<compile_context>
chip_gen: v7x
topology: tpu7x:2x2x1
jax: 0.10.0
libtpu: 0.0.40
codegen_flags: <defaults>
</compile_context>

<pallas_src>
import functools

import jax
import jax.numpy as jnp
from jax import lax
from jax.experimental import pallas as pl
from jax.experimental.pallas import tpu as pltpu


LANE = 128                       # TPU lane width: channel dims padded to this
_MM_DTYPE = jnp.float32          # set to jnp.bfloat16 for the v6e/v7x fast MXU path
_PAR1 = pltpu.CompilerParams(dimension_semantics=("parallel",))


def _round_up(n, m):
    return (n + m - 1) // m * m


def _pick_row_tile(rows, cap=1024):
    for t in (1024, 512, 256, 128, 64, 32, 16, 8):
        if t <= cap and t <= rows and rows % t == 0:
            return t
    return rows


# ----------------------------- Pallas kernels ------------------------------


def _bn_relu_kernel(x_ref, s_ref, b_ref, o_ref):
    # x: (TM, CP); scale/bias: (1, CP) -> lane-wise affine + ReLU on the VPU.
    o_ref[...] = jnp.maximum(x_ref[...] * s_ref[...] + b_ref[...],
                             0.0).astype(o_ref.dtype)


def _conv_taps_kernel(x_ref, w_ref, o_ref, *, taps, cin):
    # x: (1, HP, WP, CT) haloed activation tile (space-to-depth'd when stride=2)
    # w: (9, CP, COP) resident weights.  9 taps = 9 static slices + MXU dots.
    _, OH, OW, COP = o_ref.shape
    x = x_ref[0]
    acc = None
    for k, (ro, co, cho) in enumerate(taps):
        a = x[ro:ro + OH, co:co + OW, cho:cho + cin].reshape(OH * OW, cin)
        d = jnp.dot(a.astype(_MM_DTYPE), w_ref[k].astype(_MM_DTYPE),
                    preferred_element_type=jnp.float32)
        acc = d if acc is None else acc + d
    o_ref[0] = acc.reshape(OH, OW, COP).astype(o_ref.dtype)


def _conv_taps_sc_kernel(x_ref, w_ref, ws_ref, o_ref, sc_ref, *, taps, sc_tap, cin):
    # Same as above, plus the strided 1x1 shortcut conv computed as one extra tap
    # from the same resident input tile (second output -> no extra HBM read of a1).
    _, OH, OW, COP = o_ref.shape
    x = x_ref[0]
    acc = None
    for k, (ro, co, cho) in enumerate(taps):
        a = x[ro:ro + OH, co:co + OW, cho:cho + cin].reshape(OH * OW, cin)
        d = jnp.dot(a.astype(_MM_DTYPE), w_ref[k].astype(_MM_DTYPE),
                    preferred_element_type=jnp.float32)
        acc = d if acc is None else acc + d
    o_ref[0] = acc.reshape(OH, OW, COP).astype(o_ref.dtype)

    ro, co, cho = sc_tap
    s = x[ro:ro + OH, co:co + OW, cho:cho + cin].reshape(OH * OW, cin)
    sc = jnp.dot(s.astype(_MM_DTYPE), ws_ref[...].astype(_MM_DTYPE),
                 preferred_element_type=jnp.float32)
    sc_ref[0] = sc.reshape(OH, OW, COP).astype(sc_ref.dtype)


def _conv_bn_res_kernel(h_ref, s_ref, b_ref, w_ref, r_ref, o_ref):
    # out = conv3x3(relu(bn(h)), w) + residual, all fused:
    #  - BN+ReLU applied to the haloed tile in VMEM (prologue, VPU),
    #  - halo ring re-zeroed so zero-padding semantics hold for any bias,
    #  - accumulator initialized from the residual (no zero tensor from HBM).
    _, OH, OW, COP = o_ref.shape
    hp = h_ref[0].astype(jnp.float32)                       # (OH+2, OW+2, COP)
    a2 = jnp.maximum(hp * s_ref[...] + b_ref[...], 0.0)
    row = lax.broadcasted_iota(jnp.int32, a2.shape, 0)
    col = lax.broadcasted_iota(jnp.int32, a2.shape, 1)
    inside = (row >= 1) & (row <= OH) & (col >= 1) & (col <= OW)
    a2 = jnp.where(inside, a2, 0.0)

    acc = r_ref[0].reshape(OH * OW, COP).astype(jnp.float32)
    for k in range(9):
        dy, dx = k // 3, k % 3
        a = a2[dy:dy + OH, dx:dx + OW, :].reshape(OH * OW, COP)
        acc = acc + jnp.dot(a.astype(_MM_DTYPE), w_ref[k].astype(_MM_DTYPE),
                            preferred_element_type=jnp.float32)
    o_ref[0] = acc.reshape(OH, OW, COP).astype(o_ref.dtype)


# ------------------------------ JAX wrappers -------------------------------


def bn_relu(x, scale, bias):
    """x: (N, H, W, CP) channel-padded NHWC; scale/bias: (CP,)."""
    N, H, W, CP = x.shape
    rows = N * H * W
    tm = _pick_row_tile(rows)
    x2 = x.reshape(rows, CP)
    out = pl.pallas_call(
        _bn_relu_kernel,
        out_shape=jax.ShapeDtypeStruct((rows, CP), x.dtype),
        grid=(rows // tm,),
        in_specs=[pl.BlockSpec((tm, CP), lambda i: (i, 0)),
                  pl.BlockSpec((1, CP), lambda i: (0, 0)),
                  pl.BlockSpec((1, CP), lambda i: (0, 0))],
        out_specs=pl.BlockSpec((tm, CP), lambda i: (i, 0)),
        compiler_params=_PAR1,
    )(x2, scale.reshape(1, CP), bias.reshape(1, CP))
    return out.reshape(N, H, W, CP)


def _pad_input(a, stride):
    """Spatial zero-pad; for stride 2, space-to-depth the padded tensor so the
    strided conv becomes 9 unstrided taps over a 4x-channel tile (1x HBM traffic)."""
    N, H, W, CP = a.shape
    ap = jnp.pad(a, ((0, 0), (1, 1), (1, 1), (0, 0)))
    if stride == 1:
        return ap
    OH, OW = H // 2, W // 2
    ap = ap.reshape(N, OH + 1, 2, OW + 1, 2, CP)
    ap = ap.transpose(0, 1, 3, 2, 4, 5).reshape(N, OH + 1, OW + 1, 4 * CP)
    return ap


def _tap_offsets(stride, cp):
    taps = []
    for dy in range(3):
        for dx in range(3):
            if stride == 1:
                taps.append((dy, dx, 0))
            else:
                taps.append((dy // 2, dx // 2, ((dy % 2) * 2 + (dx % 2)) * cp))
    return tuple(taps)


def conv3x3(a, w9, *, stride, ws=None):
    """3x3 conv (pad 1, stride 1 or 2) over channel-padded NHWC `a`.
    w9: (9, CP, COP).  If ws (CP, COP) is given, also returns the strided 1x1
    shortcut conv, computed from the same resident input tile."""
    N, H, W, CP = a.shape
    COP = w9.shape[-1]
    OH, OW = H // stride, W // stride
    ap = _pad_input(a, stride)
    _, HPt, WPt, CT = ap.shape
    taps = _tap_offsets(stride, CP)
    itemsize = a.dtype.itemsize
    flops = 2 * N * OH * OW * 9 * CP * COP
    bytes_acc = (ap.size + w9.size + N * OH * OW * COP) * itemsize

    if ws is None:
        return pl.pallas_call(
            functools.partial(_conv_taps_kernel, taps=taps, cin=CP),
            out_shape=jax.ShapeDtypeStruct((N, OH, OW, COP), a.dtype),
            grid=(N,),
            in_specs=[pl.BlockSpec((1, HPt, WPt, CT), lambda n: (n, 0, 0, 0)),
                      pl.BlockSpec((9, CP, COP), lambda n: (0, 0, 0))],
            out_specs=pl.BlockSpec((1, OH, OW, COP), lambda n: (n, 0, 0, 0)),
            compiler_params=_PAR1,
            cost_estimate=pl.CostEstimate(flops=flops, transcendentals=0,
                                          bytes_accessed=bytes_acc),
        )(ap, w9)

    sc_tap = (1, 1, 0) if stride == 1 else (0, 0, 3 * CP)
    flops += 2 * N * OH * OW * CP * COP
    bytes_acc += (ws.size + N * OH * OW * COP) * itemsize
    return pl.pallas_call(
        functools.partial(_conv_taps_sc_kernel, taps=taps, sc_tap=sc_tap, cin=CP),
        out_shape=(jax.ShapeDtypeStruct((N, OH, OW, COP), a.dtype),
                   jax.ShapeDtypeStruct((N, OH, OW, COP), a.dtype)),
        grid=(N,),
        in_specs=[pl.BlockSpec((1, HPt, WPt, CT), lambda n: (n, 0, 0, 0)),
                  pl.BlockSpec((9, CP, COP), lambda n: (0, 0, 0)),
                  pl.BlockSpec((CP, COP), lambda n: (0, 0))],
        out_specs=(pl.BlockSpec((1, OH, OW, COP), lambda n: (n, 0, 0, 0)),
                   pl.BlockSpec((1, OH, OW, COP), lambda n: (n, 0, 0, 0))),
        compiler_params=_PAR1,
        cost_estimate=pl.CostEstimate(flops=flops, transcendentals=0,
                                      bytes_accessed=bytes_acc),
    )(ap, w9, ws)


def conv3x3_bn_res(h, scale, bias, w9, res):
    """out = conv3x3(relu(bn(h)), w9) + res, with BN+ReLU and residual fused."""
    N, OH, OW, COP = h.shape
    hp = jnp.pad(h, ((0, 0), (1, 1), (1, 1), (0, 0)))
    itemsize = h.dtype.itemsize
    flops = 2 * N * OH * OW * 9 * COP * COP
    bytes_acc = (hp.size + w9.size + 2 * N * OH * OW * COP) * itemsize
    return pl.pallas_call(
        _conv_bn_res_kernel,
        out_shape=jax.ShapeDtypeStruct((N, OH, OW, COP), h.dtype),
        grid=(N,),
        in_specs=[pl.BlockSpec((1, OH + 2, OW + 2, COP), lambda n: (n, 0, 0, 0)),
                  pl.BlockSpec((1, 1, COP), lambda n: (0, 0, 0)),
                  pl.BlockSpec((1, 1, COP), lambda n: (0, 0, 0)),
                  pl.BlockSpec((9, COP, COP), lambda n: (0, 0, 0)),
                  pl.BlockSpec((1, OH, OW, COP), lambda n: (n, 0, 0, 0))],
        out_specs=pl.BlockSpec((1, OH, OW, COP), lambda n: (n, 0, 0, 0)),
        compiler_params=_PAR1,
        cost_estimate=pl.CostEstimate(flops=flops, transcendentals=0,
                                      bytes_accessed=bytes_acc),
    )(hp, scale.reshape(1, 1, COP), bias.reshape(1, 1, COP), w9, res)


# --------------------------- Module equivalents ----------------------------


def _pad_w9(w, cp_in, cp_out):
    kh, kw, ci, co = w.shape
    wp = jnp.zeros((kh, kw, cp_in, cp_out), w.dtype).at[:, :, :ci, :co].set(w)
    return wp.reshape(kh * kw, cp_in, cp_out)


class BasicBlockPallas:
    """Pre-activation WRN BasicBlock over channel-padded NHWC.
    __call__(x) -> (out, q) with q = relu(bn1(x))."""
    # TODO(synk): exact `block` class from remodel.py is not provided; this is a
    #             standard pre-activation WideResNet BasicBlock, q = relu(bn1(x)).

    def __init__(self, in_planes, out_planes, stride, idx, key):
        del idx
        self.in_planes, self.out_planes, self.stride = in_planes, out_planes, stride
        self.equal = (in_planes == out_planes) and (stride == 1)
        self.cp_in = _round_up(in_planes, LANE)
        self.cp_out = _round_up(out_planes, LANE)
        k1, k2, k3 = jax.random.split(key, 3)
        w1 = jax.random.normal(k1, (3, 3, in_planes, out_planes), jnp.float32) \
            * (2.0 / (9 * in_planes)) ** 0.5
        w2 = jax.random.normal(k2, (3, 3, out_planes, out_planes), jnp.float32) \
            * (2.0 / (9 * out_planes)) ** 0.5
        self.w1 = _pad_w9(w1, self.cp_in, self.cp_out)
        self.w2 = _pad_w9(w2, self.cp_out, self.cp_out)
        if not self.equal:
            ws = jax.random.normal(k3, (in_planes, out_planes), jnp.float32) \
                * (1.0 / in_planes) ** 0.5
            self.ws = jnp.zeros((self.cp_in, self.cp_out), jnp.float32) \
                .at[:in_planes, :out_planes].set(ws)
        else:
            self.ws = None
        eps = 1e-5
        # Eval-mode BN (mean=0, var=1, gamma=1, beta=0) folded to scale/bias.
        # Padded channels get scale=bias=0 so they stay exactly zero end-to-end.
        self.bn1_scale = jnp.zeros((self.cp_in,), jnp.float32) \
            .at[:in_planes].set(1.0 / (1.0 + eps) ** 0.5)
        self.bn1_bias = jnp.zeros((self.cp_in,), jnp.float32)
        self.bn2_scale = jnp.zeros((self.cp_out,), jnp.float32) \
            .at[:out_planes].set(1.0 / (1.0 + eps) ** 0.5)
        self.bn2_bias = jnp.zeros((self.cp_out,), jnp.float32)

    def __call__(self, x):
        a1 = bn_relu(x, self.bn1_scale, self.bn1_bias)          # q
        if self.equal:
            h = conv3x3(a1, self.w1, stride=1)
            shortcut = x
        else:
            h, shortcut = conv3x3(a1, self.w1, stride=self.stride, ws=self.ws)
        out = conv3x3_bn_res(h, self.bn2_scale, self.bn2_bias, self.w2, shortcut)
        return out, a1


def _to_nchw(x, channels):
    return jnp.transpose(x[..., :channels], (0, 3, 1, 2))


class NetworkBlockPallas:
    """Mirrors NetworkBlock.forward: returns (out, outs, ys), all NCHW."""

    def __init__(self, nb_layers, in_planes, out_planes, stride, pos, key):
        self.layers = []
        for i in range(int(nb_layers)):
            _in = in_planes if i == 0 else out_planes
            _st = stride if i == 0 else 1
            key, sub = jax.random.split(key)
            self.layers.append(BasicBlockPallas(_in, out_planes, _st, i + pos, sub))

    def __call__(self, x_nchw):
        N, C, H, W = x_nchw.shape
        cp = _round_up(C, LANE)
        # NCHW -> NHWC once, pad channels to the 128-lane width once; the whole
        # compute chain then stays channel-padded NHWC (transposes only at the
        # returned-tensor boundary).
        out = jnp.pad(jnp.transpose(x_nchw, (0, 2, 3, 1)),
                      ((0, 0), (0, 0), (0, 0), (0, cp - C)))
        outs, ys = [], []
        for op in self.layers:
            out, q = op(out)
            outs.append(_to_nchw(q, op.in_planes))
            ys.append(_to_nchw(out, op.out_planes))
        return ys[-1], outs, ys


# ----------------------- pure-JAX reference (for checks) --------------------


def _ref_forward(x_nchw, net):
    dn = ("NHWC", "HWIO", "NHWC")
    prec = lax.Precision.HIGHEST
    out = jnp.transpose(x_nchw, (0, 2, 3, 1))
    outs, ys = [], []
    for blk in net.layers:
        ip, op = blk.in_planes, blk.out_planes
        s1, b1 = blk.bn1_scale[:ip], blk.bn1_bias[:ip]
        s2, b2 = blk.bn2_scale[:op], blk.bn2_bias[:op]
        w1 = blk.w1.reshape(3, 3, blk.cp_in, blk.cp_out)[:, :, :ip, :op]
        w2 = blk.w2.reshape(3, 3, blk.cp_out, blk.cp_out)[:, :, :op, :op]
        a1 = jnp.maximum(out * s1 + b1, 0.0)
        h = lax.conv_general_dilated(a1, w1, (blk.stride, blk.stride),
                                     ((1, 1), (1, 1)), dimension_numbers=dn,
                                     precision=prec)
        a2 = jnp.maximum(h * s2 + b2, 0.0)
        if blk.equal:
            sc = out
        else:
            sc = lax.conv_general_dilated(a1, blk.ws[:ip, :op][None, None],
                                          (blk.stride, blk.stride), "VALID",
                                          dimension_numbers=dn, precision=prec)
        out = lax.conv_general_dilated(a2, w2, (1, 1), ((1, 1), (1, 1)),
                                       dimension_numbers=dn, precision=prec) + sc
        outs.append(jnp.transpose(a1, (0, 3, 1, 2)))
        ys.append(jnp.transpose(out, (0, 3, 1, 2)))
    return ys[-1], outs, ys


# ----------------------------------- main -----------------------------------

if __name__ == "__main__":
    key = jax.random.PRNGKey(0)
    kx, kp = jax.random.split(key)
    # NCHW input, matching the PyTorch module's convention.
    x = jax.random.normal(kx, (2, 4, 16, 16), jnp.float32)

    net = NetworkBlockPallas(nb_layers=2, in_planes=4, out_planes=8,
                             stride=2, pos=0, key=kp)
    fwd = jax.jit(net.__call__)
    out, outs, ys = fwd(x)

    jax.block_until_ready(out)
    for t in outs + ys:
        jax.block_until_ready(t)

    assert out.shape == (2, 8, 8, 8)
    assert outs[0].shape == (2, 4, 16, 16) and outs[1].shape == (2, 8, 8, 8)
    assert ys[0].shape == (2, 8, 8, 8) and ys[1].shape == (2, 8, 8, 8)

    # Cross-check against a pure-JAX (lax.conv) reference of the same block.
    r_out, r_outs, r_ys = _ref_forward(x, net)
    for got, want in [(out, r_out)] + list(zip(outs, r_outs)) + list(zip(ys, r_ys)):
        assert jnp.allclose(got, want, rtol=2e-2, atol=2e-2), \
            float(jnp.max(jnp.abs(got - want)))

    print("KERNEL_OK")
</pallas_src>

<mosaic_0001>
module attributes {stable_mosaic.version = 11 : i64} {
  func.func @_bn_relu_kernel(%arg0: i32, %arg1: memref<512x128xf32, #tpu.memory_space<vmem>>, %arg2: memref<1x128xf32, #tpu.memory_space<vmem>>, %arg3: memref<1x128xf32, #tpu.memory_space<vmem>>, %arg4: memref<512x128xf32, #tpu.memory_space<vmem>>) attributes {dimension_semantics = [#tpu.dimension_semantics<parallel>], iteration_bounds = array<i64: 1>, scalar_prefetch = 0 : i64, scratch_operands = 0 : i64, tpu.core_type = #tpu.core_type<tc>, window_params = [{transform_indices = @transform_0, window_bounds = array<i64: 512, 128>}, {pipeline_mode = #tpu.pipeline_mode<synchronous>, transform_indices = @transform_1, window_bounds = array<i64: 1, 128>}, {pipeline_mode = #tpu.pipeline_mode<synchronous>, transform_indices = @transform_2, window_bounds = array<i64: 1, 128>}, {transform_indices = @transform_3, window_bounds = array<i64: 512, 128>}]} {
    %c0 = arith.constant 0 : index
    %c0_0 = arith.constant 0 : index
    %0 = vector.load %arg1[%c0, %c0_0] : memref<512x128xf32, #tpu.memory_space<vmem>>, vector<512x128xf32>
    %c0_1 = arith.constant 0 : index
    %c0_2 = arith.constant 0 : index
    %1 = vector.load %arg2[%c0_1, %c0_2] : memref<1x128xf32, #tpu.memory_space<vmem>>, vector<1x128xf32>
    %2 = vector.broadcast %1 : vector<1x128xf32> to vector<512x128xf32>
    %3 = arith.mulf %0, %2 : vector<512x128xf32>
    %c0_3 = arith.constant 0 : index
    %c0_4 = arith.constant 0 : index
    %4 = vector.load %arg3[%c0_3, %c0_4] : memref<1x128xf32, #tpu.memory_space<vmem>>, vector<1x128xf32>
    %5 = vector.broadcast %4 : vector<1x128xf32> to vector<512x128xf32>
    %6 = arith.addf %3, %5 : vector<512x128xf32>
    %cst = arith.constant 0.000000e+00 : f32
    %7 = vector.broadcast %cst : f32 to vector<512x128xf32>
    %8 = arith.maximumf %6, %7 : vector<512x128xf32>
    %c0_5 = arith.constant 0 : index
    %c0_6 = arith.constant 0 : index
    %9 = vector.load %arg4[%c0_5, %c0_6] : memref<512x128xf32, #tpu.memory_space<vmem>>, vector<512x128xf32>
    tpu.vector_store %arg4[%c0_5, %c0_6], %8 {strides = array<i32>} : memref<512x128xf32, #tpu.memory_space<vmem>>, vector<512x128xf32>,
    return
  }
  func.func @transform_0(%arg0: i32) -> (i32, i32) {
    %c0_i32 = arith.constant 0 : i32
    %c0_i32_0 = arith.constant 0 : i32
    return %arg0, %c0_i32 : i32, i32
  }
  func.func @transform_1(%arg0: i32) -> (i32, i32) {
    %c0_i32 = arith.constant 0 : i32
    %c0_i32_0 = arith.constant 0 : i32
    %c0_i32_1 = arith.constant 0 : i32
    return %c0_i32, %c0_i32_0 : i32, i32
  }
  func.func @transform_2(%arg0: i32) -> (i32, i32) {
    %c0_i32 = arith.constant 0 : i32
    %c0_i32_0 = arith.constant 0 : i32
    %c0_i32_1 = arith.constant 0 : i32
    return %c0_i32, %c0_i32_0 : i32, i32
  }
  func.func @transform_3(%arg0: i32) -> (i32, i32) {
    %c0_i32 = arith.constant 0 : i32
    %c0_i32_0 = arith.constant 0 : i32
    return %arg0, %c0_i32 : i32, i32
  }
}

module attributes {stable_mosaic.version = 11 : i64} {
  func.func @_conv_taps_sc_kernel(%arg0: i32, %arg1: memref<1x9x9x512xf32, #tpu.memory_space<vmem>>, %arg2: memref<9x128x128xf32, #tpu.memory_space<vmem>>, %arg3: memref<128x128xf32, #tpu.memory_space<vmem>>, %arg4: memref<1x8x8x128xf32, #tpu.memory_space<vmem>>, %arg5: memref<1x8x8x128xf32, #tpu.memory_space<vmem>>) attributes {dimension_semantics = [#tpu.dimension_semantics<parallel>], iteration_bounds = array<i64: 2>, scalar_prefetch = 0 : i64, scratch_operands = 0 : i64, tpu.core_type = #tpu.core_type<tc>, window_params = [{transform_indices = @transform_0, window_bounds = array<i64: 1, 9, 9, 512>}, {pipeline_mode = #tpu.pipeline_mode<synchronous>, transform_indices = @transform_1, window_bounds = array<i64: 9, 128, 128>}, {pipeline_mode = #tpu.pipeline_mode<synchronous>, transform_indices = @transform_2, window_bounds = array<i64: 128, 128>}, {transform_indices = @transform_3, window_bounds = array<i64: 1, 8, 8, 128>}, {transform_indices = @transform_4, window_bounds = array<i64: 1, 8, 8, 128>}]} {
    %c0 = arith.constant 0 : index
    %c0_0 = arith.constant 0 : index
    %c0_1 = arith.constant 0 : index
    %c0_2 = arith.constant 0 : index
    %0 = vector.load %arg1[%c0, %c0_0, %c0_1, %c0_2] : memref<1x9x9x512xf32, #tpu.memory_space<vmem>>, vector<1x9x9x512xf32>
    %1 = vector.shape_cast %0 : vector<1x9x9x512xf32> to vector<9x9x512xf32>
    %2 = vector.extract_strided_slice %1 {offsets = [0, 0, 0], sizes = [8, 8, 128], strides = [1, 1, 1]} : vector<9x9x512xf32> to vector<8x8x128xf32>
    %3 = vector.shape_cast %2 : vector<8x8x128xf32> to vector<64x128xf32>
    %c0_3 = arith.constant 0 : index
    %c0_4 = arith.constant 0 : index
    %c0_5 = arith.constant 0 : index
    %4 = vector.load %arg2[%c0_3, %c0_4, %c0_5] : memref<9x128x128xf32, #tpu.memory_space<vmem>>, vector<1x128x128xf32>
    %5 = vector.shape_cast %4 : vector<1x128x128xf32> to vector<128x128xf32>
    %cst = arith.constant dense<0.000000e+00> : vector<64x128xf32>
    %6 = tpu.matmul %3, %5, %cst {dimension_numbers = #tpu.dot_dimension_numbers<[1], [0], [0], [1], [0, 0, 1, 1], [], []>} : vector<64x128xf32>, vector<128x128xf32>, vector<64x128xf32> -> vector<64x128xf32>
    %7 = vector.extract_strided_slice %1 {offsets = [0, 0, 128], sizes = [8, 8, 128], strides = [1, 1, 1]} : vector<9x9x512xf32> to vector<8x8x128xf32>
    %8 = vector.shape_cast %7 : vector<8x8x128xf32> to vector<64x128xf32>
    %c1 = arith.constant 1 : index
    %c0_6 = arith.constant 0 : index
    %c0_7 = arith.constant 0 : index
    %9 = vector.load %arg2[%c1, %c0_6, %c0_7] : memref<9x128x128xf32, #tpu.memory_space<vmem>>, vector<1x128x128xf32>
    %10 = vector.shape_cast %9 : vector<1x128x128xf32> to vector<128x128xf32>
    %cst_8 = arith.constant dense<0.000000e+00> : vector<64x128xf32>
    %11 = tpu.matmul %8, %10, %cst_8 {dimension_numbers = #tpu.dot_dimension_numbers<[1], [0], [0], [1], [0, 0, 1, 1], [], []>} : vector<64x128xf32>, vector<128x128xf32>, vector<64x128xf32> -> vector<64x128xf32>
    %12 = arith.addf %6, %11 : vector<64x128xf32>
    %13 = vector.extract_strided_slice %1 {offsets = [0, 1, 0], sizes = [8, 8, 128], strides = [1, 1, 1]} : vector<9x9x512xf32> to vector<8x8x128xf32>
    %14 = vector.shape_cast %13 : vector<8x8x128xf32> to vector<64x128xf32>
    %c2 = arith.constant 2 : index
    %c0_9 = arith.constant 0 : index
    %c0_10 = arith.constant 0 : index
    %15 = vector.load %arg2[%c2, %c0_9, %c0_10] : memref<9x128x128xf32, #tpu.memory_space<vmem>>, vector<1x128x128xf32>
    %16 = vector.shape_cast %15 : vector<1x128x128xf32> to vector<128x128xf32>
    %cst_11 = arith.constant dense<0.000000e+00> : vector<64x128xf32>
    %17 = tpu.matmul %14, %16, %cst_11 {dimension_numbers = #tpu.dot_dimension_numbers<[1], [0], [0], [1], [0, 0, 1, 1], [], []>} : vector<64x128xf32>, vector<128x128xf32>, vector<64x128xf32> -> vector<64x128xf32>
    %18 = arith.addf %12, %17 : vector<64x128xf32>
    %19 = vector.extract_strided_slice %1 {offsets = [0, 0, 256], sizes = [8, 8, 128], strides = [1, 1, 1]} : vector<9x9x512xf32> to vector<8x8x128xf32>
    %20 = vector.shape_cast %19 : vector<8x8x128xf32> to vector<64x128xf32>
    %c3 = arith.constant 3 : index
    %c0_12 = arith.constant 0 : index
    %c0_13 = arith.constant 0 : index
    %21 = vector.load %arg2[%c3, %c0_12, %c0_13] : memref<9x128x128xf32, #tpu.memory_space<vmem>>, vector<1x128x128xf32>
    %22 = vector.shape_cast %21 : vector<1x128x128xf32> to vector<128x128xf32>
    %cst_14 = arith.constant dense<0.000000e+00> : vector<64x128xf32>
    %23 = tpu.matmul %20, %22, %cst_14 {dimension_numbers = #tpu.dot_dimension_numbers<[1], [0], [0], [1], [0, 0, 1, 1], [], []>} : vector<64x128xf32>, vector<128x128xf32>, vector<64x128xf32> -> vector<64x128xf32>
    %24 = arith.addf %18, %23 : vector<64x128xf32>
    %25 = vector.extract_strided_slice %1 {offsets = [0, 0, 384], sizes = [8, 8, 128], strides = [1, 1, 1]} : vector<9x9x512xf32> to vector<8x8x128xf32>
    %26 = vector.shape_cast %25 : vector<8x8x128xf32> to vector<64x128xf32>
    %c4 = arith.constant 4 : index
    %c0_15 = arith.constant 0 : index
    %c0_16 = arith.constant 0 : index
    %27 = vector.load %arg2[%c4, %c0_15, %c0_16] : memref<9x128x128xf32, #tpu.memory_space<vmem>>, vector<1x128x128xf32>
    %28 = vector.shape_cast %27 : vector<1x128x128xf32> to vector<128x128xf32>
    %cst_17 = arith.constant dense<0.000000e+00> : vector<64x128xf32>
    %29 = tpu.matmul %26, %28, %cst_17 {dimension_numbers = #tpu.dot_dimension_numbers<[1], [0], [0], [1], [0, 0, 1, 1], [], []>} : vector<64x128xf32>, vector<128x128xf32>, vector<64x128xf32> -> vector<64x128xf32>
    %30 = arith.addf %24, %29 : vector<64x128xf32>
    %31 = vector.extract_strided_slice %1 {offsets = [0, 1, 256], sizes = [8, 8, 128], strides = [1, 1, 1]} : vector<9x9x512xf32> to vector<8x8x128xf32>
    %32 = vector.shape_cast %31 : vector<8x8x128xf32> to vector<64x128xf32>
    %c5 = arith.constant 5 : index
    %c0_18 = arith.constant 0 : index
    %c0_19 = arith.constant 0 : index
    %33 = vector.load %arg2[%c5, %c0_18, %c0_19] : memref<9x128x128xf32, #tpu.memory_space<vmem>>, vector<1x128x128xf32>
    %34 = vector.shape_cast %33 : vector<1x128x128xf32> to vector<128x128xf32>
    %cst_20 = arith.constant dense<0.000000e+00> : vector<64x128xf32>
    %35 = tpu.matmul %32, %34, %cst_20 {dimension_numbers = #tpu.dot_dimension_numbers<[1], [0], [0], [1], [0, 0, 1, 1], [], []>} : vector<64x128xf32>, vector<128x128xf32>, vector<64x128xf32> -> vector<64x128xf32>
    %36 = arith.addf %30, %35 : vector<64x128xf32>
    %37 = vector.extract_strided_slice %1 {offsets = [1, 0, 0], sizes = [8, 8, 128], strides = [1, 1, 1]} : vector<9x9x512xf32> to vector<8x8x128xf32>
    %38 = vector.shape_cast %37 : vector<8x8x128xf32> to vector<64x128xf32>
    %c6 = arith.constant 6 : index
    %c0_21 = arith.constant 0 : index
    %c0_22 = arith.constant 0 : index
    %39 = vector.load %arg2[%c6, %c0_21, %c0_22] : memref<9x128x128xf32, #tpu.memory_space<vmem>>, vector<1x128x128xf32>
    %40 = vector.shape_cast %39 : vector<1x128x128xf32> to vector<128x128xf32>
    %cst_23 = arith.constant dense<0.000000e+00> : vector<64x128xf32>
    %41 = tpu.matmul %38, %40, %cst_23 {dimension_numbers = #tpu.dot_dimension_numbers<[1], [0], [0], [1], [0, 0, 1, 1], [], []>} : vector<64x128xf32>, vector<128x128xf32>, vector<64x128xf32> -> vector<64x128xf32>
    %42 = arith.addf %36, %41 : vector<64x128xf32>
    %43 = vector.extract_strided_slice %1 {offsets = [1, 0, 128], sizes = [8, 8, 128], strides = [1, 1, 1]} : vector<9x9x512xf32> to vector<8x8x128xf32>
    %44 = vector.shape_cast %43 : vector<8x8x128xf32> to vector<64x128xf32>
    %c7 = arith.constant 7 : index
    %c0_24 = arith.constant 0 : index
    %c0_25 = arith.constant 0 : index
    %45 = vector.load %arg2[%c7, %c0_24, %c0_25] : memref<9x128x128xf32, #tpu.memory_space<vmem>>, vector<1x128x128xf32>
    %46 = vector.shape_cast %45 : vector<1x128x128xf32> to vector<128x128xf32>
    %cst_26 = arith.constant dense<0.000000e+00> : vector<64x128xf32>
    %47 = tpu.matmul %44, %46, %cst_26 {dimension_numbers = #tpu.dot_dimension_numbers<[1], [0], [0], [1], [0, 0, 1, 1], [], []>} : vector<64x128xf32>, vector<128x128xf32>, vector<64x128xf32> -> vector<64x128xf32>
    %48 = arith.addf %42, %47 : vector<64x128xf32>
    %49 = vector.extract_strided_slice %1 {offsets = [1, 1, 0], sizes = [8, 8, 128], strides = [1, 1, 1]} : vector<9x9x512xf32> to vector<8x8x128xf32>
    %50 = vector.shape_cast %49 : vector<8x8x128xf32> to vector<64x128xf32>
    %c8 = arith.constant 8 : index
    %c0_27 = arith.constant 0 : index
    %c0_28 = arith.constant 0 : index
    %51 = vector.load %arg2[%c8, %c0_27, %c0_28] : memref<9x128x128xf32, #tpu.memory_space<vmem>>, vector<1x128x128xf32>
    %52 = vector.shape_cast %51 : vector<1x128x128xf32> to vector<128x128xf32>
    %cst_29 = arith.constant dense<0.000000e+00> : vector<64x128xf32>
    %53 = tpu.matmul %50, %52, %cst_29 {dimension_numbers = #tpu.dot_dimension_numbers<[1], [0], [0], [1], [0, 0, 1, 1], [], []>} : vector<64x128xf32>, vector<128x128xf32>, vector<64x128xf32> -> vector<64x128xf32>
    %54 = arith.addf %48, %53 : vector<64x128xf32>
    %55 = vector.shape_cast %54 : vector<64x128xf32> to vector<8x8x128xf32>
    %c0_30 = arith.constant 0 : index
    %c0_31 = arith.constant 0 : index
    %c0_32 = arith.constant 0 : index
    %c0_33 = arith.constant 0 : index
    %56 = vector.load %arg4[%c0_30, %c0_31, %c0_32, %c0_33] : memref<1x8x8x128xf32, #tpu.memory_space<vmem>>, vector<1x8x8x128xf32>
    %57 = vector.shape_cast %56 : vector<1x8x8x128xf32> to vector<8x8x128xf32>
    %58 = vector.shape_cast %55 : vector<8x8x128xf32> to vector<1x8x8x128xf32>
    tpu.vector_store %arg4[%c0_30, %c0_31, %c0_32, %c0_33], %58 {strides = array<i32>} : memref<1x8x8x128xf32, #tpu.memory_space<vmem>>, vector<1x8x8x128xf32>,
    %59 = vector.extract_strided_slice %1 {offsets = [0, 0, 384], sizes = [8, 8, 128], strides = [1, 1, 1]} : vector<9x9x512xf32> to vector<8x8x128xf32>
    %60 = vector.shape_cast %59 : vector<8x8x128xf32> to vector<64x128xf32>
    %c0_34 = arith.constant 0 : index
    %c0_35 = arith.constant 0 : index
    %61 = vector.load %arg3[%c0_34, %c0_35] : memref<128x128xf32, #tpu.memory_space<vmem>>, vector<128x128xf32>
    %cst_36 = arith.constant dense<0.000000e+00> : vector<64x128xf32>
    %62 = tpu.matmul %60, %61, %cst_36 {dimension_numbers = #tpu.dot_dimension_numbers<[1], [0], [0], [1], [0, 0, 1, 1], [], []>} : vector<64x128xf32>, vector<128x128xf32>, vector<64x128xf32> -> vector<64x128xf32>
    %63 = vector.shape_cast %62 : vector<64x128xf32> to vector<8x8x128xf32>
    %c0_37 = arith.constant 0 : index
    %c0_38 = arith.constant 0 : index
    %c0_39 = arith.constant 0 : index
    %c0_40 = arith.constant 0 : index
    %64 = vector.load %arg5[%c0_37, %c0_38, %c0_39, %c0_40] : memref<1x8x8x128xf32, #tpu.memory_space<vmem>>, vector<1x8x8x128xf32>
    %65 = vector.shape_cast %64 : vector<1x8x8x128xf32> to vector<8x8x128xf32>
    %66 = vector.shape_cast %63 : vector<8x8x128xf32> to vector<1x8x8x128xf32>
    tpu.vector_store %arg5[%c0_37, %c0_38, %c0_39, %c0_40], %66 {strides = array<i32>} : memref<1x8x8x128xf32, #tpu.memory_space<vmem>>, vector<1x8x8x128xf32>,
    return
  }
  func.func @transform_0(%arg0: i32) -> (i32, i32, i32, i32) {
    %c0_i32 = arith.constant 0 : i32
    %c0_i32_0 = arith.constant 0 : i32
    %c0_i32_1 = arith.constant 0 : i32
    %c0_i32_2 = arith.constant 0 : i32
    return %arg0, %c0_i32, %c0_i32_0, %c0_i32_1 : i32, i32, i32, i32
  }
  func.func @transform_1(%arg0: i32) -> (i32, i32, i32) {
    %c0_i32 = arith.constant 0 : i32
    %c0_i32_0 = arith.constant 0 : i32
    %c0_i32_1 = arith.constant 0 : i32
    %c0_i32_2 = arith.constant 0 : i32
    return %c0_i32, %c0_i32_0, %c0_i32_1 : i32, i32, i32
  }
  func.func @transform_2(%arg0: i32) -> (i32, i32) {
    %c0_i32 = arith.constant 0 : i32
    %c0_i32_0 = arith.constant 0 : i32
    %c0_i32_1 = arith.constant 0 : i32
    return %c0_i32, %c0_i32_0 : i32, i32
  }
  func.func @transform_3(%arg0: i32) -> (i32, i32, i32, i32) {
    %c0_i32 = arith.constant 0 : i32
    %c0_i32_0 = arith.constant 0 : i32
    %c0_i32_1 = arith.constant 0 : i32
    %c0_i32_2 = arith.constant 0 : i32
    return %arg0, %c0_i32, %c0_i32_0, %c0_i32_1 : i32, i32, i32, i32
  }
  func.func @transform_4(%arg0: i32) -> (i32, i32, i32, i32) {
    %c0_i32 = arith.constant 0 : i32
    %c0_i32_0 = arith.constant 0 : i32
    %c0_i32_1 = arith.constant 0 : i32
    %c0_i32_2 = arith.constant 0 : i32
    return %arg0, %c0_i32, %c0_i32_0, %c0_i32_1 : i32, i32, i32, i32
  }
}

module attributes {stable_mosaic.version = 11 : i64} {
  func.func @_conv_bn_res_kernel(%arg0: i32, %arg1: memref<1x10x10x128xf32, #tpu.memory_space<vmem>>, %arg2: memref<1x1x128xf32, #tpu.memory_space<vmem>>, %arg3: memref<1x1x128xf32, #tpu.memory_space<vmem>>, %arg4: memref<9x128x128xf32, #tpu.memory_space<vmem>>, %arg5: memref<1x8x8x128xf32, #tpu.memory_space<vmem>>, %arg6: memref<1x8x8x128xf32, #tpu.memory_space<vmem>>) attributes {dimension_semantics = [#tpu.dimension_semantics<parallel>], iteration_bounds = array<i64: 2>, scalar_prefetch = 0 : i64, scratch_operands = 0 : i64, tpu.core_type = #tpu.core_type<tc>, window_params = [{transform_indices = @transform_0, window_bounds = array<i64: 1, 10, 10, 128>}, {pipeline_mode = #tpu.pipeline_mode<synchronous>, transform_indices = @transform_1, window_bounds = array<i64: 1, 1, 128>}, {pipeline_mode = #tpu.pipeline_mode<synchronous>, transform_indices = @transform_2, window_bounds = array<i64: 1, 1, 128>}, {pipeline_mode = #tpu.pipeline_mode<synchronous>, transform_indices = @transform_3, window_bounds = array<i64: 9, 128, 128>}, {transform_indices = @transform_4, window_bounds = array<i64: 1, 8, 8, 128>}, {transform_indices = @transform_5, window_bounds = array<i64: 1, 8, 8, 128>}]} {
    %c0 = arith.constant 0 : index
    %c0_0 = arith.constant 0 : index
    %c0_1 = arith.constant 0 : index
    %c0_2 = arith.constant 0 : index
    %0 = vector.load %arg1[%c0, %c0_0, %c0_1, %c0_2] : memref<1x10x10x128xf32, #tpu.memory_space<vmem>>, vector<1x10x10x128xf32>
    %1 = vector.shape_cast %0 : vector<1x10x10x128xf32> to vector<10x10x128xf32>
    %c0_3 = arith.constant 0 : index
    %c0_4 = arith.constant 0 : index
    %c0_5 = arith.constant 0 : index
    %2 = vector.load %arg2[%c0_3, %c0_4, %c0_5] : memref<1x1x128xf32, #tpu.memory_space<vmem>>, vector<1x1x128xf32>
    %3 = vector.broadcast %2 : vector<1x1x128xf32> to vector<10x10x128xf32>
    %4 = arith.mulf %1, %3 : vector<10x10x128xf32>
    %c0_6 = arith.constant 0 : index
    %c0_7 = arith.constant 0 : index
    %c0_8 = arith.constant 0 : index
    %5 = vector.load %arg3[%c0_6, %c0_7, %c0_8] : memref<1x1x128xf32, #tpu.memory_space<vmem>>, vector<1x1x128xf32>
    %6 = vector.broadcast %5 : vector<1x1x128xf32> to vector<10x10x128xf32>
    %7 = arith.addf %4, %6 : vector<10x10x128xf32>
    %cst = arith.constant 0.000000e+00 : f32
    %8 = vector.broadcast %cst : f32 to vector<10x10x128xf32>
    %9 = arith.maximumf %7, %8 : vector<10x10x128xf32>
    %10 = tpu.iota {dimensions = array<i32: 0>} : vector<10x10x128xi32>
    %11 = tpu.iota {dimensions = array<i32: 1>} : vector<10x10x128xi32>
    %c1_i32 = arith.constant 1 : i32
    %12 = vector.broadcast %c1_i32 : i32 to vector<10x10x128xi32>
    %13 = arith.cmpi sge, %10, %12 : vector<10x10x128xi32>
    %c8_i32 = arith.constant 8 : i32
    %14 = vector.broadcast %c8_i32 : i32 to vector<10x10x128xi32>
    %15 = arith.cmpi sle, %10, %14 : vector<10x10x128xi32>
    %16 = arith.andi %13, %15 : vector<10x10x128xi1>
    %c1_i32_9 = arith.constant 1 : i32
    %17 = vector.broadcast %c1_i32_9 : i32 to vector<10x10x128xi32>
    %18 = arith.cmpi sge, %11, %17 : vector<10x10x128xi32>
    %19 = arith.andi %16, %18 : vector<10x10x128xi1>
    %c8_i32_10 = arith.constant 8 : i32
    %20 = vector.broadcast %c8_i32_10 : i32 to vector<10x10x128xi32>
    %21 = arith.cmpi sle, %11, %20 : vector<10x10x128xi32>
    %22 = arith.andi %19, %21 : vector<10x10x128xi1>
    %cst_11 = arith.constant 0.000000e+00 : f32
    %23 = vector.broadcast %cst_11 : f32 to vector<10x10x128xf32>
    %24 = arith.select %22, %9, %23 : vector<10x10x128xi1>, vector<10x10x128xf32>
    %c0_12 = arith.constant 0 : index
    %c0_13 = arith.constant 0 : index
    %c0_14 = arith.constant 0 : index
    %c0_15 = arith.constant 0 : index
    %25 = vector.load %arg5[%c0_12, %c0_13, %c0_14, %c0_15] : memref<1x8x8x128xf32, #tpu.memory_space<vmem>>, vector<1x8x8x128xf32>
    %26 = vector.shape_cast %25 : vector<1x8x8x128xf32> to vector<8x8x128xf32>
    %27 = vector.shape_cast %26 : vector<8x8x128xf32> to vector<64x128xf32>
    %28 = vector.extract_strided_slice %24 {offsets = [0, 0, 0], sizes = [8, 8, 128], strides = [1, 1, 1]} : vector<10x10x128xf32> to vector<8x8x128xf32>
    %29 = vector.shape_cast %28 : vector<8x8x128xf32> to vector<64x128xf32>
    %c0_16 = arith.constant 0 : index
    %c0_17 = arith.constant 0 : index
    %c0_18 = arith.constant 0 : index
    %30 = vector.load %arg4[%c0_16, %c0_17, %c0_18] : memref<9x128x128xf32, #tpu.memory_space<vmem>>, vector<1x128x128xf32>
    %31 = vector.shape_cast %30 : vector<1x128x128xf32> to vector<128x128xf32>
    %cst_19 = arith.constant dense<0.000000e+00> : vector<64x128xf32>
    %32 = tpu.matmul %29, %31, %cst_19 {dimension_numbers = #tpu.dot_dimension_numbers<[1], [0], [0], [1], [0, 0, 1, 1], [], []>} : vector<64x128xf32>, vector<128x128xf32>, vector<64x128xf32> -> vector<64x128xf32>
    %33 = arith.addf %27, %32 : vector<64x128xf32>
    %34 = vector.extract_strided_slice %24 {offsets = [0, 1, 0], sizes = [8, 8, 128], strides = [1, 1, 1]} : vector<10x10x128xf32> to vector<8x8x128xf32>
    %35 = vector.shape_cast %34 : vector<8x8x128xf32> to vector<64x128xf32>
    %c1 = arith.constant 1 : index
    %c0_20 = arith.constant 0 : index
    %c0_21 = arith.constant 0 : index
    %36 = vector.load %arg4[%c1, %c0_20, %c0_21] : memref<9x128x128xf32, #tpu.memory_space<vmem>>, vector<1x128x128xf32>
    %37 = vector.shape_cast %36 : vector<1x128x128xf32> to vector<128x128xf32>
    %cst_22 = arith.constant dense<0.000000e+00> : vector<64x128xf32>
    %38 = tpu.matmul %35, %37, %cst_22 {dimension_numbers = #tpu.dot_dimension_numbers<[1], [0], [0], [1], [0, 0, 1, 1], [], []>} : vector<64x128xf32>, vector<128x128xf32>, vector<64x128xf32> -> vector<64x128xf32>
    %39 = arith.addf %33, %38 : vector<64x128xf32>
    %40 = vector.extract_strided_slice %24 {offsets = [0, 2, 0], sizes = [8, 8, 128], strides = [1, 1, 1]} : vector<10x10x128xf32> to vector<8x8x128xf32>
    %41 = vector.shape_cast %40 : vector<8x8x128xf32> to vector<64x128xf32>
    %c2 = arith.constant 2 : index
    %c0_23 = arith.constant 0 : index
    %c0_24 = arith.constant 0 : index
    %42 = vector.load %arg4[%c2, %c0_23, %c0_24] : memref<9x128x128xf32, #tpu.memory_space<vmem>>, vector<1x128x128xf32>
    %43 = vector.shape_cast %42 : vector<1x128x128xf32> to vector<128x128xf32>
    %cst_25 = arith.constant dense<0.000000e+00> : vector<64x128xf32>
    %44 = tpu.matmul %41, %43, %cst_25 {dimension_numbers = #tpu.dot_dimension_numbers<[1], [0], [0], [1], [0, 0, 1, 1], [], []>} : vector<64x128xf32>, vector<128x128xf32>, vector<64x128xf32> -> vector<64x128xf32>
    %45 = arith.addf %39, %44 : vector<64x128xf32>
    %46 = vector.extract_strided_slice %24 {offsets = [1, 0, 0], sizes = [8, 8, 128], strides = [1, 1, 1]} : vector<10x10x128xf32> to vector<8x8x128xf32>
    %47 = vector.shape_cast %46 : vector<8x8x128xf32> to vector<64x128xf32>
    %c3 = arith.constant 3 : index
    %c0_26 = arith.constant 0 : index
    %c0_27 = arith.constant 0 : index
    %48 = vector.load %arg4[%c3, %c0_26, %c0_27] : memref<9x128x128xf32, #tpu.memory_space<vmem>>, vector<1x128x128xf32>
    %49 = vector.shape_cast %48 : vector<1x128x128xf32> to vector<128x128xf32>
    %cst_28 = arith.constant dense<0.000000e+00> : vector<64x128xf32>
    %50 = tpu.matmul %47, %49, %cst_28 {dimension_numbers = #tpu.dot_dimension_numbers<[1], [0], [0], [1], [0, 0, 1, 1], [], []>} : vector<64x128xf32>, vector<128x128xf32>, vector<64x128xf32> -> vector<64x128xf32>
    %51 = arith.addf %45, %50 : vector<64x128xf32>
    %52 = vector.extract_strided_slice %24 {offsets = [1, 1, 0], sizes = [8, 8, 128], strides = [1, 1, 1]} : vector<10x10x128xf32> to vector<8x8x128xf32>
    %53 = vector.shape_cast %52 : vector<8x8x128xf32> to vector<64x128xf32>
    %c4 = arith.constant 4 : index
    %c0_29 = arith.constant 0 : index
    %c0_30 = arith.constant 0 : index
    %54 = vector.load %arg4[%c4, %c0_29, %c0_30] : memref<9x128x128xf32, #tpu.memory_space<vmem>>, vector<1x128x128xf32>
    %55 = vector.shape_cast %54 : vector<1x128x128xf32> to vector<128x128xf32>
    %cst_31 = arith.constant dense<0.000000e+00> : vector<64x128xf32>
    %56 = tpu.matmul %53, %55, %cst_31 {dimension_numbers = #tpu.dot_dimension_numbers<[1], [0], [0], [1], [0, 0, 1, 1], [], []>} : vector<64x128xf32>, vector<128x128xf32>, vector<64x128xf32> -> vector<64x128xf32>
    %57 = arith.addf %51, %56 : vector<64x128xf32>
    %58 = vector.extract_strided_slice %24 {offsets = [1, 2, 0], sizes = [8, 8, 128], strides = [1, 1, 1]} : vector<10x10x128xf32> to vector<8x8x128xf32>
    %59 = vector.shape_cast %58 : vector<8x8x128xf32> to vector<64x128xf32>
    %c5 = arith.constant 5 : index
    %c0_32 = arith.constant 0 : index
    %c0_33 = arith.constant 0 : index
    %60 = vector.load %arg4[%c5, %c0_32, %c0_33] : memref<9x128x128xf32, #tpu.memory_space<vmem>>, vector<1x128x128xf32>
    %61 = vector.shape_cast %60 : vector<1x128x128xf32> to vector<128x128xf32>
    %cst_34 = arith.constant dense<0.000000e+00> : vector<64x128xf32>
    %62 = tpu.matmul %59, %61, %cst_34 {dimension_numbers = #tpu.dot_dimension_numbers<[1], [0], [0], [1], [0, 0, 1, 1], [], []>} : vector<64x128xf32>, vector<128x128xf32>, vector<64x128xf32> -> vector<64x128xf32>
    %63 = arith.addf %57, %62 : vector<64x128xf32>
    %64 = vector.extract_strided_slice %24 {offsets = [2, 0, 0], sizes = [8, 8, 128], strides = [1, 1, 1]} : vector<10x10x128xf32> to vector<8x8x128xf32>
    %65 = vector.shape_cast %64 : vector<8x8x128xf32> to vector<64x128xf32>
    %c6 = arith.constant 6 : index
    %c0_35 = arith.constant 0 : index
    %c0_36 = arith.constant 0 : index
    %66 = vector.load %arg4[%c6, %c0_35, %c0_36] : memref<9x128x128xf32, #tpu.memory_space<vmem>>, vector<1x128x128xf32>
    %67 = vector.shape_cast %66 : vector<1x128x128xf32> to vector<128x128xf32>
    %cst_37 = arith.constant dense<0.000000e+00> : vector<64x128xf32>
    %68 = tpu.matmul %65, %67, %cst_37 {dimension_numbers = #tpu.dot_dimension_numbers<[1], [0], [0], [1], [0, 0, 1, 1], [], []>} : vector<64x128xf32>, vector<128x128xf32>, vector<64x128xf32> -> vector<64x128xf32>
    %69 = arith.addf %63, %68 : vector<64x128xf32>
    %70 = vector.extract_strided_slice %24 {offsets = [2, 1, 0], sizes = [8, 8, 128], strides = [1, 1, 1]} : vector<10x10x128xf32> to vector<8x8x128xf32>
    %71 = vector.shape_cast %70 : vector<8x8x128xf32> to vector<64x128xf32>
    %c7 = arith.constant 7 : index
    %c0_38 = arith.constant 0 : index
    %c0_39 = arith.constant 0 : index
    %72 = vector.load %arg4[%c7, %c0_38, %c0_39] : memref<9x128x128xf32, #tpu.memory_space<vmem>>, vector<1x128x128xf32>
    %73 = vector.shape_cast %72 : vector<1x128x128xf32> to vector<128x128xf32>
    %cst_40 = arith.constant dense<0.000000e+00> : vector<64x128xf32>
    %74 = tpu.matmul %71, %73, %cst_40 {dimension_numbers = #tpu.dot_dimension_numbers<[1], [0], [0], [1], [0, 0, 1, 1], [], []>} : vector<64x128xf32>, vector<128x128xf32>, vector<64x128xf32> -> vector<64x128xf32>
    %75 = arith.addf %69, %74 : vector<64x128xf32>
    %76 = vector.extract_strided_slice %24 {offsets = [2, 2, 0], sizes = [8, 8, 128], strides = [1, 1, 1]} : vector<10x10x128xf32> to vector<8x8x128xf32>
    %77 = vector.shape_cast %76 : vector<8x8x128xf32> to vector<64x128xf32>
    %c8 = arith.constant 8 : index
    %c0_41 = arith.constant 0 : index
    %c0_42 = arith.constant 0 : index
    %78 = vector.load %arg4[%c8, %c0_41, %c0_42] : memref<9x128x128xf32, #tpu.memory_space<vmem>>, vector<1x128x128xf32>
    %79 = vector.shape_cast %78 : vector<1x128x128xf32> to vector<128x128xf32>
    %cst_43 = arith.constant dense<0.000000e+00> : vector<64x128xf32>
    %80 = tpu.matmul %77, %79, %cst_43 {dimension_numbers = #tpu.dot_dimension_numbers<[1], [0], [0], [1], [0, 0, 1, 1], [], []>} : vector<64x128xf32>, vector<128x128xf32>, vector<64x128xf32> -> vector<64x128xf32>
    %81 = arith.addf %75, %80 : vector<64x128xf32>
    %82 = vector.shape_cast %81 : vector<64x128xf32> to vector<8x8x128xf32>
    %c0_44 = arith.constant 0 : index
    %c0_45 = arith.constant 0 : index
    %c0_46 = arith.constant 0 : index
    %c0_47 = arith.constant 0 : index
    %83 = vector.load %arg6[%c0_44, %c0_45, %c0_46, %c0_47] : memref<1x8x8x128xf32, #tpu.memory_space<vmem>>, vector<1x8x8x128xf32>
    %84 = vector.shape_cast %83 : vector<1x8x8x128xf32> to vector<8x8x128xf32>
    %85 = vector.shape_cast %82 : vector<8x8x128xf32> to vector<1x8x8x128xf32>
    tpu.vector_store %arg6[%c0_44, %c0_45, %c0_46, %c0_47], %85 {strides = array<i32>} : memref<1x8x8x128xf32, #tpu.memory_space<vmem>>, vector<1x8x8x128xf32>,
    return
  }
  func.func @transform_0(%arg0: i32) -> (i32, i32, i32, i32) {
    %c0_i32 = arith.constant 0 : i32
    %c0_i32_0 = arith.constant 0 : i32
    %c0_i32_1 = arith.constant 0 : i32
    %c0_i32_2 = arith.constant 0 : i32
    return %arg0, %c0_i32, %c0_i32_0, %c0_i32_1 : i32, i32, i32, i32
  }
  func.func @transform_1(%arg0: i32) -> (i32, i32, i32) {
    %c0_i32 = arith.constant 0 : i32
    %c0_i32_0 = arith.constant 0 : i32
    %c0_i32_1 = arith.constant 0 : i32
    %c0_i32_2 = arith.constant 0 : i32
    return %c0_i32, %c0_i32_0, %c0_i32_1 : i32, i32, i32
  }
  func.func @transform_2(%arg0: i32) -> (i32, i32, i32) {
    %c0_i32 = arith.constant 0 : i32
    %c0_i32_0 = arith.constant 0 : i32
    %c0_i32_1 = arith.constant 0 : i32
    %c0_i32_2 = arith.constant 0 : i32
    return %c0_i32, %c0_i32_0, %c0_i32_1 : i32, i32, i32
  }
  func.func @transform_3(%arg0: i32) -> (i32, i32, i32) {
    %c0_i32 = arith.constant 0 : i32
    %c0_i32_0 = arith.constant 0 : i32
    %c0_i32_1 = arith.constant 0 : i32
    %c0_i32_2 = arith.constant 0 : i32
    return %c0_i32, %c0_i32_0, %c0_i32_1 : i32, i32, i32
  }
  func.func @transform_4(%arg0: i32) -> (i32, i32, i32, i32) {
    %c0_i32 = arith.constant 0 : i32
    %c0_i32_0 = arith.constant 0 : i32
    %c0_i32_1 = arith.constant 0 : i32
    %c0_i32_2 = arith.constant 0 : i32
    return %arg0, %c0_i32, %c0_i32_0, %c0_i32_1 : i32, i32, i32, i32
  }
  func.func @transform_5(%arg0: i32) -> (i32, i32, i32, i32) {
    %c0_i32 = arith.constant 0 : i32
    %c0_i32_0 = arith.constant 0 : i32
    %c0_i32_1 = arith.constant 0 : i32
    %c0_i32_2 = arith.constant 0 : i32
    return %arg0, %c0_i32, %c0_i32_0, %c0_i32_1 : i32, i32, i32, i32
  }
}

module attributes {stable_mosaic.version = 11 : i64} {
  func.func @_bn_relu_kernel(%arg0: i32, %arg1: memref<128x128xf32, #tpu.memory_space<vmem>>, %arg2: memref<1x128xf32, #tpu.memory_space<vmem>>, %arg3: memref<1x128xf32, #tpu.memory_space<vmem>>, %arg4: memref<128x128xf32, #tpu.memory_space<vmem>>) attributes {dimension_semantics = [#tpu.dimension_semantics<parallel>], iteration_bounds = array<i64: 1>, scalar_prefetch = 0 : i64, scratch_operands = 0 : i64, tpu.core_type = #tpu.core_type<tc>, window_params = [{transform_indices = @transform_0, window_bounds = array<i64: 128, 128>}, {pipeline_mode = #tpu.pipeline_mode<synchronous>, transform_indices = @transform_1, window_bounds = array<i64: 1, 128>}, {pipeline_mode = #tpu.pipeline_mode<synchronous>, transform_indices = @transform_2, window_bounds = array<i64: 1, 128>}, {transform_indices = @transform_3, window_bounds = array<i64: 128, 128>}]} {
    %c0 = arith.constant 0 : index
    %c0_0 = arith.constant 0 : index
    %0 = vector.load %arg1[%c0, %c0_0] : memref<128x128xf32, #tpu.memory_space<vmem>>, vector<128x128xf32>
    %c0_1 = arith.constant 0 : index
    %c0_2 = arith.constant 0 : index
    %1 = vector.load %arg2[%c0_1, %c0_2] : memref<1x128xf32, #tpu.memory_space<vmem>>, vector<1x128xf32>
    %2 = vector.broadcast %1 : vector<1x128xf32> to vector<128x128xf32>
    %3 = arith.mulf %0, %2 : vector<128x128xf32>
    %c0_3 = arith.constant 0 : index
    %c0_4 = arith.constant 0 : index
    %4 = vector.load %arg3[%c0_3, %c0_4] : memref<1x128xf32, #tpu.memory_space<vmem>>, vector<1x128xf32>
    %5 = vector.broadcast %4 : vector<1x128xf32> to vector<128x128xf32>
    %6 = arith.addf %3, %5 : vector<128x128xf32>
    %cst = arith.constant 0.000000e+00 : f32
    %7 = vector.broadcast %cst : f32 to vector<128x128xf32>
    %8 = arith.maximumf %6, %7 : vector<128x128xf32>
    %c0_5 = arith.constant 0 : index
    %c0_6 = arith.constant 0 : index
    %9 = vector.load %arg4[%c0_5, %c0_6] : memref<128x128xf32, #tpu.memory_space<vmem>>, vector<128x128xf32>
    tpu.vector_store %arg4[%c0_5, %c0_6], %8 {strides = array<i32>} : memref<128x128xf32, #tpu.memory_space<vmem>>, vector<128x128xf32>,
    return
  }
  func.func @transform_0(%arg0: i32) -> (i32, i32) {
    %c0_i32 = arith.constant 0 : i32
    %c0_i32_0 = arith.constant 0 : i32
    return %arg0, %c0_i32 : i32, i32
  }
  func.func @transform_1(%arg0: i32) -> (i32, i32) {
    %c0_i32 = arith.constant 0 : i32
    %c0_i32_0 = arith.constant 0 : i32
    %c0_i32_1 = arith.constant 0 : i32
    return %c0_i32, %c0_i32_0 : i32, i32
  }
  func.func @transform_2(%arg0: i32) -> (i32, i32) {
    %c0_i32 = arith.constant 0 : i32
    %c0_i32_0 = arith.constant 0 : i32
    %c0_i32_1 = arith.constant 0 : i32
    return %c0_i32, %c0_i32_0 : i32, i32
  }
  func.func @transform_3(%arg0: i32) -> (i32, i32) {
    %c0_i32 = arith.constant 0 : i32
    %c0_i32_0 = arith.constant 0 : i32
    return %arg0, %c0_i32 : i32, i32
  }
}

module attributes {stable_mosaic.version = 11 : i64} {
  func.func @_conv_taps_kernel(%arg0: i32, %arg1: memref<1x10x10x128xf32, #tpu.memory_space<vmem>>, %arg2: memref<9x128x128xf32, #tpu.memory_space<vmem>>, %arg3: memref<1x8x8x128xf32, #tpu.memory_space<vmem>>) attributes {dimension_semantics = [#tpu.dimension_semantics<parallel>], iteration_bounds = array<i64: 2>, scalar_prefetch = 0 : i64, scratch_operands = 0 : i64, tpu.core_type = #tpu.core_type<tc>, window_params = [{transform_indices = @transform_0, window_bounds = array<i64: 1, 10, 10, 128>}, {pipeline_mode = #tpu.pipeline_mode<synchronous>, transform_indices = @transform_1, window_bounds = array<i64: 9, 128, 128>}, {transform_indices = @transform_2, window_bounds = array<i64: 1, 8, 8, 128>}]} {
    %c0 = arith.constant 0 : index
    %c0_0 = arith.constant 0 : index
    %c0_1 = arith.constant 0 : index
    %c0_2 = arith.constant 0 : index
    %0 = vector.load %arg1[%c0, %c0_0, %c0_1, %c0_2] : memref<1x10x10x128xf32, #tpu.memory_space<vmem>>, vector<1x10x10x128xf32>
    %1 = vector.shape_cast %0 : vector<1x10x10x128xf32> to vector<10x10x128xf32>
    %2 = vector.extract_strided_slice %1 {offsets = [0, 0, 0], sizes = [8, 8, 128], strides = [1, 1, 1]} : vector<10x10x128xf32> to vector<8x8x128xf32>
    %3 = vector.shape_cast %2 : vector<8x8x128xf32> to vector<64x128xf32>
    %c0_3 = arith.constant 0 : index
    %c0_4 = arith.constant 0 : index
    %c0_5 = arith.constant 0 : index
    %4 = vector.load %arg2[%c0_3, %c0_4, %c0_5] : memref<9x128x128xf32, #tpu.memory_space<vmem>>, vector<1x128x128xf32>
    %5 = vector.shape_cast %4 : vector<1x128x128xf32> to vector<128x128xf32>
    %cst = arith.constant dense<0.000000e+00> : vector<64x128xf32>
    %6 = tpu.matmul %3, %5, %cst {dimension_numbers = #tpu.dot_dimension_numbers<[1], [0], [0], [1], [0, 0, 1, 1], [], []>} : vector<64x128xf32>, vector<128x128xf32>, vector<64x128xf32> -> vector<64x128xf32>
    %7 = vector.extract_strided_slice %1 {offsets = [0, 1, 0], sizes = [8, 8, 128], strides = [1, 1, 1]} : vector<10x10x128xf32> to vector<8x8x128xf32>
    %8 = vector.shape_cast %7 : vector<8x8x128xf32> to vector<64x128xf32>
    %c1 = arith.constant 1 : index
    %c0_6 = arith.constant 0 : index
    %c0_7 = arith.constant 0 : index
    %9 = vector.load %arg2[%c1, %c0_6, %c0_7] : memref<9x128x128xf32, #tpu.memory_space<vmem>>, vector<1x128x128xf32>
    %10 = vector.shape_cast %9 : vector<1x128x128xf32> to vector<128x128xf32>
    %cst_8 = arith.constant dense<0.000000e+00> : vector<64x128xf32>
    %11 = tpu.matmul %8, %10, %cst_8 {dimension_numbers = #tpu.dot_dimension_numbers<[1], [0], [0], [1], [0, 0, 1, 1], [], []>} : vector<64x128xf32>, vector<128x128xf32>, vector<64x128xf32> -> vector<64x128xf32>
    %12 = arith.addf %6, %11 : vector<64x128xf32>
    %13 = vector.extract_strided_slice %1 {offsets = [0, 2, 0], sizes = [8, 8, 128], strides = [1, 1, 1]} : vector<10x10x128xf32> to vector<8x8x128xf32>
    %14 = vector.shape_cast %13 : vector<8x8x128xf32> to vector<64x128xf32>
    %c2 = arith.constant 2 : index
    %c0_9 = arith.constant 0 : index
    %c0_10 = arith.constant 0 : index
    %15 = vector.load %arg2[%c2, %c0_9, %c0_10] : memref<9x128x128xf32, #tpu.memory_space<vmem>>, vector<1x128x128xf32>
    %16 = vector.shape_cast %15 : vector<1x128x128xf32> to vector<128x128xf32>
    %cst_11 = arith.constant dense<0.000000e+00> : vector<64x128xf32>
    %17 = tpu.matmul %14, %16, %cst_11 {dimension_numbers = #tpu.dot_dimension_numbers<[1], [0], [0], [1], [0, 0, 1, 1], [], []>} : vector<64x128xf32>, vector<128x128xf32>, vector<64x128xf32> -> vector<64x128xf32>
    %18 = arith.addf %12, %17 : vector<64x128xf32>
    %19 = vector.extract_strided_slice %1 {offsets = [1, 0, 0], sizes = [8, 8, 128], strides = [1, 1, 1]} : vector<10x10x128xf32> to vector<8x8x128xf32>
    %20 = vector.shape_cast %19 : vector<8x8x128xf32> to vector<64x128xf32>
    %c3 = arith.constant 3 : index
    %c0_12 = arith.constant 0 : index
    %c0_13 = arith.constant 0 : index
    %21 = vector.load %arg2[%c3, %c0_12, %c0_13] : memref<9x128x128xf32, #tpu.memory_space<vmem>>, vector<1x128x128xf32>
    %22 = vector.shape_cast %21 : vector<1x128x128xf32> to vector<128x128xf32>
    %cst_14 = arith.constant dense<0.000000e+00> : vector<64x128xf32>
    %23 = tpu.matmul %20, %22, %cst_14 {dimension_numbers = #tpu.dot_dimension_numbers<[1], [0], [0], [1], [0, 0, 1, 1], [], []>} : vector<64x128xf32>, vector<128x128xf32>, vector<64x128xf32> -> vector<64x128xf32>
    %24 = arith.addf %18, %23 : vector<64x128xf32>
    %25 = vector.extract_strided_slice %1 {offsets = [1, 1, 0], sizes = [8, 8, 128], strides = [1, 1, 1]} : vector<10x10x128xf32> to vector<8x8x128xf32>
    %26 = vector.shape_cast %25 : vector<8x8x128xf32> to vector<64x128xf32>
    %c4 = arith.constant 4 : index
    %c0_15 = arith.constant 0 : index
    %c0_16 = arith.constant 0 : index
    %27 = vector.load %arg2[%c4, %c0_15, %c0_16] : memref<9x128x128xf32, #tpu.memory_space<vmem>>, vector<1x128x128xf32>
    %28 = vector.shape_cast %27 : vector<1x128x128xf32> to vector<128x128xf32>
    %cst_17 = arith.constant dense<0.000000e+00> : vector<64x128xf32>
    %29 = tpu.matmul %26, %28, %cst_17 {dimension_numbers = #tpu.dot_dimension_numbers<[1], [0], [0], [1], [0, 0, 1, 1], [], []>} : vector<64x128xf32>, vector<128x128xf32>, vector<64x128xf32> -> vector<64x128xf32>
    %30 = arith.addf %24, %29 : vector<64x128xf32>
    %31 = vector.extract_strided_slice %1 {offsets = [1, 2, 0], sizes = [8, 8, 128], strides = [1, 1, 1]} : vector<10x10x128xf32> to vector<8x8x128xf32>
    %32 = vector.shape_cast %31 : vector<8x8x128xf32> to vector<64x128xf32>
    %c5 = arith.constant 5 : index
    %c0_18 = arith.constant 0 : index
    %c0_19 = arith.constant 0 : index
    %33 = vector.load %arg2[%c5, %c0_18, %c0_19] : memref<9x128x128xf32, #tpu.memory_space<vmem>>, vector<1x128x128xf32>
    %34 = vector.shape_cast %33 : vector<1x128x128xf32> to vector<128x128xf32>
    %cst_20 = arith.constant dense<0.000000e+00> : vector<64x128xf32>
    %35 = tpu.matmul %32, %34, %cst_20 {dimension_numbers = #tpu.dot_dimension_numbers<[1], [0], [0], [1], [0, 0, 1, 1], [], []>} : vector<64x128xf32>, vector<128x128xf32>, vector<64x128xf32> -> vector<64x128xf32>
    %36 = arith.addf %30, %35 : vector<64x128xf32>
    %37 = vector.extract_strided_slice %1 {offsets = [2, 0, 0], sizes = [8, 8, 128], strides = [1, 1, 1]} : vector<10x10x128xf32> to vector<8x8x128xf32>
    %38 = vector.shape_cast %37 : vector<8x8x128xf32> to vector<64x128xf32>
    %c6 = arith.constant 6 : index
    %c0_21 = arith.constant 0 : index
    %c0_22 = arith.constant 0 : index
    %39 = vector.load %arg2[%c6, %c0_21, %c0_22] : memref<9x128x128xf32, #tpu.memory_space<vmem>>, vector<1x128x128xf32>
    %40 = vector.shape_cast %39 : vector<1x128x128xf32> to vector<128x128xf32>
    %cst_23 = arith.constant dense<0.000000e+00> : vector<64x128xf32>
    %41 = tpu.matmul %38, %40, %cst_23 {dimension_numbers = #tpu.dot_dimension_numbers<[1], [0], [0], [1], [0, 0, 1, 1], [], []>} : vector<64x128xf32>, vector<128x128xf32>, vector<64x128xf32> -> vector<64x128xf32>
    %42 = arith.addf %36, %41 : vector<64x128xf32>
    %43 = vector.extract_strided_slice %1 {offsets = [2, 1, 0], sizes = [8, 8, 128], strides = [1, 1, 1]} : vector<10x10x128xf32> to vector<8x8x128xf32>
    %44 = vector.shape_cast %43 : vector<8x8x128xf32> to vector<64x128xf32>
    %c7 = arith.constant 7 : index
    %c0_24 = arith.constant 0 : index
    %c0_25 = arith.constant 0 : index
    %45 = vector.load %arg2[%c7, %c0_24, %c0_25] : memref<9x128x128xf32, #tpu.memory_space<vmem>>, vector<1x128x128xf32>
    %46 = vector.shape_cast %45 : vector<1x128x128xf32> to vector<128x128xf32>
    %cst_26 = arith.constant dense<0.000000e+00> : vector<64x128xf32>
    %47 = tpu.matmul %44, %46, %cst_26 {dimension_numbers = #tpu.dot_dimension_numbers<[1], [0], [0], [1], [0, 0, 1, 1], [], []>} : vector<64x128xf32>, vector<128x128xf32>, vector<64x128xf32> -> vector<64x128xf32>
    %48 = arith.addf %42, %47 : vector<64x128xf32>
    %49 = vector.extract_strided_slice %1 {offsets = [2, 2, 0], sizes = [8, 8, 128], strides = [1, 1, 1]} : vector<10x10x128xf32> to vector<8x8x128xf32>
    %50 = vector.shape_cast %49 : vector<8x8x128xf32> to vector<64x128xf32>
    %c8 = arith.constant 8 : index
    %c0_27 = arith.constant 0 : index
    %c0_28 = arith.constant 0 : index
    %51 = vector.load %arg2[%c8, %c0_27, %c0_28] : memref<9x128x128xf32, #tpu.memory_space<vmem>>, vector<1x128x128xf32>
    %52 = vector.shape_cast %51 : vector<1x128x128xf32> to vector<128x128xf32>
    %cst_29 = arith.constant dense<0.000000e+00> : vector<64x128xf32>
    %53 = tpu.matmul %50, %52, %cst_29 {dimension_numbers = #tpu.dot_dimension_numbers<[1], [0], [0], [1], [0, 0, 1, 1], [], []>} : vector<64x128xf32>, vector<128x128xf32>, vector<64x128xf32> -> vector<64x128xf32>
    %54 = arith.addf %48, %53 : vector<64x128xf32>
    %55 = vector.shape_cast %54 : vector<64x128xf32> to vector<8x8x128xf32>
    %c0_30 = arith.constant 0 : index
    %c0_31 = arith.constant 0 : index
    %c0_32 = arith.constant 0 : index
    %c0_33 = arith.constant 0 : index
    %56 = vector.load %arg3[%c0_30, %c0_31, %c0_32, %c0_33] : memref<1x8x8x128xf32, #tpu.memory_space<vmem>>, vector<1x8x8x128xf32>
    %57 = vector.shape_cast %56 : vector<1x8x8x128xf32> to vector<8x8x128xf32>
    %58 = vector.shape_cast %55 : vector<8x8x128xf32> to vector<1x8x8x128xf32>
    tpu.vector_store %arg3[%c0_30, %c0_31, %c0_32, %c0_33], %58 {strides = array<i32>} : memref<1x8x8x128xf32, #tpu.memory_space<vmem>>, vector<1x8x8x128xf32>,
    return
  }
  func.func @transform_0(%arg0: i32) -> (i32, i32, i32, i32) {
    %c0_i32 = arith.constant 0 : i32
    %c0_i32_0 = arith.constant 0 : i32
    %c0_i32_1 = arith.constant 0 : i32
    %c0_i32_2 = arith.constant 0 : i32
    return %arg0, %c0_i32, %c0_i32_0, %c0_i32_1 : i32, i32, i32, i32
  }
  func.func @transform_1(%arg0: i32) -> (i32, i32, i32) {
    %c0_i32 = arith.constant 0 : i32
    %c0_i32_0 = arith.constant 0 : i32
    %c0_i32_1 = arith.constant 0 : i32
    %c0_i32_2 = arith.constant 0 : i32
    return %c0_i32, %c0_i32_0, %c0_i32_1 : i32, i32, i32
  }
  func.func @transform_2(%arg0: i32) -> (i32, i32, i32, i32) {
    %c0_i32 = arith.constant 0 : i32
    %c0_i32_0 = arith.constant 0 : i32
    %c0_i32_1 = arith.constant 0 : i32
    %c0_i32_2 = arith.constant 0 : i32
    return %arg0, %c0_i32, %c0_i32_0, %c0_i32_1 : i32, i32, i32, i32
  }
}

</mosaic_0001>

<bundles_post_ra>
// kernel: a_call__.6
= control target key start
LH: loop header
LB: loop body
LE: loop exit
PB: predicated region body
PF: predicated region fallthrough
CT: control target
= control target key end

     0   :  { %s896_s0 = inlined_call_operand.vmem [shape: f32[512,128], index: 0, kind: input, shape index: {}]   ;;  %s897_s1 = inlined_call_operand.vmem [shape: f32[1,128], index: 1, kind: input, shape index: {}]   ;;  %s898_s2 = inlined_call_operand.vmem [shape: f32[1,128], index: 2, kind: input, shape index: {}]   ;;  %s899_s3 = inlined_call_operand.vmem [shape: f32[512,128], index: 3, kind: output, shape index: {}]  }
   0x1   :  { %v14_v0 = vld [vmem:[%s896_s0] sm:$0xff]  ;;  %v15_v4 = vld [vmem:[%s896_s0 + $0x8] sm:$0xff]  ;;  %v16_v5 = vld [vmem:[%s896_s0 + $0x10] sm:$0xff] }
   0x2   :  { %v380_v1 = vld [vmem:[%s897_s1] ss:$0 sm:$0xff]  ;;  %v17_v6 = vld [vmem:[%s896_s0 + $0x18] sm:$0xff]  ;;  %v19_v11 = vld [vmem:[%s896_s0 + $0x28] sm:$0xff] }
   0x3   :  { %v385_v2 = vld [vmem:[%s898_s2] ss:$0 sm:$0xff]  ;;  %v85_v3 = vmul.f32 %v380_v1, %v14_v0  ;;  %v86_v7 = vmul.f32 %v380_v1, %v15_v4  ;;  %v87_v8 = vmul.f32 %v380_v1, %v16_v5  ;;  %v88_v9 = vmul.f32 %v380_v1, %v17_v6  ;;  %v20_v12 = vld [vmem:[%s896_s0 + $0x30] sm:$0xff]  ;;  %v21_v17 = vld [vmem:[%s896_s0 + $0x38] sm:$0xff] }
   0x4   :  { %v18_v10 = vld [vmem:[%s896_s0 + $0x20] sm:$0xff]  ;;  %v90_v15 = vmul.f32 %v380_v1, %v19_v11  ;;  %v91_v16 = vmul.f32 %v380_v1, %v20_v12  ;;  %v92_v21 = vmul.f32 %v380_v1, %v21_v17  ;;  %v23_v27 = vld [vmem:[%s896_s0 + $0x48] sm:$0xff]  ;;  %v24_v28 = vld [vmem:[%s896_s0 + $0x50] sm:$0xff] }
   0x5   :  { %v156_v13 = vadd.f32 %v385_v2, %v85_v3  ;;  %v89_v14 = vmul.f32 %v380_v1, %v18_v10  ;;  %v157_v18 = vadd.f32 %v385_v2, %v86_v7  ;;  %v158_v19 = vadd.f32 %v385_v2, %v87_v8  ;;  %v22_v22 = vld [vmem:[%s896_s0 + $0x40] sm:$0xff]  ;;  %v25_v29 = vld [vmem:[%s896_s0 + $0x58] sm:$0xff]  ;;  %v27_v35 = vld [vmem:[%s896_s0 + $0x68] sm:$0xff] }
   0x6   :  { %v159_v20 = vadd.f32 %v385_v2, %v88_v9  ;;  %v161_v25 = vadd.f32 %v385_v2, %v90_v15  ;;  %v162_v26 = vadd.f32 %v385_v2, %v91_v16  ;;  %v163_v33 = vadd.f32 %v385_v2, %v92_v21  ;;  %v26_v34 = vld [vmem:[%s896_s0 + $0x60] sm:$0xff]  ;;  %v28_v36 = vld [vmem:[%s896_s0 + $0x70] sm:$0xff]  ;;  %v29_v41 = vld [vmem:[%s896_s0 + $0x78] sm:$0xff] }
   0x7   :  { %v220_v23 = vmax.f32 %v156_v13, 0.0  ;;  %v160_v24 = vadd.f32 %v385_v2, %v89_v14  ;;  %v221_v30 = vmax.f32 %v157_v18, 0.0  ;;  %v222_v31 = vmax.f32 %v158_v19, 0.0  ;;  %v30_v54 = vld [vmem:[%s896_s0 + $0x80] sm:$0xff]  ;;  %v31_v59 = vld [vmem:[%s896_s0 + $0x88] sm:$0xff]  ;;  %v32_v60 = vld [vmem:[%s896_s0 + $0x90] sm:$0xff] }
   0x8   :  { %v223_v32 = vmax.f32 %v159_v20, 0.0  ;;  %v225_v38 = vmax.f32 %v161_v25, 0.0  ;;  %v226_v39 = vmax.f32 %v162_v26, 0.0  ;;  %v93_v40 = vmul.f32 %v380_v1, %v22_v22  ;;  %v33_v61 = vld [vmem:[%s896_s0 + $0x98] sm:$0xff]  ;;  %v34_v4 = vld [vmem:[%s896_s0 + $0xa0] sm:$0xff]  ;;  %v35_v5 = vld [vmem:[%s896_s0 + $0xa8] sm:$0xff] }
   0x9   :  { %284 = vst [vmem:[%s899_s3] sm:$0xff] %v220_v23  ;;  %v224_v37 = vmax.f32 %v160_v24, 0.0  ;;  %285 = vst [vmem:[%s899_s3 + $0x8] sm:$0xff] %v221_v30  ;;  %v227_v42 = vmax.f32 %v163_v33, 0.0  ;;  %v94_v43 = vmul.f32 %v380_v1, %v23_v27  ;;  %v95_v44 = vmul.f32 %v380_v1, %v24_v28  ;;  %v36_v6 = vld [vmem:[%s896_s0 + $0xb0] sm:$0xff]  ;;  %v37_v11 = vld [vmem:[%s896_s0 + $0xb8] sm:$0xff] }
   0xa   :  { %286 = vst [vmem:[%s899_s3 + $0x10] sm:$0xff] %v222_v31  ;;  %287 = vst [vmem:[%s899_s3 + $0x18] sm:$0xff] %v223_v32  ;;  %v96_v45 = vmul.f32 %v380_v1, %v25_v29  ;;  %v164_v46 = vadd.f32 %v385_v2, %v93_v40  ;;  %v97_v47 = vmul.f32 %v380_v1, %v26_v34  ;;  %v38_v24 = vld [vmem:[%s896_s0 + $0xc0] sm:$0xff]  ;;  %v39_v29 = vld [vmem:[%s896_s0 + $0xc8] sm:$0xff] }
   0xb   :  { %288 = vst [vmem:[%s899_s3 + $0x20] sm:$0xff] %v224_v37  ;;  %289 = vst [vmem:[%s899_s3 + $0x28] sm:$0xff] %v225_v38  ;;  %v98_v48 = vmul.f32 %v380_v1, %v27_v35  ;;  %v99_v49 = vmul.f32 %v380_v1, %v28_v36  ;;  %v165_v50 = vadd.f32 %v385_v2, %v94_v43  ;;  %v40_v30 = vld [vmem:[%s896_s0 + $0xd0] sm:$0xff]  ;;  %v41_v31 = vld [vmem:[%s896_s0 + $0xd8] sm:$0xff] }
   0xc   :  { %290 = vst [vmem:[%s899_s3 + $0x30] sm:$0xff] %v226_v39  ;;  %291 = vst [vmem:[%s899_s3 + $0x38] sm:$0xff] %v227_v42  ;;  %v166_v51 = vadd.f32 %v385_v2, %v95_v44  ;;  %v167_v52 = vadd.f32 %v385_v2, %v96_v45  ;;  %v100_v53 = vmul.f32 %v380_v1, %v29_v41  ;;  %v228_v55 = vmax.f32 %v164_v46, 0.0  ;;  %v42_v36 = vld [vmem:[%s896_s0 + $0xe0] sm:$0xff]  ;;  %v43_v37 = vld [vmem:[%s896_s0 + $0xe8] sm:$0xff] }
   0xd   :  { %v168_v56 = vadd.f32 %v385_v2, %v97_v47  ;;  %v169_v57 = vadd.f32 %v385_v2, %v98_v48  ;;  %v170_v58 = vadd.f32 %v385_v2, %v99_v49  ;;  %v229_v62 = vmax.f32 %v165_v50, 0.0  ;;  %v44_v38 = vld [vmem:[%s896_s0 + $0xf0] sm:$0xff]  ;;  %v45_v43 = vld [vmem:[%s896_s0 + $0xf8] sm:$0xff] }
   0xe   :  { %v230_v63 = vmax.f32 %v166_v51, 0.0  ;;  %v231_v0 = vmax.f32 %v167_v52, 0.0  ;;  %v171_v3 = vadd.f32 %v385_v2, %v100_v53  ;;  %292 = vst [vmem:[%s899_s3 + $0x40] sm:$0xff] %v228_v55  ;;  %v101_v10 = vmul.f32 %v380_v1, %v30_v54 }
   0xf   :  { %v232_v7 = vmax.f32 %v168_v56, 0.0  ;;  %v233_v8 = vmax.f32 %v169_v57, 0.0  ;;  %v234_v9 = vmax.f32 %v170_v58, 0.0  ;;  %293 = vst [vmem:[%s899_s3 + $0x48] sm:$0xff] %v229_v62  ;;  %v102_v13 = vmul.f32 %v380_v1, %v31_v59  ;;  %v46_v56 = vld [vmem:[%s896_s0 + $0x100] sm:$0xff]  ;;  %v48_v62 = vld [vmem:[%s896_s0 + $0x110] sm:$0xff] }
  0x10   :  { %294 = vst [vmem:[%s899_s3 + $0x50] sm:$0xff] %v230_v63  ;;  %295 = vst [vmem:[%s899_s3 + $0x58] sm:$0xff] %v231_v0  ;;  %v235_v12 = vmax.f32 %v171_v3, 0.0  ;;  %v103_v14 = vmul.f32 %v380_v1, %v32_v60  ;;  %v104_v15 = vmul.f32 %v380_v1, %v33_v61  ;;  %v172_v16 = vadd.f32 %v385_v2, %v101_v10  ;;  %v47_v61 = vld [vmem:[%s896_s0 + $0x108] sm:$0xff]  ;;  %v49_v63 = vld [vmem:[%s896_s0 + $0x118] sm:$0xff] }
  0x11   :  { %296 = vst [vmem:[%s899_s3 + $0x60] sm:$0xff] %v232_v7  ;;  %297 = vst [vmem:[%s899_s3 + $0x68] sm:$0xff] %v233_v8  ;;  %v105_v17 = vmul.f32 %v380_v1, %v34_v4  ;;  %v106_v18 = vmul.f32 %v380_v1, %v35_v5  ;;  %v107_v19 = vmul.f32 %v380_v1, %v36_v6  ;;  %v50_v6 = vld [vmem:[%s896_s0 + $0x120] sm:$0xff]  ;;  %v51_v7 = vld [vmem:[%s896_s0 + $0x128] sm:$0xff] }
  0x12   :  { %298 = vst [vmem:[%s899_s3 + $0x70] sm:$0xff] %v234_v9  ;;  %299 = vst [vmem:[%s899_s3 + $0x78] sm:$0xff] %v235_v12  ;;  %v173_v20 = vadd.f32 %v385_v2, %v102_v13  ;;  %v174_v21 = vadd.f32 %v385_v2, %v103_v14  ;;  %v175_v22 = vadd.f32 %v385_v2, %v104_v15  ;;  %v236_v25 = vmax.f32 %v172_v16, 0.0  ;;  %v52_v8 = vld [vmem:[%s896_s0 + $0x130] sm:$0xff]  ;;  %v53_v13 = vld [vmem:[%s896_s0 + $0x138] sm:$0xff] }
  0x13   :  { %v108_v23 = vmul.f32 %v380_v1, %v37_v11  ;;  %v176_v26 = vadd.f32 %v385_v2, %v105_v17  ;;  %v177_v27 = vadd.f32 %v385_v2, %v106_v18  ;;  %v178_v28 = vadd.f32 %v385_v2, %v107_v19 }
  0x14   :  { %v237_v32 = vmax.f32 %v173_v20, 0.0  ;;  %v238_v33 = vmax.f32 %v174_v21, 0.0  ;;  %v239_v34 = vmax.f32 %v175_v22, 0.0  ;;  %300 = vst [vmem:[%s899_s3 + $0x80] sm:$0xff] %v236_v25  ;;  %v109_v42 = vmul.f32 %v380_v1, %v38_v24 }
  0x15   :  { %v179_v35 = vadd.f32 %v385_v2, %v108_v23  ;;  %v240_v39 = vmax.f32 %v176_v26, 0.0  ;;  %v241_v40 = vmax.f32 %v177_v27, 0.0  ;;  %v242_v41 = vmax.f32 %v178_v28, 0.0  ;;  %v54_v26 = vld [vmem:[%s896_s0 + $0x140] sm:$0xff] }
  0x16   :  { %301 = vst [vmem:[%s899_s3 + $0x88] sm:$0xff] %v237_v32  ;;  %302 = vst [vmem:[%s899_s3 + $0x90] sm:$0xff] %v238_v33  ;;  %v110_v45 = vmul.f32 %v380_v1, %v39_v29  ;;  %v111_v46 = vmul.f32 %v380_v1, %v40_v30  ;;  %v112_v47 = vmul.f32 %v380_v1, %v41_v31  ;;  %v55_v31 = vld [vmem:[%s896_s0 + $0x148] sm:$0xff]  ;;  %v56_v32 = vld [vmem:[%s896_s0 + $0x150] sm:$0xff] }
  0x17   :  { %303 = vst [vmem:[%s899_s3 + $0x98] sm:$0xff] %v239_v34  ;;  %v243_v44 = vmax.f32 %v179_v35, 0.0  ;;  %304 = vst [vmem:[%s899_s3 + $0xa0] sm:$0xff] %v240_v39  ;;  %v180_v48 = vadd.f32 %v385_v2, %v109_v42  ;;  %v113_v49 = vmul.f32 %v380_v1, %v42_v36  ;;  %v114_v50 = vmul.f32 %v380_v1, %v43_v37  ;;  %v57_v33 = vld [vmem:[%s896_s0 + $0x158] sm:$0xff]  ;;  %v59_v39 = vld [vmem:[%s896_s0 + $0x168] sm:$0xff] }
  0x18   :  { %305 = vst [vmem:[%s899_s3 + $0xa8] sm:$0xff] %v241_v40  ;;  %306 = vst [vmem:[%s899_s3 + $0xb0] sm:$0xff] %v242_v41  ;;  %v115_v51 = vmul.f32 %v380_v1, %v44_v38  ;;  %v181_v52 = vadd.f32 %v385_v2, %v110_v45  ;;  %v182_v53 = vadd.f32 %v385_v2, %v111_v46  ;;  %v58_v38 = vld [vmem:[%s896_s0 + $0x160] sm:$0xff]  ;;  %v60_v40 = vld [vmem:[%s896_s0 + $0x170] sm:$0xff] }
  0x19   :  { %307 = vst [vmem:[%s899_s3 + $0xb8] sm:$0xff] %v243_v44  ;;  %v183_v54 = vadd.f32 %v385_v2, %v112_v47  ;;  %v116_v55 = vmul.f32 %v380_v1, %v45_v43  ;;  %v244_v57 = vmax.f32 %v180_v48, 0.0  ;;  %v184_v58 = vadd.f32 %v385_v2, %v113_v49  ;;  %v61_v45 = vld [vmem:[%s896_s0 + $0x178] sm:$0xff] }
  0x1a   :  { %v185_v59 = vadd.f32 %v385_v2, %v114_v50  ;;  %v186_v60 = vadd.f32 %v385_v2, %v115_v51  ;;  %v245_v0 = vmax.f32 %v181_v52, 0.0  ;;  %v246_v3 = vmax.f32 %v182_v53, 0.0 }
  0x1b   :  { %v247_v4 = vmax.f32 %v183_v54, 0.0  ;;  %v187_v5 = vadd.f32 %v385_v2, %v116_v55  ;;  %308 = vst [vmem:[%s899_s3 + $0xc0] sm:$0xff] %v244_v57  ;;  %v248_v9 = vmax.f32 %v184_v58, 0.0  ;;  %v117_v12 = vmul.f32 %v380_v1, %v46_v56  ;;  %v62_v58 = vld [vmem:[%s896_s0 + $0x180] sm:$0xff] }
  0x1c   :  { %v249_v10 = vmax.f32 %v185_v59, 0.0  ;;  %v250_v11 = vmax.f32 %v186_v60, 0.0  ;;  %309 = vst [vmem:[%s899_s3 + $0xc8] sm:$0xff] %v245_v0  ;;  %310 = vst [vmem:[%s899_s3 + $0xd0] sm:$0xff] %v246_v3  ;;  %v118_v15 = vmul.f32 %v380_v1, %v47_v61  ;;  %v119_v16 = vmul.f32 %v380_v1, %v48_v62  ;;  %v64_v0 = vld [vmem:[%s896_s0 + $0x190] sm:$0xff]  ;;  %v65_v3 = vld [vmem:[%s896_s0 + $0x198] sm:$0xff] }
  0x1d   :  { %311 = vst [vmem:[%s899_s3 + $0xd8] sm:$0xff] %v247_v4  ;;  %v251_v14 = vmax.f32 %v187_v5, 0.0  ;;  %v120_v17 = vmul.f32 %v380_v1, %v49_v63  ;;  %312 = vst [vmem:[%s899_s3 + $0xe0] sm:$0xff] %v248_v9  ;;  %v188_v18 = vadd.f32 %v385_v2, %v117_v12  ;;  %v121_v19 = vmul.f32 %v380_v1, %v50_v6  ;;  %v63_v63 = vld [vmem:[%s896_s0 + $0x188] sm:$0xff] }
  0x1e   :  { %313 = vst [vmem:[%s899_s3 + $0xe8] sm:$0xff] %v249_v10  ;;  %314 = vst [vmem:[%s899_s3 + $0xf0] sm:$0xff] %v250_v11  ;;  %v122_v20 = vmul.f32 %v380_v1, %v51_v7  ;;  %v123_v21 = vmul.f32 %v380_v1, %v52_v8  ;;  %v189_v22 = vadd.f32 %v385_v2, %v118_v15  ;;  %v66_v8 = vld [vmem:[%s896_s0 + $0x1a0] sm:$0xff]  ;;  %v67_v9 = vld [vmem:[%s896_s0 + $0x1a8] sm:$0xff] }
  0x1f   :  { %315 = vst [vmem:[%s899_s3 + $0xf8] sm:$0xff] %v251_v14  ;;  %v190_v23 = vadd.f32 %v385_v2, %v119_v16  ;;  %v191_v24 = vadd.f32 %v385_v2, %v120_v17  ;;  %v124_v25 = vmul.f32 %v380_v1, %v53_v13  ;;  %v252_v27 = vmax.f32 %v188_v18, 0.0  ;;  %v68_v10 = vld [vmem:[%s896_s0 + $0x1b0] sm:$0xff]  ;;  %v69_v15 = vld [vmem:[%s896_s0 + $0x1b8] sm:$0xff] }
  0x20   :  { %v192_v28 = vadd.f32 %v385_v2, %v121_v19  ;;  %v193_v29 = vadd.f32 %v385_v2, %v122_v20  ;;  %v194_v30 = vadd.f32 %v385_v2, %v123_v21  ;;  %v253_v34 = vmax.f32 %v189_v22, 0.0 }
  0x21   :  { %v254_v35 = vmax.f32 %v190_v23, 0.0  ;;  %v255_v36 = vmax.f32 %v191_v24, 0.0  ;;  %v195_v37 = vadd.f32 %v385_v2, %v124_v25  ;;  %316 = vst [vmem:[%s899_s3 + $0x100] sm:$0xff] %v252_v27  ;;  %v125_v44 = vmul.f32 %v380_v1, %v54_v26 }
  0x22   :  { %v256_v41 = vmax.f32 %v192_v28, 0.0  ;;  %v257_v42 = vmax.f32 %v193_v29, 0.0  ;;  %v258_v43 = vmax.f32 %v194_v30, 0.0  ;;  %317 = vst [vmem:[%s899_s3 + $0x108] sm:$0xff] %v253_v34  ;;  %v126_v47 = vmul.f32 %v380_v1, %v55_v31  ;;  %v70_v28 = vld [vmem:[%s896_s0 + $0x1c0] sm:$0xff]  ;;  %v72_v34 = vld [vmem:[%s896_s0 + $0x1d0] sm:$0xff] }
  0x23   :  { %318 = vst [vmem:[%s899_s3 + $0x110] sm:$0xff] %v254_v35  ;;  %319 = vst [vmem:[%s899_s3 + $0x118] sm:$0xff] %v255_v36  ;;  %v259_v46 = vmax.f32 %v195_v37, 0.0  ;;  %v127_v48 = vmul.f32 %v380_v1, %v56_v32  ;;  %v128_v49 = vmul.f32 %v380_v1, %v57_v33  ;;  %v196_v50 = vadd.f32 %v385_v2, %v125_v44  ;;  %v71_v33 = vld [vmem:[%s896_s0 + $0x1c8] sm:$0xff]  ;;  %v73_v35 = vld [vmem:[%s896_s0 + $0x1d8] sm:$0xff] }
  0x24   :  { %320 = vst [vmem:[%s899_s3 + $0x120] sm:$0xff] %v256_v41  ;;  %321 = vst [vmem:[%s899_s3 + $0x128] sm:$0xff] %v257_v42  ;;  %v129_v51 = vmul.f32 %v380_v1, %v58_v38  ;;  %v130_v52 = vmul.f32 %v380_v1, %v59_v39  ;;  %v131_v53 = vmul.f32 %v380_v1, %v60_v40  ;;  %v74_v40 = vld [vmem:[%s896_s0 + $0x1e0] sm:$0xff]  ;;  %v75_v41 = vld [vmem:[%s896_s0 + $0x1e8] sm:$0xff] }
  0x25   :  { %322 = vst [vmem:[%s899_s3 + $0x130] sm:$0xff] %v258_v43  ;;  %323 = vst [vmem:[%s899_s3 + $0x138] sm:$0xff] %v259_v46  ;;  %v197_v54 = vadd.f32 %v385_v2, %v126_v47  ;;  %v198_v55 = vadd.f32 %v385_v2, %v127_v48  ;;  %v199_v56 = vadd.f32 %v385_v2, %v128_v49  ;;  %v260_v59 = vmax.f32 %v196_v50, 0.0  ;;  %v76_v42 = vld [vmem:[%s896_s0 + $0x1f0] sm:$0xff]  ;;  %v77_v47 = vld [vmem:[%s896_s0 + $0x1f8] sm:$0xff] }
  0x26   :  { %v132_v57 = vmul.f32 %v380_v1, %v61_v45  ;;  %v200_v60 = vadd.f32 %v385_v2, %v129_v51  ;;  %v201_v61 = vadd.f32 %v385_v2, %v130_v52  ;;  %v202_v62 = vadd.f32 %v385_v2, %v131_v53 }
  0x27   :  { %v261_v4 = vmax.f32 %v197_v54, 0.0  ;;  %v262_v5 = vmax.f32 %v198_v55, 0.0  ;;  %v263_v6 = vmax.f32 %v199_v56, 0.0  ;;  %324 = vst [vmem:[%s899_s3 + $0x140] sm:$0xff] %v260_v59  ;;  %v133_v14 = vmul.f32 %v380_v1, %v62_v58 }
  0x28   :  { %v203_v7 = vadd.f32 %v385_v2, %v132_v57  ;;  %v264_v11 = vmax.f32 %v200_v60, 0.0  ;;  %v265_v12 = vmax.f32 %v201_v61, 0.0  ;;  %v266_v13 = vmax.f32 %v202_v62, 0.0 }
  0x29   :  { %325 = vst [vmem:[%s899_s3 + $0x148] sm:$0xff] %v261_v4  ;;  %326 = vst [vmem:[%s899_s3 + $0x150] sm:$0xff] %v262_v5  ;;  %v134_v17 = vmul.f32 %v380_v1, %v63_v63  ;;  %v135_v18 = vmul.f32 %v380_v1, %v64_v0  ;;  %v136_v19 = vmul.f32 %v380_v1, %v65_v3 }
  0x2a   :  { %327 = vst [vmem:[%s899_s3 + $0x158] sm:$0xff] %v263_v6  ;;  %v267_v16 = vmax.f32 %v203_v7, 0.0  ;;  %328 = vst [vmem:[%s899_s3 + $0x160] sm:$0xff] %v264_v11  ;;  %v204_v20 = vadd.f32 %v385_v2, %v133_v14  ;;  %v137_v21 = vmul.f32 %v380_v1, %v66_v8  ;;  %v138_v22 = vmul.f32 %v380_v1, %v67_v9 }
  0x2b   :  { %329 = vst [vmem:[%s899_s3 + $0x168] sm:$0xff] %v265_v12  ;;  %330 = vst [vmem:[%s899_s3 + $0x170] sm:$0xff] %v266_v13  ;;  %v139_v23 = vmul.f32 %v380_v1, %v68_v10  ;;  %v205_v24 = vadd.f32 %v385_v2, %v134_v17  ;;  %v206_v25 = vadd.f32 %v385_v2, %v135_v18 }
  0x2c   :  { %331 = vst [vmem:[%s899_s3 + $0x178] sm:$0xff] %v267_v16  ;;  %v207_v26 = vadd.f32 %v385_v2, %v136_v19  ;;  %v140_v27 = vmul.f32 %v380_v1, %v69_v15  ;;  %v268_v29 = vmax.f32 %v204_v20, 0.0  ;;  %v208_v30 = vadd.f32 %v385_v2, %v137_v21 }
  0x2d   :  { %v209_v31 = vadd.f32 %v385_v2, %v138_v22  ;;  %v210_v32 = vadd.f32 %v385_v2, %v139_v23  ;;  %v269_v36 = vmax.f32 %v205_v24, 0.0  ;;  %v270_v37 = vmax.f32 %v206_v25, 0.0 }
  0x2e   :  { %v271_v38 = vmax.f32 %v207_v26, 0.0  ;;  %v211_v39 = vadd.f32 %v385_v2, %v140_v27  ;;  %332 = vst [vmem:[%s899_s3 + $0x180] sm:$0xff] %v268_v29  ;;  %v272_v43 = vmax.f32 %v208_v30, 0.0  ;;  %v141_v46 = vmul.f32 %v380_v1, %v70_v28 }
  0x2f   :  { %v273_v44 = vmax.f32 %v209_v31, 0.0  ;;  %v274_v45 = vmax.f32 %v210_v32, 0.0  ;;  %333 = vst [vmem:[%s899_s3 + $0x188] sm:$0xff] %v269_v36  ;;  %334 = vst [vmem:[%s899_s3 + $0x190] sm:$0xff] %v270_v37  ;;  %v142_v49 = vmul.f32 %v380_v1, %v71_v33  ;;  %v143_v50 = vmul.f32 %v380_v1, %v72_v34 }
  0x30   :  { %335 = vst [vmem:[%s899_s3 + $0x198] sm:$0xff] %v271_v38  ;;  %v275_v48 = vmax.f32 %v211_v39, 0.0  ;;  %v144_v51 = vmul.f32 %v380_v1, %v73_v35  ;;  %336 = vst [vmem:[%s899_s3 + $0x1a0] sm:$0xff] %v272_v43  ;;  %v212_v52 = vadd.f32 %v385_v2, %v141_v46  ;;  %v145_v53 = vmul.f32 %v380_v1, %v74_v40 }
  0x31   :  { %337 = vst [vmem:[%s899_s3 + $0x1a8] sm:$0xff] %v273_v44  ;;  %338 = vst [vmem:[%s899_s3 + $0x1b0] sm:$0xff] %v274_v45  ;;  %v146_v54 = vmul.f32 %v380_v1, %v75_v41  ;;  %v147_v55 = vmul.f32 %v380_v1, %v76_v42  ;;  %v213_v56 = vadd.f32 %v385_v2, %v142_v49 }
  0x32   :  { %339 = vst [vmem:[%s899_s3 + $0x1b8] sm:$0xff] %v275_v48  ;;  %v214_v57 = vadd.f32 %v385_v2, %v143_v50  ;;  %v215_v58 = vadd.f32 %v385_v2, %v144_v51  ;;  %v148_v59 = vmul.f32 %v380_v1, %v77_v47  ;;  %v276_v60 = vmax.f32 %v212_v52, 0.0 }
  0x33   :  { %v216_v61 = vadd.f32 %v385_v2, %v145_v53  ;;  %v217_v62 = vadd.f32 %v385_v2, %v146_v54  ;;  %v218_v63 = vadd.f32 %v385_v2, %v147_v55  ;;  %v277_v0 = vmax.f32 %v213_v56, 0.0 }
  0x34   :  { %v278_v3 = vmax.f32 %v214_v57, 0.0  ;;  %v279_v4 = vmax.f32 %v215_v58, 0.0  ;;  %v219_v5 = vadd.f32 %v385_v2, %v148_v59  ;;  %340 = vst [vmem:[%s899_s3 + $0x1c0] sm:$0xff] %v276_v60 }
  0x35   :  { %v280_v6 = vmax.f32 %v216_v61, 0.0  ;;  %v281_v7 = vmax.f32 %v217_v62, 0.0  ;;  %v282_v8 = vmax.f32 %v218_v63, 0.0  ;;  %341 = vst [vmem:[%s899_s3 + $0x1c8] sm:$0xff] %v277_v0 }
  0x36   :  { %342 = vst [vmem:[%s899_s3 + $0x1d0] sm:$0xff] %v278_v3  ;;  %343 = vst [vmem:[%s899_s3 + $0x1d8] sm:$0xff] %v279_v4  ;;  %v283_v1 = vmax.f32 %v219_v5, 0.0 }
  0x37   :  { %344 = vst [vmem:[%s899_s3 + $0x1e0] sm:$0xff] %v280_v6  ;;  %345 = vst [vmem:[%s899_s3 + $0x1e8] sm:$0xff] %v281_v7 }
  0x38   :  { %346 = vst [vmem:[%s899_s3 + $0x1f0] sm:$0xff] %v282_v8  ;;  %347 = vst [vmem:[%s899_s3 + $0x1f8] sm:$0xff] %v283_v1 }

// kernel: a_call__.9
= control target key start
LH: loop header
LB: loop body
LE: loop exit
PB: predicated region body
PF: predicated region fallthrough
CT: control target
= control target key end

     0   :  { %s254_s0 = inlined_call_operand.vmem [shape: f32[128,128], index: 0, kind: input, shape index: {}]   ;;  %s255_s1 = inlined_call_operand.vmem [shape: f32[1,128], index: 1, kind: input, shape index: {}]   ;;  %s256_s2 = inlined_call_operand.vmem [shape: f32[1,128], index: 2, kind: input, shape index: {}]   ;;  %s257_s3 = inlined_call_operand.vmem [shape: f32[128,128], index: 3, kind: output, shape index: {}]  }
   0x1   :  { %v14_v0 = vld [vmem:[%s254_s0] sm:$0xff]  ;;  %v15_v4 = vld [vmem:[%s254_s0 + $0x8] sm:$0xff]  ;;  %v16_v5 = vld [vmem:[%s254_s0 + $0x10] sm:$0xff] }
   0x2   :  { %v112_v1 = vld [vmem:[%s255_s1] ss:$0 sm:$0xff]  ;;  %v17_v6 = vld [vmem:[%s254_s0 + $0x18] sm:$0xff]  ;;  %v19_v11 = vld [vmem:[%s254_s0 + $0x28] sm:$0xff] }
   0x3   :  { %v143_v2 = vld [vmem:[%s256_s2] ss:$0 sm:$0xff]  ;;  %v37_v3 = vmul.f32 %v112_v1, %v14_v0  ;;  %v38_v7 = vmul.f32 %v112_v1, %v15_v4  ;;  %v39_v8 = vmul.f32 %v112_v1, %v16_v5  ;;  %v40_v9 = vmul.f32 %v112_v1, %v17_v6  ;;  %v20_v12 = vld [vmem:[%s254_s0 + $0x30] sm:$0xff]  ;;  %v21_v17 = vld [vmem:[%s254_s0 + $0x38] sm:$0xff] }
   0x4   :  { %v18_v10 = vld [vmem:[%s254_s0 + $0x20] sm:$0xff]  ;;  %v42_v15 = vmul.f32 %v112_v1, %v19_v11  ;;  %v43_v16 = vmul.f32 %v112_v1, %v20_v12  ;;  %v44_v21 = vmul.f32 %v112_v1, %v21_v17  ;;  %v23_v27 = vld [vmem:[%s254_s0 + $0x48] sm:$0xff]  ;;  %v24_v28 = vld [vmem:[%s254_s0 + $0x50] sm:$0xff] }
   0x5   :  { %v60_v13 = vadd.f32 %v143_v2, %v37_v3  ;;  %v41_v14 = vmul.f32 %v112_v1, %v18_v10  ;;  %v61_v18 = vadd.f32 %v143_v2, %v38_v7  ;;  %v62_v19 = vadd.f32 %v143_v2, %v39_v8  ;;  %v22_v22 = vld [vmem:[%s254_s0 + $0x40] sm:$0xff]  ;;  %v25_v29 = vld [vmem:[%s254_s0 + $0x58] sm:$0xff]  ;;  %v27_v35 = vld [vmem:[%s254_s0 + $0x68] sm:$0xff] }
   0x6   :  { %v63_v20 = vadd.f32 %v143_v2, %v40_v9  ;;  %v65_v25 = vadd.f32 %v143_v2, %v42_v15  ;;  %v66_v26 = vadd.f32 %v143_v2, %v43_v16  ;;  %v67_v33 = vadd.f32 %v143_v2, %v44_v21  ;;  %v26_v34 = vld [vmem:[%s254_s0 + $0x60] sm:$0xff]  ;;  %v28_v36 = vld [vmem:[%s254_s0 + $0x70] sm:$0xff]  ;;  %v29_v41 = vld [vmem:[%s254_s0 + $0x78] sm:$0xff] }
   0x7   :  { %v76_v23 = vmax.f32 %v60_v13, 0.0  ;;  %v64_v24 = vadd.f32 %v143_v2, %v41_v14  ;;  %v77_v30 = vmax.f32 %v61_v18, 0.0  ;;  %v78_v31 = vmax.f32 %v62_v19, 0.0 }
   0x8   :  { %v79_v32 = vmax.f32 %v63_v20, 0.0  ;;  %v81_v38 = vmax.f32 %v65_v25, 0.0  ;;  %v82_v39 = vmax.f32 %v66_v26, 0.0  ;;  %v45_v40 = vmul.f32 %v112_v1, %v22_v22 }
   0x9   :  { %92 = vst [vmem:[%s257_s3] sm:$0xff] %v76_v23  ;;  %v80_v37 = vmax.f32 %v64_v24, 0.0  ;;  %93 = vst [vmem:[%s257_s3 + $0x8] sm:$0xff] %v77_v30  ;;  %v83_v42 = vmax.f32 %v67_v33, 0.0  ;;  %v46_v43 = vmul.f32 %v112_v1, %v23_v27  ;;  %v47_v44 = vmul.f32 %v112_v1, %v24_v28 }
   0xa   :  { %94 = vst [vmem:[%s257_s3 + $0x10] sm:$0xff] %v78_v31  ;;  %95 = vst [vmem:[%s257_s3 + $0x18] sm:$0xff] %v79_v32  ;;  %v48_v45 = vmul.f32 %v112_v1, %v25_v29  ;;  %v68_v46 = vadd.f32 %v143_v2, %v45_v40  ;;  %v49_v47 = vmul.f32 %v112_v1, %v26_v34 }
   0xb   :  { %96 = vst [vmem:[%s257_s3 + $0x20] sm:$0xff] %v80_v37  ;;  %97 = vst [vmem:[%s257_s3 + $0x28] sm:$0xff] %v81_v38  ;;  %v50_v48 = vmul.f32 %v112_v1, %v27_v35  ;;  %v51_v49 = vmul.f32 %v112_v1, %v28_v36  ;;  %v69_v50 = vadd.f32 %v143_v2, %v46_v43 }
   0xc   :  { %98 = vst [vmem:[%s257_s3 + $0x30] sm:$0xff] %v82_v39  ;;  %99 = vst [vmem:[%s257_s3 + $0x38] sm:$0xff] %v83_v42  ;;  %v70_v51 = vadd.f32 %v143_v2, %v47_v44  ;;  %v71_v52 = vadd.f32 %v143_v2, %v48_v45  ;;  %v52_v53 = vmul.f32 %v112_v1, %v29_v41  ;;  %v84_v54 = vmax.f32 %v68_v46, 0.0 }
   0xd   :  { %v72_v55 = vadd.f32 %v143_v2, %v49_v47  ;;  %v73_v56 = vadd.f32 %v143_v2, %v50_v48  ;;  %v74_v57 = vadd.f32 %v143_v2, %v51_v49  ;;  %v85_v58 = vmax.f32 %v69_v50, 0.0 }
   0xe   :  { %v86_v59 = vmax.f32 %v70_v51, 0.0  ;;  %v87_v60 = vmax.f32 %v71_v52, 0.0  ;;  %v75_v61 = vadd.f32 %v143_v2, %v52_v53  ;;  %100 = vst [vmem:[%s257_s3 + $0x40] sm:$0xff] %v84_v54 }
   0xf   :  { %v88_v62 = vmax.f32 %v72_v55, 0.0  ;;  %v89_v63 = vmax.f32 %v73_v56, 0.0  ;;  %v90_v0 = vmax.f32 %v74_v57, 0.0  ;;  %101 = vst [vmem:[%s257_s3 + $0x48] sm:$0xff] %v85_v58 }
  0x10   :  { %102 = vst [vmem:[%s257_s3 + $0x50] sm:$0xff] %v86_v59  ;;  %103 = vst [vmem:[%s257_s3 + $0x58] sm:$0xff] %v87_v60  ;;  %v91_v1 = vmax.f32 %v75_v61, 0.0 }
  0x11   :  { %104 = vst [vmem:[%s257_s3 + $0x60] sm:$0xff] %v88_v62  ;;  %105 = vst [vmem:[%s257_s3 + $0x68] sm:$0xff] %v89_v63 }
  0x12   :  { %106 = vst [vmem:[%s257_s3 + $0x70] sm:$0xff] %v90_v0  ;;  %107 = vst [vmem:[%s257_s3 + $0x78] sm:$0xff] %v91_v1 }

// kernel: a_call__.7
= control target key start
LH: loop header
LB: loop body
LE: loop exit
PB: predicated region body
PF: predicated region fallthrough
CT: control target
= control target key end

     0   :  { %s2991_s15 = smov 0   ;;  %s3751_s0 = inlined_call_operand.vmem [shape: f32[2,9,9,512], index: 0, kind: input, shape index: {}]   ;;  %s3752_s1 = inlined_call_operand.vmem [shape: f32[9,128,128], index: 1, kind: input, shape index: {}]   ;;  %s3753_s2 = inlined_call_operand.vmem [shape: f32[128,128], index: 2, kind: input, shape index: {}]   ;;  %s3754_s3 = inlined_call_operand.vmem [shape: f32[2,8,8,128], index: 3, kind: output, shape index: {0}]   ;;  %s3755_s4 = inlined_call_operand.vmem [shape: f32[2,8,8,128], index: 4, kind: output, shape index: {1}]  }
   0x1 LB: > { %s1743_s16 = sadd.s32 4294967295, %s2964_s15   ;;  %p1747_p0 = scmp.ge.s32.totalorder %s2964_s15, 1  ;;  %s2964_s15 = sphi %s2991_s15, %s15_s15  }
   0x2   : > { %p165_p1 = scmp.lt.s32.totalorder %s2964_s15, 3 }
   0x4   : > { %p166_p2 = pnand %p1747_p0, %p165_p1 }
   0x5   : > { %v1753_v0 = vld [vmem:[%s3752_s1 + $0x80] sm:$0xff] (!%p166_p2)  ;;  %v1754_v1 = vld [vmem:[%s3752_s1 + $0x88] sm:$0xff] (!%p166_p2)  ;;  %p196_p3 = scmp.lt.s32.totalorder (!%p166_p2), %s1743_s16, 1  ;;  %v1755_v5 = vld [vmem:[%s3752_s1 + $0x90] sm:$0xff] (!%p166_p2)  ;;  %vm521_vm0 = vcmask (!%p166_p2), 1046528  }
   0x6   : > { %169 = sbr.rel (%p166_p2) target bundleno = 398 (0x18e), region = 32  ;;  %v1801_v2 = vld [vmem:[%s3752_s1 + $0x200] sm:$0xff] (!%p166_p2)  ;;  %v2565_v3 = vpack.c.bf16 (!%p166_p2), %v1754_v1, %v1753_v0  ;;  %v1802_v4 = vld [vmem:[%s3752_s1 + $0x208] sm:$0xff] (!%p166_p2)  ;;  %v1756_v6 = vld [vmem:[%s3752_s1 + $0x98] sm:$0xff] (!%p166_p2) }
   0x7   : > { %v2693_v7 = vpack.c.bf16 (!%p166_p2), %v1802_v4, %v1801_v2  ;;  %v2569_v8 = vpack.c.bf16 (!%p166_p2), %v1756_v6, %v1755_v5  ;;  %v1803_v9 = vld [vmem:[%s3752_s1 + $0x210] sm:$0xff] (!%p166_p2)  ;;  %v1804_v10 = vld [vmem:[%s3752_s1 + $0x218] sm:$0xff] (!%p166_p2)  ;;  %v1757_v11 = vld [vmem:[%s3752_s1 + $0xa0] sm:$0xff] (!%p166_p2) }
   0x8   : > { %2566 = vmatprep.subr.bf16.mxu1 (!%p166_p2), %v2565_v3  ;;  %v2697_v12 = vpack.c.bf16 (!%p166_p2), %v1804_v10, %v1803_v9  ;;  %v1758_v13 = vld [vmem:[%s3752_s1 + $0xa8] sm:$0xff] (!%p166_p2)  ;;  %v1805_v14 = vld [vmem:[%s3752_s1 + $0x220] sm:$0xff] (!%p166_p2)  ;;  %v1759_v18 = vld [vmem:[%s3752_s1 + $0xb0] sm:$0xff] (!%p166_p2) }
   0x9   : > { %v1806_v15 = vld [vmem:[%s3752_s1 + $0x228] sm:$0xff] (!%p166_p2)  ;;  %2694 = vmatprep.subr.bf16.mxu0 (!%p166_p2), %v2693_v7  ;;  %2568 = vmatpush3.bf16.msra.mxu1 (!%p166_p2), %v2565_v3  ;;  %v2573_v16 = vpack.c.bf16 (!%p166_p2), %v1758_v13, %v1757_v11  ;;  %v1760_v19 = vld [vmem:[%s3752_s1 + $0xb8] sm:$0xff] (!%p166_p2)  ;;  %v1807_v20 = vld [vmem:[%s3752_s1 + $0x230] sm:$0xff] (!%p166_p2) }
   0xa   : > { %2696 = vmatpush3.bf16.msra.mxu0 (!%p166_p2), %v2693_v7  ;;  %2570 = vmatprep.subr.bf16.mxu1 (!%p166_p2), %v2569_v8  ;;  %v2701_v17 = vpack.c.bf16 (!%p166_p2), %v1806_v15, %v1805_v14  ;;  %v1808_v21 = vld [vmem:[%s3752_s1 + $0x238] sm:$0xff] (!%p166_p2)  ;;  %v2577_v22 = vpack.c.bf16 (!%p166_p2), %v1760_v19, %v1759_v18  ;;  %v1761_v24 = vld [vmem:[%s3752_s1 + $0xc0] sm:$0xff] (!%p166_p2)  ;;  %v1762_v25 = vld [vmem:[%s3752_s1 + $0xc8] sm:$0xff] (!%p166_p2) }
   0xb   : > { %2698 = vmatprep.subr.bf16.mxu0 (!%p166_p2), %v2697_v12  ;;  %v2705_v23 = vpack.c.bf16 (!%p166_p2), %v1808_v21, %v1807_v20  ;;  %v1809_v27 = vld [vmem:[%s3752_s1 + $0x240] sm:$0xff] (!%p166_p2)  ;;  %v1810_v28 = vld [vmem:[%s3752_s1 + $0x248] sm:$0xff] (!%p166_p2)  ;;  %v2581_v30 = vpack.c.bf16 (!%p166_p2), %v1762_v25, %v1761_v24  ;;  %v1763_v32 = vld [vmem:[%s3752_s1 + $0xd0] sm:$0xff] (!%p166_p2) }
   0xc   : > { %v2709_v31 = vpack.c.bf16 (!%p166_p2), %v1810_v28, %v1809_v27  ;;  %v1764_v33 = vld [vmem:[%s3752_s1 + $0xd8] sm:$0xff] (!%p166_p2)  ;;  %v1811_v34 = vld [vmem:[%s3752_s1 + $0x250] sm:$0xff] (!%p166_p2)  ;;  %v1765_v38 = vld [vmem:[%s3752_s1 + $0xe0] sm:$0xff] (!%p166_p2) }
   0xd   : > { %s3757_s16 = smov (!%p196_p3, %s1743_s16), 1  ;;  %2572 = vmatpush3.bf16.msra.mxu1 %v2569_v8  ;;  %v1812_v35 = vld [vmem:[%s3752_s1 + $0x258] sm:$0xff]  ;;  %v2585_v36 = vpack.c.bf16 %v1764_v33, %v1763_v32  ;;  %v1766_v39 = vld [vmem:[%s3752_s1 + $0xe8] sm:$0xff]  ;;  %v1813_v40 = vld [vmem:[%s3752_s1 + $0x260] sm:$0xff] }
   0xe   : > { %s2949_s17 = smul.u32 576, %s3757_s16  ;;  %2700 = vmatpush3.bf16.msra.mxu0 %v2697_v12  ;;  %2574 = vmatprep.subr.bf16.mxu1 %v2573_v16  ;;  %v2713_v37 = vpack.c.bf16 %v1812_v35, %v1811_v34  ;;  %v1814_v41 = vld [vmem:[%s3752_s1 + $0x268] sm:$0xff]  ;;  %v2589_v42 = vpack.c.bf16 %v1766_v39, %v1765_v38  ;;  %v1767_v44 = vld [vmem:[%s3752_s1 + $0xf0] sm:$0xff]  ;;  %v1768_v45 = vld [vmem:[%s3752_s1 + $0xf8] sm:$0xff]  ;;  %s1883_s14 = sshll.u32 %s3757_s16, 6 }
   0xf   : > { %2702 = vmatprep.subr.bf16.mxu0 %v2701_v17  ;;  %v2717_v43 = vpack.c.bf16 %v1814_v41, %v1813_v40  ;;  %v1815_v46 = vld [vmem:[%s3752_s1 + $0x270] sm:$0xff]  ;;  %v1816_v47 = vld [vmem:[%s3752_s1 + $0x278] sm:$0xff]  ;;  %v2593_v48 = vpack.c.bf16 %v1768_v45, %v1767_v44  ;;  %v262_v50 = vld [vmem:[%s3752_s1] sm:$0xff]  ;;  %s3725_s19 = scalar_lea.vmem %s3755_s4, %s1883_s14  ;;  %s3730_s22 = scalar_lea.vmem %s3754_s3, %s1883_s14 }
  0x10   : > { %s3053_s28 = scalar_lea.vmem %s3751_s0, %s2949_s17  ;;  %v2721_v49 = vpack.c.bf16 %v1816_v47, %v1815_v46  ;;  %v263_v51 = vld [vmem:[%s3752_s1 + $0x8] sm:$0xff]  ;;  %v1817_v52 = vld [vmem:[%s3752_s1 + $0x280] sm:$0xff]  ;;  %v264_v56 = vld [vmem:[%s3752_s1 + $0x10] sm:$0xff] }
  0x11   : > { %v212_v26 = vld [vmem:[%s3053_s28 + $0x8] sm:$0xff]  ;;  %v3069_v29 = vld [vmem:[%s3053_s28 + $0x18] sm:$0xff]  ;;  %2576 = vmatpush3.bf16.msra.mxu1 %v2573_v16  ;;  %v2597_v54 = vpack.c.bf16 %v263_v51, %v262_v50  ;;  %v1819_v58 = vld [vmem:[%s3752_s1 + $0x290] sm:$0xff] }
  0x12   : > { %2157 = vmatprep.mubr.f32.mxu1 %v212_v26  ;;  %2333 = vmatprep.mubr.f32.mxu0 %v3069_v29  ;;  %v1818_v53 = vld [vmem:[%s3752_s1 + $0x288] sm:$0xff]  ;;  %v265_v57 = vld [vmem:[%s3752_s1 + $0x18] sm:$0xff]  ;;  %v266_v0 = vld [vmem:[%s3752_s1 + $0x20] sm:$0xff] }
  0x13   : > { %2704 = vmatpush3.bf16.msra.mxu0 %v2701_v17  ;;  %2578 = vmatprep.subr.bf16.mxu1 %v2577_v22  ;;  %v2725_v55 = vpack.c.bf16 %v1818_v53, %v1817_v52  ;;  %v1820_v59 = vld [vmem:[%s3752_s1 + $0x298] sm:$0xff]  ;;  %v3133_v60 = vld [vmem:[%s3053_s28 + $0x48] sm:$0xff]  ;;  %v2601_v62 = vpack.c.bf16 %v265_v57, %v264_v56  ;;  %v1821_v2 = vld [vmem:[%s3752_s1 + $0x2a0] sm:$0xff] }
  0x14   : > { %2706 = vmatprep.subr.bf16.mxu0 %v2705_v23  ;;  %v3136_v61 = vld [vmem:[%s3053_s28 + $0x58] sm:$0xff]  ;;  %v2729_v63 = vpack.c.bf16 %v1820_v59, %v1819_v58  ;;  %v267_v1 = vld [vmem:[%s3752_s1 + $0x28] sm:$0xff]  ;;  %v268_v10 = vld [vmem:[%s3752_s1 + $0x30] sm:$0xff] }
  0x15   : > { %2580 = vmatpush3.bf16.msra.mxu1 %v2577_v22  ;;  %v1822_v3 = vld [vmem:[%s3752_s1 + $0x2a8] sm:$0xff]  ;;  %v3156_v5 = vld [vmem:[%s3053_s28 + $0x98] sm:$0xff]  ;;  %v2605_v7 = vpack.c.bf16 %v267_v1, %v266_v0  ;;  %v1823_v12 = vld [vmem:[%s3752_s1 + $0x2b0] sm:$0xff] }
  0x16   : > { %2582 = vmatprep.subr.bf16.mxu1 %v2581_v30  ;;  %v3152_v4 = vld [vmem:[%s3053_s28 + $0x88] sm:$0xff]  ;;  %v3162_v8 = vld [vmem:[%s3053_s28 + $0xd8] sm:$0xff]  ;;  %v2733_v9 = vpack.c.bf16 %v1822_v3, %v1821_v2  ;;  %v3193_v19 = vld [vmem:[%s3053_s28 + $0x10] sm:$0xff] }
  0x17   : > { %2708 = vmatpush3.bf16.msra.mxu0 %v2705_v23  ;;  %v3159_v6 = vld [vmem:[%s3053_s28 + $0xc8] sm:$0xff]  ;;  %v269_v11 = vld [vmem:[%s3752_s1 + $0x38] sm:$0xff]  ;;  %v216_v20 = vld [vmem:[%s3053_s28 + $0x30] sm:$0x1] }
  0x18   : > { %2710 = vmatprep.subr.bf16.mxu0 %v2709_v31  ;;  %v1824_v13 = vld [vmem:[%s3752_s1 + $0x2b8] sm:$0xff]  ;;  %v3180_v14 = vld [vmem:[%s3053_s28 + $0x108] sm:$0xff]  ;;  %v2609_v17 = vpack.c.bf16 %v269_v11, %v268_v10  ;;  %v270_v22 = vld [vmem:[%s3752_s1 + $0x40] sm:$0xff] }
  0x19   : > { %2584 = vmatpush3.bf16.msra.mxu1 %v2581_v30  ;;  %v3184_v15 = vld [vmem:[%s3053_s28 + $0x118] sm:$0xff]  ;;  %v3187_v16 = vld [vmem:[%s3053_s28 + $0x148] sm:$0xff]  ;;  %v2737_v21 = vpack.c.bf16 %v1824_v13, %v1823_v12  ;;  %v1825_v24 = vld [vmem:[%s3752_s1 + $0x2c0] sm:$0xff]  ;;  %v960_v30 = vrot.slane %v3193_v19, 1 }
  0x1a   : > { %2586 = vmatprep.subr.bf16.mxu1 %v2585_v36  ;;  %v3190_v18 = vld [vmem:[%s3053_s28 + $0x158] sm:$0xff]  ;;  %v271_v23 = vld [vmem:[%s3752_s1 + $0x48] sm:$0xff]  ;;  %v272_v35 = vld [vmem:[%s3752_s1 + $0x50] sm:$0xff] }
  0x1b   : > { %2712 = vmatpush3.bf16.msra.mxu0 %v2709_v31  ;;  %v1826_v25 = vld [vmem:[%s3752_s1 + $0x2c8] sm:$0xff]  ;;  %v3216_v27 = vld [vmem:[%s3053_s28 + $0x198] sm:$0xff]  ;;  %v961_v31 = vrot.slane %v216_v20, 1  ;;  %v2613_v32 = vpack.c.bf16 %v271_v23, %v270_v22  ;;  %v3241_v39 = vld [vmem:[%s3053_s28] sm:$0xff] }
  0x1c   : > { %2714 = vmatprep.subr.bf16.mxu0 %v2713_v37  ;;  %v3212_v26 = vld [vmem:[%s3053_s28 + $0x188] sm:$0xff]  ;;  %v3223_v33 = vld [vmem:[%s3053_s28 + $0x1d8] sm:$0xff]  ;;  %v2741_v34 = vpack.c.bf16 %v1826_v25, %v1825_v24  ;;  %v1829_v45 = vld [vmem:[%s3752_s1 + $0x2e0] sm:$0xff] }
  0x1d   : > { %2588 = vmatpush3.bf16.msra.mxu1 %v2585_v36  ;;  %v3219_v28 = vld [vmem:[%s3053_s28 + $0x1c8] sm:$0xff]  ;;  %v273_v36 = vld [vmem:[%s3752_s1 + $0x58] sm:$0xff]  ;;  %v962_v40 = vsel %vm521_vm0, %v960_v30, %v961_v31  ;;  %v1831_v51 = vld [vmem:[%s3752_s1 + $0x2f0] sm:$0xff] }
  0x1e   : > { %2590 = vmatprep.subr.bf16.mxu1 %v2589_v42  ;;  %v1828_v38 = vld [vmem:[%s3752_s1 + $0x2d8] sm:$0xff]  ;;  %v2617_v41 = vpack.c.bf16 %v273_v36, %v272_v35  ;;  %v275_v44 = vld [vmem:[%s3752_s1 + $0x68] sm:$0xff]  ;;  %v3277_v57 = vld [vmem:[%s3053_s28 + $0x50] sm:$0xff] }
  0x1f   : > { %2716 = vmatpush3.bf16.msra.mxu0 %v2713_v37  ;;  %v1827_v37 = vld [vmem:[%s3752_s1 + $0x2d0] sm:$0xff]  ;;  %v1830_v46 = vld [vmem:[%s3752_s1 + $0x2e8] sm:$0xff]  ;;  %v277_v50 = vld [vmem:[%s3752_s1 + $0x78] sm:$0xff]  ;;  %v963_v0 = vrot.slane %v3277_v57, 1 }
  0x20   : > { %2718 = vmatprep.subr.bf16.mxu0 %v2717_v43  ;;  %v1832_v52 = vld [vmem:[%s3752_s1 + $0x2f8] sm:$0xff]  ;;  %v1770_v56 = vld [vmem:[%s3752_s1 + $0x108] sm:$0xff]  ;;  %v222_v58 = vld [vmem:[%s3053_s28 + $0x70] sm:$0x1] }
  0x21   : > { %2592 = vmatpush3.bf16.msra.mxu1 %v2589_v42  ;;  %v2745_v42 = vpack.c.bf16 %v1828_v38, %v1827_v37  ;;  %v1833_v59 = vld [vmem:[%s3752_s1 + $0x300] sm:$0xff]  ;;  %v964_v1 = vrot.slane %v222_v58, 1  ;;  %v1771_v2 = vld [vmem:[%s3752_s1 + $0x110] sm:$0xff]  ;;  %v1772_v10 = vld [vmem:[%s3752_s1 + $0x118] sm:$0xff] }
  0x22   : > { %2594 = vmatprep.subr.bf16.mxu1 %v2593_v48  ;;  %v3291_v3 = vld [vmem:[%s3053_s28 + $0x90] sm:$0xff]  ;;  %v3308_v20 = vld [vmem:[%s3053_s28 + $0x40] sm:$0xff]  ;;  %v2633_v25 = vpack.c.bf16 %v1772_v10, %v1771_v2  ;;  %v1774_v30 = vld [vmem:[%s3752_s1 + $0x128] sm:$0xff] }
  0x23   : > { %2720 = vmatpush3.bf16.msra.mxu0 %v2717_v43  ;;  %v274_v43 = vld [vmem:[%s3752_s1 + $0x60] sm:$0xff]  ;;  %v3298_v11 = vld [vmem:[%s3053_s28 + $0xd0] sm:$0xff]  ;;  %v966_v22 = vrot.slane %v3291_v3, 1  ;;  %v965_v24 = vsel %vm521_vm0, %v963_v0, %v964_v1  ;;  %v1840_v1 = vld [vmem:[%s3752_s1 + $0x338] sm:$0xff] }
  0x24   : > { %2722 = vmatprep.subr.bf16.mxu0 %v2721_v49  ;;  %v2621_v47 = vpack.c.bf16 %v275_v44, %v274_v43  ;;  %v234_v12 = vld [vmem:[%s3053_s28 + $0xf0] sm:$0x1]  ;;  %v969_v31 = vrot.slane %v3298_v11, 1  ;;  %v1837_v37 = vld [vmem:[%s3752_s1 + $0x320] sm:$0xff] }
  0x25   : > { %2596 = vmatpush3.bf16.msra.mxu1 %v2593_v48  ;;  %v2749_v48 = vpack.c.bf16 %v1830_v46, %v1829_v45  ;;  %v1835_v13 = vld [vmem:[%s3752_s1 + $0x310] sm:$0xff]  ;;  %v3338_v43 = vld [vmem:[%s3053_s28 + $0x80] sm:$0xff]  ;;  %v1776_v45 = vld [vmem:[%s3752_s1 + $0x138] sm:$0xff] }
  0x26   : > { %2598 = vmatprep.subr.bf16.mxu1 %v2597_v54  ;;  %v240_v35 = vld [vmem:[%s3053_s28 + $0x130] sm:$0x1]  ;;  %v3372_v2 = vld [vmem:[%s3053_s28 + $0x100] sm:$0xff] }
  0x27   : > { %2724 = vmatpush3.bf16.msra.mxu0 %v2721_v49  ;;  %v276_v49 = vld [vmem:[%s3752_s1 + $0x70] sm:$0xff] }
  0x28   : > { %2726 = vmatprep.subr.bf16.mxu0 %v2725_v55  ;;  %2158 = vmatmul.mubr.f32.vlgmr.msra.gmra.mrb[0].mxu1 %v3133_v60  ;;  %v2625_v53 = vpack.c.bf16 %v277_v50, %v276_v49  ;;  %v3327_v38 = vld [vmem:[%s3053_s28 + $0x150] sm:$0xff]  ;;  %v973_v49 = vrot.slane %v240_v35, 1  ;;  %v3349_v50 = vld [vmem:[%s3053_s28 + $0x200] sm:$0xff]  ;;  %v522_v35 = vrot.slane %v3241_v39, 1 }
  0x29   : > { %2600 = vmatpush3.bf16.msra.mxu1 %v2597_v54  ;;  %2160 = vmatprep.mubr.f32.mxu1 %v3152_v4  ;;  %v1769_v54 = vld [vmem:[%s3752_s1 + $0x100] sm:$0xff]  ;;  %v1839_v0 = vld [vmem:[%s3752_s1 + $0x330] sm:$0xff] }
  0x2a   : > { %2334 = vmatmul.mubr.f32.vlgmr.msra.gmra.mrb[0].mxu0 %v3136_v61  ;;  %2602 = vmatprep.subr.bf16.mxu1 %v2601_v62 }
  0x2b   : > { %2728 = vmatpush3.bf16.msra.mxu0 %v2725_v55  ;;  %2336 = vmatprep.mubr.f32.mxu0 %v3156_v5  ;;  %v2753_v55 = vpack.c.bf16 %v1832_v52, %v1831_v51  ;;  %v975_v52 = vrot.slane %v3327_v38, 1 }
  0x2c   : > { %2730 = vmatprep.subr.bf16.mxu0 %v2729_v63  ;;  %2161 = vmatmul.mubr.f32.gmra.mrb[2].mxu1 %v3159_v6 }
  0x2d   : > { %2604 = vmatpush3.bf16.msra.mxu1 %v2601_v62  ;;  %2163 = vmatprep.mubr.f32.mxu1 %v3180_v14  ;;  %v1834_v62 = vld [vmem:[%s3752_s1 + $0x308] sm:$0xff] }
  0x2e   : > { %2337 = vmatmul.mubr.f32.gmra.mrb[2].mxu0 %v3162_v8  ;;  %2606 = vmatprep.subr.bf16.mxu1 %v2605_v7 }
  0x2f   : > { %2732 = vmatpush3.bf16.msra.mxu0 %v2729_v63  ;;  %2339 = vmatprep.mubr.f32.mxu0 %v3184_v15  ;;  %v2629_v63 = vpack.c.bf16 %v1770_v56, %v1769_v54  ;;  %v3354_v54 = vld [vmem:[%s3053_s28 + $0x190] sm:$0xff]  ;;  %v1384_v56 = vrot.slane %v3349_v50, 1 }
  0x30   : > { %2734 = vmatprep.subr.bf16.mxu0 %v2733_v9  ;;  %2164 = vmatmul.mubr.f32.gmra.mrb[4].mxu1 %v3187_v16 }
  0x31   : > { %2608 = vmatpush3.bf16.msra.mxu1 %v2605_v7  ;;  %2166 = vmatprep.mubr.f32.mxu1 %v3212_v26  ;;  %v228_v7 = vld [vmem:[%s3053_s28 + $0xb0] sm:$0x1] }
  0x32   : > { %2340 = vmatmul.mubr.f32.gmra.mrb[4].mxu0 %v3190_v18  ;;  %2610 = vmatprep.subr.bf16.mxu1 %v2609_v17  ;;  %v967_v23 = vrot.slane %v228_v7, 1 }
  0x33   : > { %2736 = vmatpush3.bf16.msra.mxu0 %v2733_v9  ;;  %2342 = vmatprep.mubr.f32.mxu0 %v3216_v27  ;;  %v2757_v9 = vpack.c.bf16 %v1834_v62, %v1833_v59  ;;  %v3360_v59 = vld [vmem:[%s3053_s28 + $0x1d0] sm:$0xff] }
  0x34   : > { %2738 = vmatprep.subr.bf16.mxu0 %v2737_v21  ;;  %2167 = vmatmul.mubr.f32.gmra.mrb[6].mxu1 %v3219_v28  ;;  %v968_v46 = vsel %vm521_vm0, %v966_v22, %v967_v23  ;;  %v258_v62 = vld [vmem:[%s3053_s28 + $0x1f0] sm:$0x1]  ;;  %v981_v23 = vrot.slane %v3360_v59, 1 }
  0x35   : > { %2612 = vmatpush3.bf16.msra.mxu1 %v2609_v17  ;;  %2201 = vmatprep.mubr.f32.mxu1 %v3241_v39  ;;  %v1836_v17 = vld [vmem:[%s3752_s1 + $0x318] sm:$0xff] }
  0x36   : > { %2343 = vmatmul.mubr.f32.gmra.mrb[6].mxu0 %v3223_v33  ;;  %2614 = vmatprep.subr.bf16.mxu1 %v2613_v32  ;;  %v2761_v36 = vpack.c.bf16 %v1836_v17, %v1835_v13  ;;  %v978_v13 = vrot.slane %v3354_v54, 1 }
  0x37   : > { %2740 = vmatpush3.bf16.msra.mxu0 %v2737_v21  ;;  %2377 = vmatprep.mubr.f32.mxu0 %v962_v40  ;;  %v1773_v21 = vld [vmem:[%s3752_s1 + $0x120] sm:$0xff]  ;;  %v246_v40 = vld [vmem:[%s3053_s28 + $0x170] sm:$0x1] }
  0x38   : > { %2742 = vmatprep.subr.bf16.mxu0 %v2741_v34  ;;  %v2637_v44 = vpack.c.bf16 %v1774_v30, %v1773_v21  ;;  %v215_v21 = vld [vmem:[%s3053_s28 + $0x20] sm:$0x1]  ;;  %v2769_v30 = vpack.c.bf16 %v1840_v1, %v1839_v0  ;;  %v1846_v0 = vld [vmem:[%s3752_s1 + $0x368] sm:$0xff] }
  0x39   : > { %2616 = vmatpush3.bf16.msra.mxu1 %v2613_v32  ;;  %v970_v32 = vrot.slane %v234_v12, 1  ;;  %v3376_v12 = vld [vmem:[%s3053_s28 + $0x140] sm:$0xff] }
  0x3a   : > { %2618 = vmatprep.subr.bf16.mxu1 %v2617_v41 }
  0x3b   : > { %2744 = vmatpush3.bf16.msra.mxu0 %v2741_v34  ;;  %v3320_v34 = vld [vmem:[%s3053_s28 + $0x110] sm:$0xff]  ;;  %v971_v51 = vsel %vm521_vm0, %v969_v31, %v970_v32  ;;  %v1777_v31 = vld [vmem:[%s3752_s1 + $0x140] sm:$0xff]  ;;  %v1778_v32 = vld [vmem:[%s3752_s1 + $0x148] sm:$0xff] }
  0x3c   : > { %2746 = vmatprep.subr.bf16.mxu0 %v2745_v42  ;;  %v2645_v39 = vpack.c.bf16 %v1778_v32, %v1777_v31  ;;  %v1849_v31 = vld [vmem:[%s3752_s1 + $0x380] sm:$0xff]  ;;  %v1850_v32 = vld [vmem:[%s3752_s1 + $0x388] sm:$0xff] }
  0x3d   : > { %2620 = vmatpush3.bf16.msra.mxu1 %v2617_v41  ;;  %v1838_v41 = vld [vmem:[%s3752_s1 + $0x328] sm:$0xff] }
  0x3e   : > { %2622 = vmatprep.subr.bf16.mxu1 %v2621_v47  ;;  %v2765_v58 = vpack.c.bf16 %v1838_v41, %v1837_v37  ;;  %v1842_v37 = vld [vmem:[%s3752_s1 + $0x348] sm:$0xff]  ;;  %v523_v41 = vrot.slane %v215_v21, 1 }
  0x3f   : > { %2748 = vmatpush3.bf16.msra.mxu0 %v2745_v42  ;;  %v1775_v42 = vld [vmem:[%s3752_s1 + $0x130] sm:$0xff] }
  0x40   : > { %2750 = vmatprep.subr.bf16.mxu0 %v2749_v48 }
  0x41   : > { %2624 = vmatpush3.bf16.msra.mxu1 %v2621_v47  ;;  %v3345_v47 = vld [vmem:[%s3053_s28 + $0xc0] sm:$0xff] }
  0x42   : > { %2626 = vmatprep.subr.bf16.mxu1 %v2625_v53 }
  0x43   : > { %2752 = vmatpush3.bf16.msra.mxu0 %v2749_v48  ;;  %v972_v48 = vrot.slane %v3320_v34, 1 }
  0x44   : > { %2754 = vmatprep.subr.bf16.mxu0 %v2753_v55 }
  0x45   : > { %2628 = vmatpush3.bf16.msra.mxu1 %v2625_v53  ;;  %v976_v53 = vrot.slane %v246_v40, 1  ;;  %v974_v10 = vsel %vm521_vm0, %v972_v48, %v973_v49  ;;  %v3401_v40 = vld [vmem:[%s3053_s28 + $0x180] sm:$0xff]  ;;  %v1779_v49 = vld [vmem:[%s3752_s1 + $0x150] sm:$0xff] }
  0x46   : > { %2630 = vmatprep.subr.bf16.mxu1 %v2629_v63 }
  0x47   : > { %2756 = vmatpush3.bf16.msra.mxu0 %v2753_v55  ;;  %v252_v55 = vld [vmem:[%s3053_s28 + $0x1b0] sm:$0x1]  ;;  %v977_v22 = vsel %vm521_vm0, %v975_v52, %v976_v53  ;;  %v1844_v52 = vld [vmem:[%s3752_s1 + $0x358] sm:$0xff]  ;;  %v524_v53 = vsel %vm521_vm0, %v522_v35, %v523_v41  ;;  %v525_v35 = vrot.slane %v3308_v20, 1 }
  0x48   : > { %2758 = vmatprep.subr.bf16.mxu0 %v2757_v9  ;;  %2202 = vmatmul.mubr.f32.vlgmr.msra.gmra.mrb[0].mxu1 %v3308_v20  ;;  %v979_v17 = vrot.slane %v252_v55, 1 }
  0x49   : > { %2632 = vmatpush3.bf16.msra.mxu1 %v2629_v63  ;;  %2204 = vmatprep.mubr.f32.mxu1 %v3338_v43  ;;  %v261_v63 = vld [vmem:[%s3053_s28 + $0x220] sm:$0x1] }
  0x4a   : > { %2378 = vmatmul.mubr.f32.vlgmr.msra.gmra.mrb[0].mxu0 %v965_v24  ;;  %2634 = vmatprep.subr.bf16.mxu1 %v2633_v25  ;;  %v1385_v7 = vrot.slane %v261_v63, 1  ;;  %v982_v24 = vrot.slane %v258_v62, 1  ;;  %v1782_v62 = vld [vmem:[%s3752_s1 + $0x168] sm:$0xff]  ;;  %v1845_v63 = vld [vmem:[%s3752_s1 + $0x360] sm:$0xff] }
  0x4b   : > { %2760 = vmatpush3.bf16.msra.mxu0 %v2757_v9  ;;  %2380 = vmatprep.mubr.f32.mxu0 %v968_v46  ;;  %v2641_v9 = vpack.c.bf16 %v1776_v45, %v1775_v42  ;;  %v980_v42 = vsel %vm521_vm0, %v978_v13, %v979_v17  ;;  %v3405_v45 = vld [vmem:[%s3053_s28 + $0x1c0] sm:$0xff]  ;;  %v1847_v13 = vld [vmem:[%s3752_s1 + $0x370] sm:$0xff]  ;;  %v1848_v17 = vld [vmem:[%s3752_s1 + $0x378] sm:$0xff] }
  0x4c   : > { %2762 = vmatprep.subr.bf16.mxu0 %v2761_v36  ;;  %2205 = vmatmul.mubr.f32.gmra.mrb[2].mxu1 %v3345_v47  ;;  %v983_v46 = vsel %vm521_vm0, %v981_v23, %v982_v24  ;;  %v2785_v23 = vpack.c.bf16 %v1848_v17, %v1847_v13  ;;  %v1785_v24 = vld [vmem:[%s3752_s1 + $0x180] sm:$0xff] }
  0x4d   : > { %2636 = vmatpush3.bf16.msra.mxu1 %v2633_v25  ;;  %v3383_v25 = vsel %vm521_vm0, %v1384_v56, %v1385_v7  ;;  %2207 = vmatprep.mubr.f32.mxu1 %v3372_v2  ;;  %v2781_v7 = vpack.c.bf16 %v1846_v0, %v1845_v63  ;;  %v1789_v0 = vld [vmem:[%s3752_s1 + $0x1a0] sm:$0xff] }
  0x4e   : > { %2381 = vmatmul.mubr.f32.gmra.mrb[2].mxu0 %v971_v51  ;;  %2638 = vmatprep.subr.bf16.mxu1 %v2637_v44  ;;  %v1843_v51 = vld [vmem:[%s3752_s1 + $0x350] sm:$0xff] }
  0x4f   : > { %2764 = vmatpush3.bf16.msra.mxu0 %v2761_v36  ;;  %v1841_v36 = vld [vmem:[%s3752_s1 + $0x340] sm:$0xff]  ;;  %2383 = vmatprep.mubr.f32.mxu0 %v974_v10  ;;  %v2777_v56 = vpack.c.bf16 %v1844_v52, %v1843_v51  ;;  %v1784_v10 = vld [vmem:[%s3752_s1 + $0x178] sm:$0xff]  ;;  %v531_v52 = vrot.slane %v3345_v47, 1 }
  0x50   : > { %2766 = vmatprep.subr.bf16.mxu0 %v2765_v58  ;;  %2208 = vmatmul.mubr.f32.gmra.mrb[4].mxu1 %v3376_v12  ;;  %v2773_v48 = vpack.c.bf16 %v1842_v37, %v1841_v36  ;;  %v227_v37 = vld [vmem:[%s3053_s28 + $0xa0] sm:$0x1] }
  0x51   : > { %2640 = vmatpush3.bf16.msra.mxu1 %v2637_v44  ;;  %v1780_v44 = vld [vmem:[%s3752_s1 + $0x158] sm:$0xff]  ;;  %2210 = vmatprep.mubr.f32.mxu1 %v3401_v40  ;;  %v529_v51 = vrot.slane %v227_v37, 1  ;;  %v1855_v37 = vld [vmem:[%s3752_s1 + $0x3b0] sm:$0xff] }
  0x52   : > { %2384 = vmatmul.mubr.f32.gmra.mrb[4].mxu0 %v977_v22  ;;  %2642 = vmatprep.subr.bf16.mxu1 %v2641_v9  ;;  %v2649_v55 = vpack.c.bf16 %v1780_v44, %v1779_v49  ;;  %v221_v22 = vld [vmem:[%s3053_s28 + $0x60] sm:$0x1]  ;;  %v1851_v49 = vld [vmem:[%s3752_s1 + $0x390] sm:$0xff]  ;;  %v1852_v44 = vld [vmem:[%s3752_s1 + $0x398] sm:$0xff] }
  0x53   : > { %2768 = vmatpush3.bf16.msra.mxu0 %v2765_v58  ;;  %2386 = vmatprep.mubr.f32.mxu0 %v980_v42  ;;  %v1781_v58 = vld [vmem:[%s3752_s1 + $0x160] sm:$0xff]  ;;  %v526_v36 = vrot.slane %v221_v22, 1  ;;  %v2793_v63 = vpack.c.bf16 %v1852_v44, %v1851_v49 }
  0x54   : > { %2770 = vmatprep.subr.bf16.mxu0 %v2769_v30  ;;  %2211 = vmatmul.mubr.f32.gmra.mrb[6].mxu1 %v3405_v45  ;;  %v2653_v1 = vpack.c.bf16 %v1782_v62, %v1781_v58  ;;  %v233_v42 = vld [vmem:[%s3053_s28 + $0xe0] sm:$0x1] }
  0x55   : > { %2644 = vmatpush3.bf16.msra.mxu1 %v2641_v9  ;;  %2245 = vmatprep.mubr.f32.mxu1 %v524_v53  ;;  %v1783_v9 = vld [vmem:[%s3752_s1 + $0x170] sm:$0xff]  ;;  %v3479_v53 = vsel %vm521_vm0, %v525_v35, %v526_v36  ;;  %v245_v62 = vld [vmem:[%s3053_s28 + $0x160] sm:$0x1]  ;;  %v1792_v36 = vld [vmem:[%s3752_s1 + $0x1b8] sm:$0xff] }
  0x56   : > { %2387 = vmatmul.mubr.f32.gmra.mrb[6].mxu0 %v983_v46  ;;  %2646 = vmatprep.subr.bf16.mxu1 %v2645_v39  ;;  %v2657_v21 = vpack.c.bf16 %v1784_v10, %v1783_v9  ;;  %v1787_v46 = vld [vmem:[%s3752_s1 + $0x190] sm:$0xff]  ;;  %v1853_v9 = vld [vmem:[%s3752_s1 + $0x3a0] sm:$0xff]  ;;  %v1854_v10 = vld [vmem:[%s3752_s1 + $0x3a8] sm:$0xff] }
  0x57   : > { %2772 = vmatpush3.bf16.msra.mxu0 %v2769_v30  ;;  %2421 = vmatprep.mubr.f32.mxu0 %v3308_v20  ;;  %v1786_v30 = vld [vmem:[%s3752_s1 + $0x188] sm:$0xff]  ;;  %v528_v20 = vrot.slane %v3338_v43, 1  ;;  %v1791_v35 = vld [vmem:[%s3752_s1 + $0x1b0] sm:$0xff] }
  0x58   : > { %2774 = vmatprep.subr.bf16.mxu0 %v2773_v48  ;;  %v2661_v41 = vpack.c.bf16 %v1786_v30, %v1785_v24  ;;  %v251_v24 = vld [vmem:[%s3053_s28 + $0x1a0] sm:$0x1]  ;;  %v2673_v49 = vpack.c.bf16 %v1792_v36, %v1791_v35  ;;  %v1527_v35 = vld [vmem:[%s3753_s2 + $0x8] sm:$0xff] }
  0x59   : > { %2648 = vmatpush3.bf16.msra.mxu1 %v2645_v39  ;;  %v2789_v39 = vpack.c.bf16 %v1850_v32, %v1849_v31  ;;  %v3498_v13 = vsel %vm521_vm0, %v528_v20, %v529_v51  ;;  %v257_v31 = vld [vmem:[%s3053_s28 + $0x1e0] sm:$0x1]  ;;  %v2797_v32 = vpack.c.bf16 %v1854_v10, %v1853_v9  ;;  %v1794_v51 = vld [vmem:[%s3752_s1 + $0x1c8] sm:$0xff] }
  0x5a   : > { %2650 = vmatprep.subr.bf16.mxu1 %v2649_v55  ;;  %v544_v20 = vrot.slane %v257_v31, 1  ;;  %v1797_v9 = vld [vmem:[%s3752_s1 + $0x1e0] sm:$0xff]  ;;  %v1798_v10 = vld [vmem:[%s3752_s1 + $0x1e8] sm:$0xff] }
  0x5b   : > { %2776 = vmatpush3.bf16.msra.mxu0 %v2773_v48  ;;  %v1788_v48 = vld [vmem:[%s3752_s1 + $0x198] sm:$0xff]  ;;  %v1865_v36 = vld [vmem:[%s3752_s1 + $0x400] sm:$0xff] }
  0x5c   : > { %2778 = vmatprep.subr.bf16.mxu0 %v2777_v56  ;;  %v2665_v58 = vpack.c.bf16 %v1788_v48, %v1787_v46  ;;  %v543_v46 = vrot.slane %v3405_v45, 1 }
  0x5d   : > { %2652 = vmatpush3.bf16.msra.mxu1 %v2649_v55  ;;  %v532_v55 = vrot.slane %v233_v42, 1 }
  0x5e   : > { %2654 = vmatprep.subr.bf16.mxu1 %v2653_v1 }
  0x5f   : > { %2780 = vmatpush3.bf16.msra.mxu0 %v2777_v56  ;;  %v239_v56 = vld [vmem:[%s3053_s28 + $0x120] sm:$0x1]  ;;  %v3503_v22 = vsel %vm521_vm0, %v531_v52, %v532_v55  ;;  %v1858_v52 = vld [vmem:[%s3752_s1 + $0x3c8] sm:$0xff] }
  0x60   : > { %2782 = vmatprep.subr.bf16.mxu0 %v2781_v7  ;;  %v535_v17 = vrot.slane %v239_v56, 1  ;;  %v3551_v56 = vsel %vm521_vm0, %v543_v46, %v544_v20  ;;  %v1868_v46 = vld [vmem:[%s3752_s1 + $0x418] sm:$0xff]  ;;  %v1528_v20 = vld [vmem:[%s3753_s2 + $0x10] sm:$0xff] }
  0x61   : > { %2656 = vmatpush3.bf16.msra.mxu1 %v2653_v1  ;;  %v1790_v1 = vld [vmem:[%s3752_s1 + $0x1a8] sm:$0xff] }
  0x62   : > { %2658 = vmatprep.subr.bf16.mxu1 %v2657_v21  ;;  %v2669_v30 = vpack.c.bf16 %v1790_v1, %v1789_v0  ;;  %v1860_v0 = vld [vmem:[%s3752_s1 + $0x3d8] sm:$0xff] }
  0x63   : > { %2784 = vmatpush3.bf16.msra.mxu0 %v2781_v7  ;;  %v534_v7 = vrot.slane %v3372_v2, 1 }
  0x64   : > { %2786 = vmatprep.subr.bf16.mxu0 %v2785_v23 }
  0x65   : > { %2660 = vmatpush3.bf16.msra.mxu1 %v2657_v21  ;;  %v537_v21 = vrot.slane %v3376_v12, 1  ;;  %v3524_v42 = vsel %vm521_vm0, %v534_v7, %v535_v17  ;;  %v2685_v17 = vpack.c.bf16 %v1798_v10, %v1797_v9  ;;  %v1537_v9 = vld [vmem:[%s3753_s2 + $0x58] sm:$0xff]  ;;  %v260_v10 = vld [vmem:[%s3053_s28 + $0x208] sm:$0xff] }
  0x66   : > { %2662 = vmatprep.subr.bf16.mxu1 %v2661_v41 }
  0x67   : > { %2788 = vmatpush3.bf16.msra.mxu0 %v2785_v23  ;;  %v538_v23 = vrot.slane %v245_v62, 1 }
  0x68   : > { %2790 = vmatprep.subr.bf16.mxu0 %v2789_v39  ;;  %2246 = vmatmul.mubr.f32.vlgmr.msra.gmra.mrb[0].mxu1 %v3479_v53 }
  0x69   : > { %2664 = vmatpush3.bf16.msra.mxu1 %v2661_v41  ;;  %2248 = vmatprep.mubr.f32.mxu1 %v3498_v13  ;;  %v1856_v41 = vld [vmem:[%s3752_s1 + $0x3b8] sm:$0xff]  ;;  %v3529_v48 = vsel %vm521_vm0, %v537_v21, %v538_v23 }
  0x6a   : > { %2422 = vmatmul.mubr.f32.vlgmr.msra.gmra.mrb[0].mxu0 %v3338_v43  ;;  %2666 = vmatprep.subr.bf16.mxu1 %v2665_v58  ;;  %v540_v43 = vrot.slane %v3401_v40, 1  ;;  %v2801_v44 = vpack.c.bf16 %v1856_v41, %v1855_v37  ;;  %v1800_v23 = vld [vmem:[%s3752_s1 + $0x1f8] sm:$0xff] }
  0x6b   : > { %2792 = vmatpush3.bf16.msra.mxu0 %v2789_v39  ;;  %2424 = vmatprep.mubr.f32.mxu0 %v3345_v47  ;;  %v541_v39 = vrot.slane %v251_v24, 1  ;;  %v1793_v47 = vld [vmem:[%s3752_s1 + $0x1c0] sm:$0xff]  ;;  %v1863_v24 = vld [vmem:[%s3752_s1 + $0x3f0] sm:$0xff] }
  0x6c   : > { %2794 = vmatprep.subr.bf16.mxu0 %v2793_v63  ;;  %2249 = vmatmul.mubr.f32.gmra.mrb[2].mxu1 %v3503_v22 }
  0x6d   : > { %2668 = vmatpush3.bf16.msra.mxu1 %v2665_v58  ;;  %2251 = vmatprep.mubr.f32.mxu1 %v3524_v42  ;;  %v3547_v55 = vsel %vm521_vm0, %v540_v43, %v541_v39  ;;  %v2677_v58 = vpack.c.bf16 %v1794_v51, %v1793_v47  ;;  %v1866_v43 = vld [vmem:[%s3752_s1 + $0x408] sm:$0xff]  ;;  %v1867_v39 = vld [vmem:[%s3752_s1 + $0x410] sm:$0xff]  ;;  %v1530_v51 = vld [vmem:[%s3753_s2 + $0x20] sm:$0xff] }
  0x6e   : > { %2425 = vmatmul.mubr.f32.gmra.mrb[2].mxu0 %v3372_v2  ;;  %2670 = vmatprep.subr.bf16.mxu1 %v2669_v30  ;;  %v1857_v2 = vld [vmem:[%s3752_s1 + $0x3c0] sm:$0xff]  ;;  %v2821_v41 = vpack.c.bf16 %v1866_v43, %v1865_v36 }
  0x6f   : > { %2796 = vmatpush3.bf16.msra.mxu0 %v2793_v63  ;;  %2427 = vmatprep.mubr.f32.mxu0 %v3376_v12  ;;  %v2805_v62 = vpack.c.bf16 %v1858_v52, %v1857_v2  ;;  %v1795_v63 = vld [vmem:[%s3752_s1 + $0x1d0] sm:$0xff]  ;;  %v1796_v12 = vld [vmem:[%s3752_s1 + $0x1d8] sm:$0xff]  ;;  %v1531_v2 = vld [vmem:[%s3753_s2 + $0x28] sm:$0xff] }
  0x70   : > { %2798 = vmatprep.subr.bf16.mxu0 %v2797_v32  ;;  %2252 = vmatmul.mubr.f32.gmra.mrb[4].mxu1 %v3529_v48  ;;  %v2681_v1 = vpack.c.bf16 %v1796_v12, %v1795_v63  ;;  %v1869_v52 = vld [vmem:[%s3752_s1 + $0x420] sm:$0xff]  ;;  %v1533_v12 = vld [vmem:[%s3753_s2 + $0x38] sm:$0xff] }
  0x71   : > { %2672 = vmatpush3.bf16.msra.mxu1 %v2669_v30  ;;  %2254 = vmatprep.mubr.f32.mxu1 %v3547_v55 }
  0x72   : > { %2428 = vmatmul.mubr.f32.gmra.mrb[4].mxu0 %v3401_v40  ;;  %2674 = vmatprep.subr.bf16.mxu1 %v2673_v49  ;;  %v1859_v40 = vld [vmem:[%s3752_s1 + $0x3d0] sm:$0xff] }
  0x73   : > { %2800 = vmatpush3.bf16.msra.mxu0 %v2797_v32  ;;  %2430 = vmatprep.mubr.f32.mxu0 %v3405_v45  ;;  %v2809_v7 = vpack.c.bf16 %v1860_v0, %v1859_v40  ;;  %v1861_v45 = vld [vmem:[%s3752_s1 + $0x3e0] sm:$0xff] }
  0x74   : > { %2802 = vmatprep.subr.bf16.mxu0 %v2801_v44  ;;  %2255 = vmatmul.mubr.f32.gmra.mrb[6].mxu1 %v3551_v56  ;;  %v1526_v32 = vld [vmem:[%s3753_s2] sm:$0xff] }
  0x75   : > { %2676 = vmatpush3.bf16.msra.mxu1 %v2673_v49  ;;  %2289 = vmatprep.mubr.f32.mxu1 %v3193_v19  ;;  %v1799_v19 = vld [vmem:[%s3752_s1 + $0x1f0] sm:$0xff]  ;;  %v2853_v37 = vpack.c.bf16 %v1527_v35, %v1526_v32  ;;  %v1529_v49 = vld [vmem:[%s3753_s2 + $0x18] sm:$0xff] }
  0x76   : > { %2431 = vmatmul.mubr.f32.gmra.mrb[6].mxu0 %v3349_v50  ;;  %2678 = vmatprep.subr.bf16.mxu1 %v2677_v58  ;;  %v1862_v50 = vld [vmem:[%s3752_s1 + $0x3e8] sm:$0xff]  ;;  %v2689_v30 = vpack.c.bf16 %v1800_v23, %v1799_v19  ;;  %v2857_v47 = vpack.c.bf16 %v1529_v49, %v1528_v20  ;;  %v1540_v19 = vld [vmem:[%s3753_s2 + $0x70] sm:$0xff]  ;;  %v1541_v23 = vld [vmem:[%s3753_s2 + $0x78] sm:$0xff] }
  0x77   : > { %2804 = vmatpush3.bf16.msra.mxu0 %v2801_v44  ;;  %2465 = vmatprep.mubr.f32.mxu0 %v3133_v60  ;;  %v2813_v21 = vpack.c.bf16 %v1862_v50, %v1861_v45  ;;  %v1864_v60 = vld [vmem:[%s3752_s1 + $0x3f8] sm:$0xff]  ;;  %v2825_v44 = vpack.c.bf16 %v1868_v46, %v1867_v39  ;;  %v1539_v50 = vld [vmem:[%s3753_s2 + $0x68] sm:$0xff] }
  0x78   : > { %2806 = vmatprep.subr.bf16.mxu0 %v2805_v62  ;;  %v2817_v31 = vpack.c.bf16 %v1864_v60, %v1863_v24  ;;  %v1879_v24 = vld [vmem:[%s3752_s1 + $0x470] sm:$0xff]  ;;  %v2881_v60 = vpack.c.bf16 %v1541_v23, %v1540_v19 }
  0x79   : > { %2680 = vmatpush3.bf16.msra.mxu1 %v2677_v58  ;;  %v1870_v58 = vld [vmem:[%s3752_s1 + $0x428] sm:$0xff] }
  0x7a   : > { %2682 = vmatprep.subr.bf16.mxu1 %v2681_v1  ;;  %v2829_v63 = vpack.c.bf16 %v1870_v58, %v1869_v52 }
  0x7b   : > { %2808 = vmatpush3.bf16.msra.mxu0 %v2805_v62  ;;  %v2861_v62 = vpack.c.bf16 %v1531_v2, %v1530_v51 }
  0x7c   : > { %2810 = vmatprep.subr.bf16.mxu0 %v2809_v7 }
  0x7d   : > { %2684 = vmatpush3.bf16.msra.mxu1 %v2681_v1  ;;  %v1535_v1 = vld [vmem:[%s3753_s2 + $0x48] sm:$0xff] }
  0x7e   : > { %2686 = vmatprep.subr.bf16.mxu1 %v2685_v17 }
  0x7f   : > { %2812 = vmatpush3.bf16.msra.mxu0 %v2809_v7 }
  0x80   : > { %2814 = vmatprep.subr.bf16.mxu0 %v2813_v21 }
  0x81   : > { %2688 = vmatpush3.bf16.msra.mxu1 %v2685_v17 }
  0x82   : > { %2690 = vmatprep.subr.bf16.mxu1 %v2689_v30 }
  0x83   : > { %2816 = vmatpush3.bf16.msra.mxu0 %v2813_v21 }
  0x84   : > { %2818 = vmatprep.subr.bf16.mxu0 %v2817_v31 }
  0x85   : > { %2692 = vmatpush3.bf16.msra.mxu1 %v2689_v30 }
  0x86   : > { %2854 = vmatprep.subr.bf16.mxu1 %v2853_v37 }
  0x87   : > { %2820 = vmatpush3.bf16.msra.mxu0 %v2817_v31 }
  0x88   : > { %2822 = vmatprep.subr.bf16.mxu0 %v2821_v41  ;;  %2290 = vmatmul.mubr.f32.vlgmr.msra.gmra.mrb[0].mxu1 %v3277_v57  ;;  %v1532_v57 = vld [vmem:[%s3753_s2 + $0x30] sm:$0xff] }
  0x89   : > { %2856 = vmatpush3.bf16.msra.mxu1 %v2853_v37  ;;  %2292 = vmatprep.mubr.f32.mxu1 %v3291_v3  ;;  %v1872_v3 = vld [vmem:[%s3752_s1 + $0x438] sm:$0xff]  ;;  %v2865_v40 = vpack.c.bf16 %v1533_v12, %v1532_v57 }
  0x8a   : > { %2466 = vmatmul.mubr.f32.vlgmr.msra.gmra.mrb[0].mxu0 %v3152_v4  ;;  %2858 = vmatprep.subr.bf16.mxu1 %v2857_v47  ;;  %v1871_v4 = vld [vmem:[%s3752_s1 + $0x430] sm:$0xff] }
  0x8b   : > { %2824 = vmatpush3.bf16.msra.mxu0 %v2821_v41  ;;  %2468 = vmatprep.mubr.f32.mxu0 %v3159_v6  ;;  %v2833_v0 = vpack.c.bf16 %v1872_v3, %v1871_v4  ;;  %v1873_v6 = vld [vmem:[%s3752_s1 + $0x440] sm:$0xff] }
  0x8c   : > { %2826 = vmatprep.subr.bf16.mxu0 %v2825_v44  ;;  %2293 = vmatmul.mubr.f32.gmra.mrb[2].mxu1 %v3298_v11  ;;  %v1534_v11 = vld [vmem:[%s3753_s2 + $0x40] sm:$0xff] }
  0x8d   : > { %2860 = vmatpush3.bf16.msra.mxu1 %v2857_v47  ;;  %2295 = vmatprep.mubr.f32.mxu1 %v3320_v34  ;;  %v1874_v34 = vld [vmem:[%s3752_s1 + $0x448] sm:$0xff]  ;;  %v2869_v7 = vpack.c.bf16 %v1535_v1, %v1534_v11 }
  0x8e   : > { %2862 = vmatprep.subr.bf16.mxu1 %v2861_v62  ;;  %2469 = vmatmul.mubr.f32.gmra.mrb[2].mxu0 %v3180_v14  ;;  %v2837_v14 = vpack.c.bf16 %v1874_v34, %v1873_v6 }
  0x8f   : > { %2828 = vmatpush3.bf16.msra.mxu0 %v2825_v44  ;;  %2471 = vmatprep.mubr.f32.mxu0 %v3187_v16  ;;  %v1875_v16 = vld [vmem:[%s3752_s1 + $0x450] sm:$0xff] }
  0x90   : > { %2830 = vmatprep.subr.bf16.mxu0 %v2829_v63  ;;  %2296 = vmatmul.mubr.f32.gmra.mrb[4].mxu1 %v3327_v38  ;;  %v1536_v38 = vld [vmem:[%s3753_s2 + $0x50] sm:$0xff] }
  0x91   : > { %2864 = vmatpush3.bf16.msra.mxu1 %v2861_v62  ;;  %2298 = vmatprep.mubr.f32.mxu1 %v3354_v54  ;;  %v1876_v54 = vld [vmem:[%s3752_s1 + $0x458] sm:$0xff]  ;;  %v2873_v45 = vpack.c.bf16 %v1537_v9, %v1536_v38 }
  0x92   : > { %2866 = vmatprep.subr.bf16.mxu1 %v2865_v40  ;;  %2472 = vmatmul.mubr.f32.gmra.mrb[4].mxu0 %v3212_v26  ;;  %v2841_v26 = vpack.c.bf16 %v1876_v54, %v1875_v16 }
  0x93   : > { %2832 = vmatpush3.bf16.msra.mxu0 %v2829_v63  ;;  %2474 = vmatprep.mubr.f32.mxu0 %v3219_v28  ;;  %v1877_v28 = vld [vmem:[%s3752_s1 + $0x460] sm:$0xff] }
  0x94   : > { %2834 = vmatprep.subr.bf16.mxu0 %v2833_v0  ;;  %2299 = vmatmul.mubr.f32.gmra.mrb[6].mxu1 %v3360_v59  ;;  %v1538_v59 = vld [vmem:[%s3753_s2 + $0x60] sm:$0xff] }
  0x95   : > { %2868 = vmatpush3.bf16.msra.mxu1 %v2865_v40  ;;  %2553 = vmatprep.mubr.f32.mxu1 %v3069_v29  ;;  %v1878_v29 = vld [vmem:[%s3752_s1 + $0x468] sm:$0xff]  ;;  %v2877_v17 = vpack.c.bf16 %v1539_v50, %v1538_v59 }
  0x96   : > { %2870 = vmatprep.subr.bf16.mxu1 %v2869_v7  ;;  %2475 = vmatmul.mubr.f32.gmra.mrb[6].mxu0 %v260_v10  ;;  %v2845_v21 = vpack.c.bf16 %v1878_v29, %v1877_v28 }
  0x97   : > { %2836 = vmatpush3.bf16.msra.mxu0 %v2833_v0  ;;  %2509 = vmatprep.mubr.f32.mxu0 %v3479_v53  ;;  %v1880_v53 = vld [vmem:[%s3752_s1 + $0x478] sm:$0xff] }
  0x98   : > { %2838 = vmatprep.subr.bf16.mxu0 %v2837_v14  ;;  %v2849_v30 = vpack.c.bf16 %v1880_v53, %v1879_v24 }
  0x99   : > { %2872 = vmatpush3.bf16.msra.mxu1 %v2869_v7 }
  0x9a   : > { %2874 = vmatprep.subr.bf16.mxu1 %v2873_v45 }
  0x9b   : > { %2840 = vmatpush3.bf16.msra.mxu0 %v2837_v14 }
  0x9c   : > { %2842 = vmatprep.subr.bf16.mxu0 %v2841_v26 }
  0x9d   : > { %2876 = vmatpush3.bf16.msra.mxu1 %v2873_v45 }
  0x9e   : > { %2878 = vmatprep.subr.bf16.mxu1 %v2877_v17 }
  0x9f   : > { %2844 = vmatpush3.bf16.msra.mxu0 %v2841_v26 }
  0xa0   : > { %2846 = vmatprep.subr.bf16.mxu0 %v2845_v21 }
  0xa1   : > { %2880 = vmatpush3.bf16.msra.mxu1 %v2877_v17 }
  0xa2   : > { %2882 = vmatprep.subr.bf16.mxu1 %v2881_v60 }
  0xa3   : > { %2848 = vmatpush3.bf16.msra.mxu0 %v2845_v21 }
  0xa4   : > { %2850 = vmatprep.subr.bf16.mxu0 %v2849_v30 }
  0xa5   : > { %2884 = vmatpush3.bf16.msra.mxu1 %v2881_v60 }
  0xa7   : > { %2852 = vmatpush3.bf16.msra.mxu0 %v2849_v30 }
  0xa8   : > { %2554 = vmatmul.mubr.f32.vlgmr.msra.gmra.mrb[8].mxu1 %v3136_v61 }
  0xa9   : > { %2556 = vmatprep.mubr.f32.mxu1 %v3156_v5 }
  0xaa   : > { %2510 = vmatmul.mubr.f32.vlgmr.msra.gmra.mrb[0].mxu0 %v3498_v13 }
  0xab   : > { %2512 = vmatprep.mubr.f32.mxu0 %v3503_v22 }
  0xac   : > { %2557 = vmatmul.mubr.f32.gmra.mrb[10].mxu1 %v3162_v8 }
  0xad   : > { %2559 = vmatprep.mubr.f32.mxu1 %v3184_v15 }
  0xae   : > { %2513 = vmatmul.mubr.f32.gmra.mrb[2].mxu0 %v3524_v42 }
  0xaf   : > { %2515 = vmatprep.mubr.f32.mxu0 %v3529_v48 }
  0xb0   : > { %2560 = vmatmul.mubr.f32.gmra.mrb[12].mxu1 %v3190_v18 }
  0xb1   : > { %2562 = vmatprep.mubr.f32.mxu1 %v3216_v27 }
  0xb2   : > { %2516 = vmatmul.mubr.f32.gmra.mrb[4].mxu0 %v3547_v55 }
  0xb3   : > { %2518 = vmatprep.mubr.f32.mxu0 %v3551_v56 }
  0xb4   : > { %2563 = vmatmul.mubr.f32.gmra.mrb[14].mxu1 %v3223_v33 }
  0xb6   : > { %2519 = vmatmul.mubr.f32.gmra.mrb[6].mxu0 %v3383_v25 }
 0x15b   : > { %v2291_v61 = vpop.f32.mrb[0].mxu1 }
 0x15c   : > { %v767_v5 = vpop.f32.mrb[1].mxu1 }
 0x15f   : > { %v2294_v8 = vpop.f32.mrb[2].mxu1 }
 0x160   : > { %v777_v13 = vpop.f32.mrb[3].mxu1 }
 0x163   : > { %v2297_v15 = vpop.f32.mrb[4].mxu1 }
 0x164   : > { %v787_v22 = vpop.f32.mrb[5].mxu1 }
 0x167   : > { %v2300_v42 = vpop.f32.mrb[6].mxu1 }
 0x168   : > { %v797_v48 = vpop.f32.mrb[7].mxu1 }
 0x17b   : > { %v2555_v18 = vpop.f32.mrb[8].mxu1 }
 0x17c   : > { %1648 = vst [vmem:[%s3725_s19 + $0x8] sm:$0xff] %v2555_v18  ;;  %v1608_v33 = vpop.f32.mrb[9].mxu1 }
 0x17d   : > { %v2511_v27 = vpop.f32.mrb[0].mxu0  ;;  %1647 = vst [vmem:[%s3725_s19] sm:$0xff] %v1608_v33 }
 0x17e   : > { %v2885_v25 = vadd.f32 %v2511_v27, %v2291_v61  ;;  %v1471_v55 = vpop.f32.mrb[1].mxu0 }
 0x17f   : > { %v2886_v56 = vadd.f32 %v1471_v55, %v767_v5  ;;  %v2558_v31 = vpop.f32.mrb[10].mxu1 }
 0x180   : > { %1519 = vst [vmem:[%s3730_s22 + $0x8] sm:$0xff] %v2885_v25  ;;  %1650 = vst [vmem:[%s3725_s19 + $0x18] sm:$0xff] %v2558_v31  ;;  %v1618_v35 = vpop.f32.mrb[11].mxu1 }
 0x181   : > { %1518 = vst [vmem:[%s3730_s22] sm:$0xff] %v2886_v56  ;;  %v2514_v32 = vpop.f32.mrb[2].mxu0  ;;  %1649 = vst [vmem:[%s3725_s19 + $0x10] sm:$0xff] %v1618_v35 }
 0x182   : > { %v2887_v36 = vadd.f32 %v2514_v32, %v2294_v8  ;;  %v1481_v43 = vpop.f32.mrb[3].mxu0 }
 0x183   : > { %v2888_v37 = vadd.f32 %v1481_v43, %v777_v13  ;;  %v2561_v41 = vpop.f32.mrb[12].mxu1 }
 0x184   : > { %1521 = vst [vmem:[%s3730_s22 + $0x18] sm:$0xff] %v2887_v36  ;;  %1652 = vst [vmem:[%s3725_s19 + $0x28] sm:$0xff] %v2561_v41  ;;  %v1628_v46 = vpop.f32.mrb[13].mxu1 }
 0x185   : > { %1520 = vst [vmem:[%s3730_s22 + $0x10] sm:$0xff] %v2888_v37  ;;  %v2517_v39 = vpop.f32.mrb[4].mxu0  ;;  %1651 = vst [vmem:[%s3725_s19 + $0x20] sm:$0xff] %v1628_v46 }
 0x186   : > { %v2889_v20 = vadd.f32 %v2517_v39, %v2297_v15  ;;  %v1491_v49 = vpop.f32.mrb[5].mxu0 }
 0x187   : > { %v2890_v44 = vadd.f32 %v1491_v49, %v787_v22  ;;  %v2564_v47 = vpop.f32.mrb[14].mxu1 }
 0x188   : > { %1523 = vst [vmem:[%s3730_s22 + $0x28] sm:$0xff] %v2889_v20  ;;  %1654 = vst [vmem:[%s3725_s19 + $0x38] sm:$0xff] %v2564_v47  ;;  %v1638_v2 = vpop.f32.mrb[15].mxu1 }
 0x189   : > { %1522 = vst [vmem:[%s3730_s22 + $0x20] sm:$0xff] %v2890_v44  ;;  %v2520_v51 = vpop.f32.mrb[6].mxu0  ;;  %1653 = vst [vmem:[%s3725_s19 + $0x30] sm:$0xff] %v1638_v2 }
 0x18a   : > { %v2891_v52 = vadd.f32 %v2520_v51, %v2300_v42  ;;  %v1501_v58 = vpop.f32.mrb[7].mxu0 }
 0x18b   : > { %v2892_v62 = vadd.f32 %v1501_v58, %v797_v48 }
 0x18c   : > { %1525 = vst [vmem:[%s3730_s22 + $0x38] sm:$0xff] %v2891_v52 }
 0x18d   : > { %1524 = vst [vmem:[%s3730_s22 + $0x30] sm:$0xff] %v2892_v62 }
 0x18e PF: > { %s15_s15 = sadd.s32 1, %s2964_s15  }
 0x18f   : > { %p12_p4 = scmp.ge.s32.totalorder %s15_s15, 4  }
 0x191   :  { %14 = sbr.rel (!%p12_p4) target bundleno = 1 (0x1), region = 82 }

// kernel: a_call__.8
= control target key start
LH: loop header
LB: loop body
LE: loop exit
PB: predicated region body
PF: predicated region fallthrough
CT: control target
= control target key end

     0   :  { %s2931_s18 = smov 0   ;;  %s3772_s0 = inlined_call_operand.vmem [shape: f32[2,10,10,128], index: 0, kind: input, shape index: {}]   ;;  %s3773_s1 = inlined_call_operand.vmem [shape: f32[1,1,128], index: 1, kind: input, shape index: {}]   ;;  %s3774_s2 = inlined_call_operand.vmem [shape: f32[1,1,128], index: 2, kind: input, shape index: {}]   ;;  %s3775_s3 = inlined_call_operand.vmem [shape: f32[9,128,128], index: 3, kind: input, shape index: {}]   ;;  %s3776_s4 = inlined_call_operand.vmem [shape: f32[2,8,8,128], index: 4, kind: input, shape index: {}]   ;;  %s3777_s5 = inlined_call_operand.vmem [shape: f32[2,8,8,128], index: 5, kind: output, shape index: {}]  }
   0x1 LB: > { %s1728_s19 = sadd.s32 4294967295, %s2898_s18   ;;  %p1732_p0 = scmp.ge.s32.totalorder %s2898_s18, 1  ;;  %s2898_s18 = sphi %s2931_s18, %s15_s18  }
   0x2   : > { %p197_p1 = scmp.lt.s32.totalorder %s2898_s18, 3 }
   0x4   : > { %p198_p2 = pnand %p1732_p0, %p197_p1 }
   0x5   : > { %v382_v0 = vld [vmem:[%s3775_s3] sm:$0xff] (!%p198_p2)  ;;  %v383_v1 = vld [vmem:[%s3775_s3 + $0x8] sm:$0xff] (!%p198_p2)  ;;  %p230_p3 = scmp.lt.s32.totalorder (!%p198_p2), %s1728_s19, 1  ;;  %v384_v5 = vld [vmem:[%s3775_s3 + $0x10] sm:$0xff] (!%p198_p2)  ;;  %v2900_v7 = vmov (!%p198_p2), 0.0   ;;  %v339_v17 = vlaneseq (!%p198_p2)  ;;  %vm527_vm2 = vcmask (!%p198_p2), 1046528  }
   0x6   : > { %201 = sbr.rel (%p198_p2) target bundleno = 389 (0x185), region = 40  ;;  %v1803_v2 = vld [vmem:[%s3775_s3 + $0x200] sm:$0xff] (!%p198_p2)  ;;  %v2506_v3 = vpack.c.bf16 (!%p198_p2), %v383_v1, %v382_v0  ;;  %v1804_v4 = vld [vmem:[%s3775_s3 + $0x208] sm:$0xff] (!%p198_p2)  ;;  %v385_v6 = vld [vmem:[%s3775_s3 + $0x18] sm:$0xff] (!%p198_p2)  ;;  %2142 = vmatprep.mubr.f32.mxu1 (!%p198_p2), %v2900_v7  ;;  %vm690_vm3 = vcmask (!%p198_p2), 1045504  }
   0x7   : > { %v2634_v8 = vpack.c.bf16 (!%p198_p2), %v1804_v4, %v1803_v2  ;;  %v2510_v9 = vpack.c.bf16 (!%p198_p2), %v385_v6, %v384_v5  ;;  %v1805_v10 = vld [vmem:[%s3775_s3 + $0x210] sm:$0xff] (!%p198_p2)  ;;  %v1806_v11 = vld [vmem:[%s3775_s3 + $0x218] sm:$0xff] (!%p198_p2)  ;;  %v386_v12 = vld [vmem:[%s3775_s3 + $0x20] sm:$0xff] (!%p198_p2)  ;;  %v2996_v24 = vshrl.u32 (!%p198_p2), %v339_v17, 7 }
   0x8   : > { %2507 = vmatprep.subr.bf16.mxu1 (!%p198_p2), %v2506_v3  ;;  %v2638_v13 = vpack.c.bf16 (!%p198_p2), %v1806_v11, %v1805_v10  ;;  %v387_v14 = vld [vmem:[%s3775_s3 + $0x28] sm:$0xff] (!%p198_p2)  ;;  %v1807_v15 = vld [vmem:[%s3775_s3 + $0x220] sm:$0xff] (!%p198_p2)  ;;  %v388_v20 = vld [vmem:[%s3775_s3 + $0x30] sm:$0xff] (!%p198_p2) }
   0x9   : > { %v1808_v16 = vld [vmem:[%s3775_s3 + $0x228] sm:$0xff] (!%p198_p2)  ;;  %2635 = vmatprep.subr.bf16.mxu0 (!%p198_p2), %v2634_v8  ;;  %2509 = vmatpush3.bf16.msra.mxu1 (!%p198_p2), %v2506_v3  ;;  %v2514_v18 = vpack.c.bf16 (!%p198_p2), %v387_v14, %v386_v12  ;;  %v389_v21 = vld [vmem:[%s3775_s3 + $0x38] sm:$0xff] (!%p198_p2)  ;;  %v1809_v22 = vld [vmem:[%s3775_s3 + $0x230] sm:$0xff] (!%p198_p2)  ;;  %v3023_v35 = vadd.s32 (!%p198_p2), 8, %v2996_v24  ;;  %vm342_vm0 = vcmp.ge.s32.totalorder (!%p198_p2), %v2996_v24, 1 }
   0xa   : > { %2637 = vmatpush3.bf16.msra.mxu0 (!%p198_p2), %v2634_v8  ;;  %2511 = vmatprep.subr.bf16.mxu1 (!%p198_p2), %v2510_v9  ;;  %v2642_v19 = vpack.c.bf16 (!%p198_p2), %v1808_v16, %v1807_v15  ;;  %v1810_v23 = vld [vmem:[%s3775_s3 + $0x238] sm:$0xff] (!%p198_p2)  ;;  %v2518_v25 = vpack.c.bf16 (!%p198_p2), %v389_v21, %v388_v20  ;;  %v390_v27 = vld [vmem:[%s3775_s3 + $0x40] sm:$0xff] (!%p198_p2)  ;;  %v391_v28 = vld [vmem:[%s3775_s3 + $0x48] sm:$0xff] (!%p198_p2) }
   0xb   : > { %2639 = vmatprep.subr.bf16.mxu0 (!%p198_p2), %v2638_v13  ;;  %v2646_v26 = vpack.c.bf16 (!%p198_p2), %v1810_v23, %v1809_v22  ;;  %v1811_v29 = vld [vmem:[%s3775_s3 + $0x240] sm:$0xff] (!%p198_p2)  ;;  %v1812_v30 = vld [vmem:[%s3775_s3 + $0x248] sm:$0xff] (!%p198_p2)  ;;  %v2522_v36 = vpack.c.bf16 (!%p198_p2), %v391_v28, %v390_v27  ;;  %v392_v42 = vld [vmem:[%s3775_s3 + $0x50] sm:$0xff] (!%p198_p2)  ;;  %vm349_vm1 = vcmp.le.s32.totalorder (!%p198_p2), %v3023_v35, 8 }
   0xc   : > { %v3015_v33 = vld [vmem:[%s3773_s1] ss:$0 sm:$0xff] (!%p198_p2)  ;;  %v2650_v41 = vpack.c.bf16 (!%p198_p2), %v1812_v30, %v1811_v29  ;;  %v393_v43 = vld [vmem:[%s3775_s3 + $0x58] sm:$0xff] (!%p198_p2)  ;;  %v1813_v46 = vld [vmem:[%s3775_s3 + $0x250] sm:$0xff] (!%p198_p2) }
   0xd   : > { %s3779_s19 = smov (!%p230_p3, %s1728_s19), 1  ;;  %2513 = vmatpush3.bf16.msra.mxu1 %v2510_v9  ;;  %v3020_v34 = vld [vmem:[%s3774_s2] ss:$0 sm:$0xff]  ;;  %v1814_v47 = vld [vmem:[%s3775_s3 + $0x258] sm:$0xff]  ;;  %v2526_v52 = vpack.c.bf16 %v393_v43, %v392_v42  ;;  %v395_v54 = vld [vmem:[%s3775_s3 + $0x68] sm:$0xff] }
   0xe   : > { %s2882_s21 = smul.u32 160, %s3779_s19  ;;  %2641 = vmatpush3.bf16.msra.mxu0 %v2638_v13  ;;  %2515 = vmatprep.subr.bf16.mxu1 %v2514_v18  ;;  %v394_v53 = vld [vmem:[%s3775_s3 + $0x60] sm:$0xff]  ;;  %v2654_v58 = vpack.c.bf16 %v1814_v47, %v1813_v46  ;;  %v1816_v59 = vld [vmem:[%s3775_s3 + $0x268] sm:$0xff]  ;;  %v396_v60 = vld [vmem:[%s3775_s3 + $0x70] sm:$0xff]  ;;  %s1892_s17 = sshll.u32 %s3779_s19, 6 }
   0xf   : > { %2643 = vmatprep.subr.bf16.mxu0 %v2642_v19  ;;  %v1815_v55 = vld [vmem:[%s3775_s3 + $0x260] sm:$0xff]  ;;  %v397_v61 = vld [vmem:[%s3775_s3 + $0x78] sm:$0xff]  ;;  %v1817_v63 = vld [vmem:[%s3775_s3 + $0x270] sm:$0xff]  ;;  %v2530_v10 = vpack.c.bf16 %v395_v54, %v394_v53  ;;  %s244_s24 = scalar_lea.vmem %s3777_s5, %s1892_s17 }
  0x10   : > { %s2994_s7 = scalar_lea.vmem %s3772_s0, %s2882_s21  ;;  %v1818_v0 = vld [vmem:[%s3775_s3 + $0x278] sm:$0xff]  ;;  %v1747_v4 = vld [vmem:[%s3775_s3 + $0x80] sm:$0xff]  ;;  %v1748_v5 = vld [vmem:[%s3775_s3 + $0x88] sm:$0xff]  ;;  %v2658_v11 = vpack.c.bf16 %v1816_v59, %v1815_v55  ;;  %v3095_v12 = vpack.c.bf16 %v397_v61, %v396_v60 }
  0x11   : > { %v247_v31 = vld [vmem:[%s2994_s7 + $0x10] sm:$0xff]  ;;  %v248_v32 = vld [vmem:[%s2994_s7 + $0x18] sm:$0x3]  ;;  %2517 = vmatpush3.bf16.msra.mxu1 %v2514_v18  ;;  %v249_v39 = vld [vmem:[%s2994_s7 + $0x20] sm:$0xff]  ;;  %v3104_v16 = vpack.c.bf16 %v1818_v0, %v1817_v63  ;;  %v3117_v22 = vpack.c.bf16 %v1748_v5, %v1747_v4 }
  0x12   : > { %2645 = vmatpush3.bf16.msra.mxu0 %v2642_v19  ;;  %2519 = vmatprep.subr.bf16.mxu1 %v2518_v25  ;;  %v274_v37 = vmul.f32 %v3015_v33, %v247_v31  ;;  %v275_v38 = vmul.f32 %v3015_v33, %v248_v32  ;;  %v250_v40 = vld [vmem:[%s2994_s7 + $0x28] sm:$0x3]  ;;  %v276_v44 = vmul.f32 %v3015_v33, %v249_v39  ;;  %v251_v9 = vld [vmem:[%s2994_s7 + $0x30] sm:$0xff]  ;;  %v1819_v13 = vld [vmem:[%s3775_s3 + $0x280] sm:$0xff] }
  0x13   : > { %2647 = vmatprep.subr.bf16.mxu0 %v2646_v26  ;;  %v277_v45 = vmul.f32 %v3015_v33, %v250_v40  ;;  %v1820_v14 = vld [vmem:[%s3775_s3 + $0x288] sm:$0xff]  ;;  %v252_v15 = vld [vmem:[%s2994_s7 + $0x38] sm:$0x3]  ;;  %v278_v19 = vmul.f32 %v3015_v33, %v251_v9  ;;  %v253_v20 = vld [vmem:[%s2994_s7 + $0x40] sm:$0xff] }
  0x14   : > { %v301_v48 = vadd.f32 %v3020_v34, %v274_v37  ;;  %v302_v49 = vadd.f32 %v3020_v34, %v275_v38  ;;  %v303_v50 = vadd.f32 %v3020_v34, %v276_v44  ;;  %v254_v21 = vld [vmem:[%s2994_s7 + $0x48] sm:$0x3]  ;;  %v255_v27 = vld [vmem:[%s2994_s7 + $0x50] sm:$0xff]  ;;  %v3127_v28 = vpack.c.bf16 %v1820_v14, %v1819_v13  ;;  %v256_v31 = vld [vmem:[%s2994_s7 + $0x58] sm:$0x3] }
  0x15   : > { %2521 = vmatpush3.bf16.msra.mxu1 %v2518_v25  ;;  %v304_v51 = vadd.f32 %v3020_v34, %v277_v45  ;;  %v279_v25 = vmul.f32 %v3015_v33, %v252_v15  ;;  %v305_v29 = vadd.f32 %v3020_v34, %v278_v19  ;;  %v281_v30 = vmul.f32 %v3015_v33, %v254_v21  ;;  %v257_v40 = vld [vmem:[%s2994_s7 + $0x60] sm:$0xff]  ;;  %v1749_v43 = vld [vmem:[%s3775_s3 + $0x90] sm:$0xff]  ;;  %v1750_v44 = vld [vmem:[%s3775_s3 + $0x98] sm:$0xff] }
  0x16   : > { %2649 = vmatpush3.bf16.msra.mxu0 %v2646_v26  ;;  %2523 = vmatprep.subr.bf16.mxu1 %v2522_v36  ;;  %v3058_v56 = vmax.f32 %v301_v48, 0.0  ;;  %v322_v57 = vmax.f32 %v302_v49, 0.0  ;;  %v3069_v62 = vmax.f32 %v303_v50, 0.0  ;;  %v280_v26 = vmul.f32 %v3015_v33, %v253_v20  ;;  %v1821_v48 = vld [vmem:[%s3775_s3 + $0x290] sm:$0xff]  ;;  %v1822_v53 = vld [vmem:[%s3775_s3 + $0x298] sm:$0xff]  ;;  %v1751_v54 = vld [vmem:[%s3775_s3 + $0xa0] sm:$0xff] }
  0x17   : > { %2651 = vmatprep.subr.bf16.mxu0 %v2650_v41  ;;  %v324_v3 = vmax.f32 %v304_v51, 0.0  ;;  %v282_v32 = vmul.f32 %v3015_v33, %v255_v27  ;;  %v306_v37 = vadd.f32 %v3020_v34, %v279_v25  ;;  %v283_v39 = vmul.f32 %v3015_v33, %v256_v31  ;;  %v1752_v55 = vld [vmem:[%s3775_s3 + $0xa8] sm:$0xff]  ;;  %v259_v4 = vld [vmem:[%s2994_s7 + $0x70] sm:$0xff]  ;;  %v261_v19 = vld [vmem:[%s2994_s7 + $0x80] sm:$0xff] }
  0x18   : > { %v3080_v1 = vsel %vm342_vm0, %v3058_v56, 0.0  ;;  %v3084_v2 = vsel %vm349_vm1, %v322_v57, 0.0  ;;  %v3112_v18 = vsel %vm342_vm0, %v3069_v62, 0.0  ;;  %v307_v38 = vadd.f32 %v3020_v34, %v280_v26  ;;  %v262_v27 = vld [vmem:[%s2994_s7 + $0x88] sm:$0x3] }
  0x19   : > { %2525 = vmatpush3.bf16.msra.mxu1 %v2522_v36  ;;  %v531_v6 = vrot.slane %v3080_v1, 1  ;;  %v532_v8 = vrot.slane %v3084_v2, 1  ;;  %v3122_v23 = vsel %vm349_vm1, %v324_v3, 0.0  ;;  %v534_v36 = vrot.slane %v3112_v18, 1 }
  0x1a   : > { %2653 = vmatpush3.bf16.msra.mxu0 %v2650_v41  ;;  %2527 = vmatprep.subr.bf16.mxu1 %v2526_v52  ;;  %v258_v41 = vld [vmem:[%s2994_s7 + $0x68] sm:$0x3]  ;;  %v535_v42 = vrot.slane %v3122_v23, 1  ;;  %v3146_v45 = vmax.f32 %v305_v29, 0.0  ;;  %v308_v46 = vadd.f32 %v3020_v34, %v281_v30  ;;  %v309_v47 = vadd.f32 %v3020_v34, %v282_v32 }
  0x1b   : > { %2655 = vmatprep.subr.bf16.mxu0 %v2654_v58  ;;  %v3107_v17 = vsel %vm527_vm2, %v531_v6, %v532_v8  ;;  %v326_v49 = vmax.f32 %v306_v37, 0.0  ;;  %v3153_v50 = vmax.f32 %v307_v38, 0.0  ;;  %v310_v51 = vadd.f32 %v3020_v34, %v283_v39  ;;  %v1823_v38 = vld [vmem:[%s3775_s3 + $0x2a0] sm:$0xff]  ;;  %v1824_v39 = vld [vmem:[%s3775_s3 + $0x2a8] sm:$0xff] }
  0x1c   : > { %2318 = vmatprep.mubr.f32.mxu0 %v3107_v17  ;;  %v3169_v57 = vsel %vm342_vm0, %v3146_v45, 0.0  ;;  %v3171_v59 = vmax.f32 %v309_v47, 0.0  ;;  %v285_v60 = vmul.f32 %v3015_v33, %v258_v41  ;;  %v3175_v61 = vpack.c.bf16 %v1750_v44, %v1749_v43 }
  0x1d   : > { %2529 = vmatpush3.bf16.msra.mxu1 %v2526_v52  ;;  %v284_v52 = vmul.f32 %v3015_v33, %v257_v40  ;;  %v3179_v63 = vsel %vm349_vm1, %v326_v49, 0.0  ;;  %v3184_v0 = vsel %vm342_vm0, %v3153_v50, 0.0  ;;  %v330_v3 = vmax.f32 %v310_v51, 0.0 }
  0x1e   : > { %2657 = vmatpush3.bf16.msra.mxu0 %v2654_v58  ;;  %2531 = vmatprep.subr.bf16.mxu1 %v2530_v10  ;;  %v328_v58 = vmax.f32 %v308_v46, 0.0  ;;  %v537_v5 = vrot.slane %v3169_v57, 1  ;;  %v538_v6 = vrot.slane %v3179_v63, 1  ;;  %v3197_v9 = vsel %vm342_vm0, %v3171_v59, 0.0 }
  0x1f   : > { %2659 = vmatprep.subr.bf16.mxu0 %v2658_v11  ;;  %v3200_v13 = vpack.c.bf16 %v1752_v55, %v1751_v54  ;;  %v3204_v14 = vsel %vm349_vm1, %v330_v3, 0.0  ;;  %v311_v15 = vadd.f32 %v3020_v34, %v284_v52  ;;  %v3210_v20 = vsel %vm527_vm2, %v534_v36, %v535_v42  ;;  %v1754_v54 = vld [vmem:[%s3775_s3 + $0xb8] sm:$0xff] }
  0x20   : > { %v3192_v8 = vsel %vm349_vm1, %v328_v58, 0.0  ;;  %v540_v21 = vrot.slane %v3184_v0, 1  ;;  %v312_v26 = vadd.f32 %v3020_v34, %v285_v60  ;;  %v543_v29 = vrot.slane %v3197_v9, 1  ;;  %v1826_v55 = vld [vmem:[%s3775_s3 + $0x2b8] sm:$0xff] }
  0x21   : > { %2533 = vmatpush3.bf16.msra.mxu1 %v2530_v10  ;;  %v260_v10 = vld [vmem:[%s2994_s7 + $0x78] sm:$0x3]  ;;  %v541_v25 = vrot.slane %v3192_v8, 1  ;;  %v3219_v30 = vmax.f32 %v311_v15, 0.0  ;;  %v3225_v32 = vsel %vm527_vm2, %v537_v5, %v538_v6  ;;  %v544_v36 = vrot.slane %v3204_v14, 1  ;;  %s239_s7 = scalar_lea.vmem %s3776_s4, %s1892_s17 }
  0x22   : > { %2661 = vmatpush3.bf16.msra.mxu0 %v2658_v11  ;;  %2535 = vmatprep.subr.bf16.mxu1 %v3095_v12  ;;  %v2670_v11 = vpack.c.bf16 %v1822_v53, %v1821_v48  ;;  %v287_v31 = vmul.f32 %v3015_v33, %v260_v10  ;;  %v332_v37 = vmax.f32 %v312_v26, 0.0  ;;  %v289_v43 = vmul.f32 %v3015_v33, %v262_v27  ;;  %v1753_v53 = vld [vmem:[%s3775_s3 + $0xb0] sm:$0xff]  ;;  %v1755_v26 = vld [vmem:[%s3775_s3 + $0xc0] sm:$0xff] }
  0x23   : > { %2663 = vmatprep.subr.bf16.mxu0 %v3104_v16  ;;  %v3241_v40 = vsel %vm342_vm0, %v3219_v30, 0.0  ;;  %v3249_v44 = vsel %vm527_vm2, %v540_v21, %v541_v25  ;;  %v2674_v52 = vpack.c.bf16 %v1824_v39, %v1823_v38  ;;  %v2550_v15 = vpack.c.bf16 %v1754_v54, %v1753_v53  ;;  %v1827_v27 = vld [vmem:[%s3775_s3 + $0x2c0] sm:$0xff]  ;;  %v1758_v39 = vld [vmem:[%s3775_s3 + $0xd8] sm:$0xff]  ;;  %v1761_v54 = vld [vmem:[%s3775_s3 + $0xf0] sm:$0xff] }
  0x24   : > { %v314_v42 = vadd.f32 %v3020_v34, %v287_v31  ;;  %v3253_v46 = vsel %vm349_vm1, %v332_v37, 0.0  ;;  %v546_v47 = vrot.slane %v3241_v40, 1  ;;  %v316_v51 = vadd.f32 %v3020_v34, %v289_v43 }
  0x25   : > { %2537 = vmatpush3.bf16.msra.mxu1 %v3095_v12  ;;  %v286_v12 = vmul.f32 %v3015_v33, %v259_v4  ;;  %v3296_v4 = vsel %vm527_vm2, %v543_v29, %v544_v36  ;;  %v1828_v29 = vld [vmem:[%s3775_s3 + $0x2c8] sm:$0xff]  ;;  %v694_v31 = vrot.slane %v3080_v1, 2  ;;  %v695_v36 = vrot.slane %v3084_v2, 2  ;;  %v1829_v2 = vld [vmem:[%s3775_s3 + $0x2d0] sm:$0xff] }
  0x26   : > { %2665 = vmatpush3.bf16.msra.mxu0 %v3104_v16  ;;  %2539 = vmatprep.subr.bf16.mxu1 %v3117_v22  ;;  %v288_v16 = vmul.f32 %v3015_v33, %v261_v19  ;;  %v547_v33 = vrot.slane %v3253_v46, 1  ;;  %v334_v49 = vmax.f32 %v314_v42, 0.0  ;;  %v336_v3 = vmax.f32 %v316_v51, 0.0  ;;  %v1832_v51 = vld [vmem:[%s3775_s3 + $0x2e8] sm:$0xff] }
  0x27   : > { %2667 = vmatprep.subr.bf16.mxu0 %v3127_v28  ;;  %v313_v41 = vadd.f32 %v3020_v34, %v286_v12  ;;  %v2682_v38 = vpack.c.bf16 %v1828_v29, %v1827_v27  ;;  %v3354_v1 = vrot.slane %v2900_v7, 1  ;;  %v3368_v42 = vsel %vm690_vm3, %v694_v31, %v695_v36  ;;  %v1765_v31 = vld [vmem:[%s3775_s3 + $0x110] sm:$0xff]  ;;  %v1766_v36 = vld [vmem:[%s3775_s3 + $0x118] sm:$0xff] }
  0x28   : > { %2143 = vmatmul.mubr.msk.f32.vlgmr.msra.gmra.mrb[0].mxu1 %vm342_vm0, %v3058_v56  ;;  %v315_v48 = vadd.f32 %v3020_v34, %v288_v16  ;;  %v1825_v34 = vld [vmem:[%s3775_s3 + $0x2b0] sm:$0xff]  ;;  %v3291_v60 = vsel %vm349_vm1, %v334_v49, 0.0  ;;  %v3311_v19 = vsel %vm349_vm1, %v336_v3, 0.0  ;;  %v1831_v49 = vld [vmem:[%s3775_s3 + $0x2e0] sm:$0xff]  ;;  %v1834_v3 = vld [vmem:[%s3775_s3 + $0x2f8] sm:$0xff] }
  0x29   : > { %2541 = vmatpush3.bf16.msra.mxu1 %v3117_v22  ;;  %2319 = vmatmul.mubr.f32.vlgmr.msra.gmra.mrb[0].mxu0 %v3210_v20  ;;  %v3260_v22 = vmax.f32 %v313_v41, 0.0  ;;  %v550_v6 = vrot.slane %v3291_v60, 1  ;;  %v2678_v25 = vpack.c.bf16 %v1826_v55, %v1825_v34  ;;  %v986_v35 = vrot.slane %v3311_v19, 1  ;;  %v1830_v41 = vld [vmem:[%s3775_s3 + $0x2d8] sm:$0xff]  ;;  %v1833_v55 = vld [vmem:[%s3775_s3 + $0x2f0] sm:$0xff] }
  0x2a   : > { %2669 = vmatpush3.bf16.msra.mxu0 %v3127_v28  ;;  %2543 = vmatprep.subr.bf16.mxu1 %v3175_v61  ;;  %v3272_v28 = vmax.f32 %v315_v48, 0.0  ;;  %v1759_v48 = vld [vmem:[%s3775_s3 + $0xe0] sm:$0xff]  ;;  %v2690_v53 = vpack.c.bf16 %v1832_v51, %v1831_v49  ;;  %v1762_v34 = vld [vmem:[%s3775_s3 + $0xf8] sm:$0xff]  ;;  %v709_v51 = vrot.slane %v3241_v40, 2 }
  0x2b   : > { %2671 = vmatprep.subr.bf16.mxu0 %v2670_v11  ;;  %2145 = vmatprep.mubr.msk.f32.mxu1 %vm342_vm0, %v3069_v62  ;;  %v3287_v58 = vsel %vm342_vm0, %v3260_v22, 0.0  ;;  %v1842_v40 = vld [vmem:[%s3775_s3 + $0x338] sm:$0xff] }
  0x2c   : > { %2321 = vmatprep.mubr.f32.mxu0 %v3225_v32  ;;  %2146 = vmatmul.mubr.msk.f32.gmra.mrb[2].mxu1 %vm342_vm0, %v3146_v45  ;;  %v549_v5 = vrot.slane %v3287_v58, 1  ;;  %v3303_v10 = vsel %vm342_vm0, %v3272_v28, 0.0 }
  0x2d   : > { %2545 = vmatpush3.bf16.msra.mxu1 %v3175_v61  ;;  %2322 = vmatmul.mubr.f32.gmra.mrb[2].mxu0 %v3249_v44  ;;  %v3307_v61 = vsel %vm527_vm2, %v546_v47, %v547_v33  ;;  %v985_v21 = vrot.slane %v3303_v10, 1  ;;  %v2686_v47 = vpack.c.bf16 %v1830_v41, %v1829_v2  ;;  %v1760_v33 = vld [vmem:[%s3775_s3 + $0xe8] sm:$0xff]  ;;  %v703_v2 = vrot.slane %v3184_v0, 2 }
  0x2e   : > { %2673 = vmatpush3.bf16.msra.mxu0 %v2670_v11  ;;  %2547 = vmatprep.subr.bf16.mxu1 %v3200_v13  ;;  %v1756_v11 = vld [vmem:[%s3775_s3 + $0xc8] sm:$0xff]  ;;  %v3337_v12 = vsel %vm527_vm2, %v549_v5, %v550_v6  ;;  %v2566_v5 = vpack.c.bf16 %v1762_v34, %v1761_v54  ;;  %v2694_v6 = vpack.c.bf16 %v1834_v3, %v1833_v55  ;;  %v704_v41 = vrot.slane %v3192_v8, 2  ;;  %v1769_v54 = vld [vmem:[%s3775_s3 + $0x130] sm:$0xff] }
  0x2f   : > { %2675 = vmatprep.subr.bf16.mxu0 %v2674_v52  ;;  %2148 = vmatprep.mubr.msk.f32.mxu1 %vm342_vm0, %v3153_v50  ;;  %v2554_v37 = vpack.c.bf16 %v1756_v11, %v1755_v26  ;;  %v3342_v16 = vsel %vm527_vm2, %v985_v21, %v986_v35  ;;  %v1764_v21 = vld [vmem:[%s3775_s3 + $0x108] sm:$0xff]  ;;  %v697_v11 = vrot.slane %v3112_v18, 2  ;;  %v698_v35 = vrot.slane %v3122_v23, 2  ;;  %v1838_v18 = vld [vmem:[%s3775_s3 + $0x318] sm:$0xff] }
  0x30   : > { %2324 = vmatprep.mubr.f32.mxu0 %v3296_v4  ;;  %2149 = vmatmul.mubr.msk.f32.gmra.mrb[4].mxu1 %vm342_vm0, %v3171_v59  ;;  %v1836_v26 = vld [vmem:[%s3775_s3 + $0x308] sm:$0xff]  ;;  %v700_v23 = vrot.slane %v3169_v57, 2  ;;  %v3449_v49 = vsel %vm690_vm3, %v703_v2, %v704_v41  ;;  %v712_v34 = vrot.slane %v3287_v58, 2  ;;  %v713_v55 = vrot.slane %v3291_v60, 2  ;;  %v1843_v60 = vld [vmem:[%s3775_s3 + $0x340] sm:$0xff] }
  0x31   : > { %2549 = vmatpush3.bf16.msra.mxu1 %v3200_v13  ;;  %2325 = vmatmul.mubr.f32.gmra.mrb[4].mxu0 %v3307_v61  ;;  %v1757_v13 = vld [vmem:[%s3775_s3 + $0xd0] sm:$0xff]  ;;  %v1768_v57 = vld [vmem:[%s3775_s3 + $0x128] sm:$0xff]  ;;  %v1847_v2 = vld [vmem:[%s3775_s3 + $0x360] sm:$0xff] }
  0x32   : > { %2677 = vmatpush3.bf16.msra.mxu0 %v2674_v52  ;;  %2551 = vmatprep.subr.bf16.mxu1 %v2550_v15  ;;  %v2558_v43 = vpack.c.bf16 %v1758_v39, %v1757_v13  ;;  %v2562_v52 = vpack.c.bf16 %v1760_v33, %v1759_v48  ;;  %v3425_v13 = vsel %vm690_vm3, %v697_v11, %v698_v35  ;;  %v1840_v0 = vld [vmem:[%s3775_s3 + $0x328] sm:$0xff]  ;;  %v706_v48 = vrot.slane %v3197_v9, 2  ;;  %v1770_v9 = vld [vmem:[%s3775_s3 + $0x138] sm:$0xff] }
  0x33   : > { %2679 = vmatprep.subr.bf16.mxu0 %v2678_v25  ;;  %2151 = vmatprep.mubr.msk.f32.mxu1 %vm342_vm0, %v3219_v30  ;;  %v2574_v39 = vpack.c.bf16 %v1766_v36, %v1765_v31  ;;  %v707_v33 = vrot.slane %v3204_v14, 2  ;;  %v1841_v14 = vld [vmem:[%s3775_s3 + $0x330] sm:$0xff]  ;;  %v2582_v3 = vpack.c.bf16 %v1770_v9, %v1769_v54  ;;  %v1772_v58 = vld [vmem:[%s3775_s3 + $0x148] sm:$0xff]  ;;  %v3509_v31 = vrot.slane %v2900_v7, 2 }
  0x34   : > { %2327 = vmatprep.mubr.f32.mxu0 %v3337_v12  ;;  %2152 = vmatmul.mubr.msk.f32.gmra.mrb[6].mxu1 %vm342_vm0, %v3260_v22  ;;  %v1845_v36 = vld [vmem:[%s3775_s3 + $0x350] sm:$0xff]  ;;  %v1848_v41 = vld [vmem:[%s3775_s3 + $0x368] sm:$0xff] }
  0x35   : > { %2553 = vmatpush3.bf16.msra.mxu1 %v2550_v15  ;;  %2328 = vmatmul.mubr.f32.gmra.mrb[6].mxu0 %v3342_v16  ;;  %v1763_v15 = vld [vmem:[%s3775_s3 + $0x100] sm:$0xff]  ;;  %v1859_v54 = vld [vmem:[%s3775_s3 + $0x388] sm:$0xff] }
  0x36   : > { %2681 = vmatpush3.bf16.msra.mxu0 %v2678_v25  ;;  %2555 = vmatprep.subr.bf16.mxu1 %v2554_v37  ;;  %v1835_v25 = vld [vmem:[%s3775_s3 + $0x300] sm:$0xff]  ;;  %v2570_v27 = vpack.c.bf16 %v1764_v21, %v1763_v15  ;;  %v1120_v15 = vrot.slane %v3311_v19, 2  ;;  %v2710_v21 = vpack.c.bf16 %v1842_v40, %v1841_v14  ;;  %v3496_v19 = vsel %vm690_vm3, %v712_v34, %v713_v55  ;;  %v1781_v40 = vld [vmem:[%s3775_s3 + $0x190] sm:$0xff]  ;;  %v1782_v34 = vld [vmem:[%s3775_s3 + $0x198] sm:$0xff] }
  0x37   : > { %2683 = vmatprep.subr.bf16.mxu0 %v2682_v38  ;;  %2186 = vmatprep.mubr.f32.mxu1 %v3354_v1  ;;  %v2698_v29 = vpack.c.bf16 %v1836_v26, %v1835_v25  ;;  %v1771_v25 = vld [vmem:[%s3775_s3 + $0x140] sm:$0xff]  ;;  %v1860_v55 = vld [vmem:[%s3775_s3 + $0x390] sm:$0xff] }
  0x38   : > { %2362 = vmatprep.mubr.f32.mxu0 %v3368_v42  ;;  %v2586_v26 = vpack.c.bf16 %v1772_v58, %v1771_v25  ;;  %v1784_v25 = vld [vmem:[%s3775_s3 + $0x1a8] sm:$0xff]  ;;  %v1862_v58 = vld [vmem:[%s3775_s3 + $0x3a0] sm:$0xff] }
  0x39   : > { %2557 = vmatpush3.bf16.msra.mxu1 %v2554_v37  ;;  %v1837_v37 = vld [vmem:[%s3775_s3 + $0x310] sm:$0xff] }
  0x3a   : > { %2685 = vmatpush3.bf16.msra.mxu0 %v2682_v38  ;;  %2559 = vmatprep.subr.bf16.mxu1 %v2558_v43  ;;  %v701_v38 = vrot.slane %v3179_v63, 2  ;;  %v1839_v63 = vld [vmem:[%s3775_s3 + $0x320] sm:$0xff] }
  0x3b   : > { %2687 = vmatprep.subr.bf16.mxu0 %v2686_v47 }
  0x3c   : > { %v3444_v8 = vsel %vm690_vm3, %v700_v23, %v701_v38  ;;  %v1775_v38 = vld [vmem:[%s3775_s3 + $0x160] sm:$0xff] }
  0x3d   : > { %2561 = vmatpush3.bf16.msra.mxu1 %v2558_v43  ;;  %v2702_v43 = vpack.c.bf16 %v1838_v18, %v1837_v37  ;;  %v1846_v37 = vld [vmem:[%s3775_s3 + $0x358] sm:$0xff] }
  0x3e   : > { %2689 = vmatpush3.bf16.msra.mxu0 %v2686_v47  ;;  %2563 = vmatprep.subr.bf16.mxu1 %v2562_v52  ;;  %v1767_v47 = vld [vmem:[%s3775_s3 + $0x120] sm:$0xff]  ;;  %v2718_v23 = vpack.c.bf16 %v1846_v37, %v1845_v36 }
  0x3f   : > { %2691 = vmatprep.subr.bf16.mxu0 %v2690_v53 }
  0x41   : > { %2565 = vmatpush3.bf16.msra.mxu1 %v2562_v52  ;;  %v710_v52 = vrot.slane %v3253_v46, 2  ;;  %v3470_v46 = vsel %vm690_vm3, %v706_v48, %v707_v33  ;;  %v1850_v48 = vld [vmem:[%s3775_s3 + $0x378] sm:$0xff] }
  0x42   : > { %2693 = vmatpush3.bf16.msra.mxu0 %v2690_v53  ;;  %2567 = vmatprep.subr.bf16.mxu1 %v2566_v5  ;;  %v2706_v53 = vpack.c.bf16 %v1840_v0, %v1839_v63  ;;  %v1778_v63 = vld [vmem:[%s3775_s3 + $0x178] sm:$0xff]  ;;  %v1849_v0 = vld [vmem:[%s3775_s3 + $0x370] sm:$0xff] }
  0x43   : > { %2695 = vmatprep.subr.bf16.mxu0 %v2694_v6 }
  0x45   : > { %2569 = vmatpush3.bf16.msra.mxu1 %v2566_v5  ;;  %v3475_v5 = vsel %vm690_vm3, %v709_v51, %v710_v52  ;;  %v1779_v51 = vld [vmem:[%s3775_s3 + $0x180] sm:$0xff]  ;;  %v1780_v52 = vld [vmem:[%s3775_s3 + $0x188] sm:$0xff] }
  0x46   : > { %2697 = vmatpush3.bf16.msra.mxu0 %v2694_v6  ;;  %2571 = vmatprep.subr.bf16.mxu1 %v2570_v27  ;;  %v1119_v6 = vrot.slane %v3303_v10, 2  ;;  %v1844_v10 = vld [vmem:[%s3775_s3 + $0x348] sm:$0xff]  ;;  %v2602_v9 = vpack.c.bf16 %v1780_v52, %v1779_v51 }
  0x47   : > { %2699 = vmatprep.subr.bf16.mxu0 %v2698_v29  ;;  %v2714_v35 = vpack.c.bf16 %v1844_v10, %v1843_v60  ;;  %v1863_v60 = vld [vmem:[%s3775_s3 + $0x3a8] sm:$0xff] }
  0x48   : > { %2187 = vmatmul.mubr.f32.vlgmr.msra.gmra.mrb[0].mxu1 %v3107_v17  ;;  %v2578_v17 = vpack.c.bf16 %v1768_v57, %v1767_v47  ;;  %v3499_v11 = vsel %vm690_vm3, %v1119_v6, %v1120_v15  ;;  %v2722_v47 = vpack.c.bf16 %v1848_v41, %v1847_v2  ;;  %v1777_v57 = vld [vmem:[%s3775_s3 + $0x170] sm:$0xff]  ;;  %v2606_v6 = vpack.c.bf16 %v1782_v34, %v1781_v40  ;;  %v1871_v51 = vld [vmem:[%s3775_s3 + $0x3e8] sm:$0xff]  ;;  %v1874_v34 = vld [vmem:[%s3775_s3 + $0x400] sm:$0xff] }
  0x49   : > { %2573 = vmatpush3.bf16.msra.mxu1 %v2570_v27  ;;  %2363 = vmatmul.mubr.f32.vlgmr.msra.gmra.mrb[0].mxu0 %v3425_v13  ;;  %v1773_v27 = vld [vmem:[%s3775_s3 + $0x150] sm:$0xff]  ;;  %v2598_v33 = vpack.c.bf16 %v1778_v63, %v1777_v57  ;;  %v1869_v63 = vld [vmem:[%s3775_s3 + $0x3d8] sm:$0xff] }
  0x4a   : > { %2701 = vmatpush3.bf16.msra.mxu0 %v2698_v29  ;;  %2575 = vmatprep.subr.bf16.mxu1 %v2574_v39  ;;  %v1774_v29 = vld [vmem:[%s3775_s3 + $0x158] sm:$0xff]  ;;  %v1868_v57 = vld [vmem:[%s3775_s3 + $0x3d0] sm:$0xff] }
  0x4b   : > { %2703 = vmatprep.subr.bf16.mxu0 %v2702_v43  ;;  %2189 = vmatprep.mubr.f32.mxu1 %v3210_v20  ;;  %v2590_v18 = vpack.c.bf16 %v1774_v29, %v1773_v27  ;;  %v1864_v27 = vld [vmem:[%s3775_s3 + $0x3b0] sm:$0xff]  ;;  %v1865_v29 = vld [vmem:[%s3775_s3 + $0x3b8] sm:$0xff] }
  0x4c   : > { %2365 = vmatprep.mubr.f32.mxu0 %v3444_v8  ;;  %2190 = vmatmul.mubr.f32.gmra.mrb[2].mxu1 %v3225_v32  ;;  %v2742_v37 = vpack.c.bf16 %v1865_v29, %v1864_v27  ;;  %v379_v29 = vld [vmem:[%s239_s7 + $0x28] sm:$0xff] }
  0x4d   : > { %2577 = vmatpush3.bf16.msra.mxu1 %v2574_v39  ;;  %2366 = vmatmul.mubr.f32.gmra.mrb[2].mxu0 %v3449_v49  ;;  %v1776_v39 = vld [vmem:[%s3775_s3 + $0x168] sm:$0xff] }
  0x4e   : > { %2705 = vmatpush3.bf16.msra.mxu0 %v2702_v43  ;;  %2579 = vmatprep.subr.bf16.mxu1 %v2578_v17  ;;  %v2594_v43 = vpack.c.bf16 %v1776_v39, %v1775_v38  ;;  %v1866_v38 = vld [vmem:[%s3775_s3 + $0x3c0] sm:$0xff]  ;;  %v1867_v39 = vld [vmem:[%s3775_s3 + $0x3c8] sm:$0xff] }
  0x4f   : > { %2707 = vmatprep.subr.bf16.mxu0 %v2706_v53  ;;  %2192 = vmatprep.mubr.f32.mxu1 %v3249_v44  ;;  %v2746_v41 = vpack.c.bf16 %v1867_v39, %v1866_v38 }
  0x50   : > { %2368 = vmatprep.mubr.f32.mxu0 %v3470_v46  ;;  %2193 = vmatmul.mubr.f32.gmra.mrb[4].mxu1 %v3296_v4 }
  0x51   : > { %2581 = vmatpush3.bf16.msra.mxu1 %v2578_v17  ;;  %2369 = vmatmul.mubr.f32.gmra.mrb[4].mxu0 %v3475_v5  ;;  %v2726_v17 = vpack.c.bf16 %v1850_v48, %v1849_v0  ;;  %v2750_v48 = vpack.c.bf16 %v1869_v63, %v1868_v57 }
  0x52   : > { %2709 = vmatpush3.bf16.msra.mxu0 %v2706_v53  ;;  %2583 = vmatprep.subr.bf16.mxu1 %v2582_v3  ;;  %v1858_v53 = vld [vmem:[%s3775_s3 + $0x380] sm:$0xff] }
  0x53   : > { %2711 = vmatprep.subr.bf16.mxu0 %v2710_v21  ;;  %2195 = vmatprep.mubr.f32.mxu1 %v3307_v61  ;;  %v2730_v14 = vpack.c.bf16 %v1859_v54, %v1858_v53  ;;  %v1794_v54 = vld [vmem:[%s3775_s3 + $0x1f8] sm:$0xff] }
  0x54   : > { %2371 = vmatprep.mubr.f32.mxu0 %v3496_v19  ;;  %2196 = vmatmul.mubr.f32.gmra.mrb[6].mxu1 %v3337_v12 }
  0x55   : > { %2585 = vmatpush3.bf16.msra.mxu1 %v2582_v3  ;;  %2372 = vmatmul.mubr.f32.gmra.mrb[6].mxu0 %v3499_v11  ;;  %v1861_v3 = vld [vmem:[%s3775_s3 + $0x398] sm:$0xff] }
  0x56   : > { %2713 = vmatpush3.bf16.msra.mxu0 %v2710_v21  ;;  %2587 = vmatprep.subr.bf16.mxu1 %v2586_v26  ;;  %v2734_v15 = vpack.c.bf16 %v1861_v3, %v1860_v55  ;;  %v1783_v21 = vld [vmem:[%s3775_s3 + $0x1a0] sm:$0xff]  ;;  %v1875_v55 = vld [vmem:[%s3775_s3 + $0x408] sm:$0xff] }
  0x57   : > { %2715 = vmatprep.subr.bf16.mxu0 %v2714_v35  ;;  %2230 = vmatprep.mubr.f32.mxu1 %v3509_v31  ;;  %v2610_v10 = vpack.c.bf16 %v1784_v25, %v1783_v21  ;;  %v2762_v3 = vpack.c.bf16 %v1875_v55, %v1874_v34  ;;  %v1878_v25 = vld [vmem:[%s3775_s3 + $0x420] sm:$0xff] }
  0x58   : > { %2406 = vmatprep.mubr.msk.f32.mxu0 %vm342_vm0, %v3069_v62 }
  0x59   : > { %2589 = vmatpush3.bf16.msra.mxu1 %v2586_v26  ;;  %v2738_v26 = vpack.c.bf16 %v1863_v60, %v1862_v58  ;;  %v1879_v58 = vld [vmem:[%s3775_s3 + $0x428] sm:$0xff]  ;;  %v1880_v60 = vld [vmem:[%s3775_s3 + $0x430] sm:$0xff] }
  0x5a   : > { %2717 = vmatpush3.bf16.msra.mxu0 %v2714_v35  ;;  %2591 = vmatprep.subr.bf16.mxu1 %v2590_v18  ;;  %v1786_v35 = vld [vmem:[%s3775_s3 + $0x1b8] sm:$0xff] }
  0x5b   : > { %2719 = vmatprep.subr.bf16.mxu0 %v2718_v23 }
  0x5d   : > { %2593 = vmatpush3.bf16.msra.mxu1 %v2590_v18  ;;  %v1787_v18 = vld [vmem:[%s3775_s3 + $0x1c0] sm:$0xff] }
  0x5e   : > { %2721 = vmatpush3.bf16.msra.mxu0 %v2718_v23  ;;  %2595 = vmatprep.subr.bf16.mxu1 %v2594_v43  ;;  %v1788_v23 = vld [vmem:[%s3775_s3 + $0x1c8] sm:$0xff] }
  0x5f   : > { %2723 = vmatprep.subr.bf16.mxu0 %v2722_v47  ;;  %v2618_v2 = vpack.c.bf16 %v1788_v23, %v1787_v18 }
  0x61   : > { %2597 = vmatpush3.bf16.msra.mxu1 %v2594_v43  ;;  %v1789_v43 = vld [vmem:[%s3775_s3 + $0x1d0] sm:$0xff] }
  0x62   : > { %2725 = vmatpush3.bf16.msra.mxu0 %v2722_v47  ;;  %2599 = vmatprep.subr.bf16.mxu1 %v2598_v33  ;;  %v1790_v47 = vld [vmem:[%s3775_s3 + $0x1d8] sm:$0xff] }
  0x63   : > { %2727 = vmatprep.subr.bf16.mxu0 %v2726_v17  ;;  %v2622_v0 = vpack.c.bf16 %v1790_v47, %v1789_v43  ;;  %v380_v43 = vld [vmem:[%s239_s7 + $0x30] sm:$0xff] }
  0x65   : > { %2601 = vmatpush3.bf16.msra.mxu1 %v2598_v33  ;;  %v1791_v33 = vld [vmem:[%s3775_s3 + $0x1e0] sm:$0xff] }
  0x66   : > { %2729 = vmatpush3.bf16.msra.mxu0 %v2726_v17  ;;  %2603 = vmatprep.subr.bf16.mxu1 %v2602_v9  ;;  %v1792_v17 = vld [vmem:[%s3775_s3 + $0x1e8] sm:$0xff] }
  0x67   : > { %2731 = vmatprep.subr.bf16.mxu0 %v2730_v14  ;;  %v2626_v52 = vpack.c.bf16 %v1792_v17, %v1791_v33 }
  0x68   : > { %2231 = vmatmul.mubr.f32.vlgmr.msra.gmra.mrb[0].mxu1 %v3368_v42  ;;  %v1785_v42 = vld [vmem:[%s3775_s3 + $0x1b0] sm:$0xff] }
  0x69   : > { %2605 = vmatpush3.bf16.msra.mxu1 %v2602_v9  ;;  %2407 = vmatmul.mubr.msk.f32.vlgmr.msra.gmra.mrb[0].mxu0 %vm342_vm0, %v3146_v45  ;;  %v2614_v36 = vpack.c.bf16 %v1786_v35, %v1785_v42  ;;  %v1872_v9 = vld [vmem:[%s3775_s3 + $0x3f0] sm:$0xff]  ;;  %v377_v42 = vld [vmem:[%s239_s7 + $0x18] sm:$0xff] }
  0x6a   : > { %2733 = vmatpush3.bf16.msra.mxu0 %v2730_v14  ;;  %2607 = vmatprep.subr.bf16.mxu1 %v2606_v6 }
  0x6b   : > { %2735 = vmatprep.subr.bf16.mxu0 %v2734_v15  ;;  %2233 = vmatprep.mubr.f32.mxu1 %v3425_v13 }
  0x6c   : > { %2409 = vmatprep.mubr.msk.f32.mxu0 %vm342_vm0, %v3153_v50  ;;  %2234 = vmatmul.mubr.f32.gmra.mrb[2].mxu1 %v3444_v8 }
  0x6d   : > { %2609 = vmatpush3.bf16.msra.mxu1 %v2606_v6  ;;  %2410 = vmatmul.mubr.msk.f32.gmra.mrb[2].mxu0 %vm342_vm0, %v3171_v59  ;;  %v1876_v6 = vld [vmem:[%s3775_s3 + $0x410] sm:$0xff] }
  0x6e   : > { %2737 = vmatpush3.bf16.msra.mxu0 %v2734_v15  ;;  %2611 = vmatprep.subr.bf16.mxu1 %v2610_v10  ;;  %v1877_v15 = vld [vmem:[%s3775_s3 + $0x418] sm:$0xff] }
  0x6f   : > { %2739 = vmatprep.subr.bf16.mxu0 %v2738_v26  ;;  %2236 = vmatprep.mubr.f32.mxu1 %v3449_v49  ;;  %v2766_v21 = vpack.c.bf16 %v1877_v15, %v1876_v6 }
  0x70   : > { %2412 = vmatprep.mubr.msk.f32.mxu0 %vm342_vm0, %v3219_v30  ;;  %2237 = vmatmul.mubr.f32.gmra.mrb[4].mxu1 %v3470_v46 }
  0x71   : > { %2613 = vmatpush3.bf16.msra.mxu1 %v2610_v10  ;;  %2413 = vmatmul.mubr.msk.f32.gmra.mrb[4].mxu0 %vm342_vm0, %v3260_v22 }
  0x72   : > { %2741 = vmatpush3.bf16.msra.mxu0 %v2738_v26  ;;  %2615 = vmatprep.subr.bf16.mxu1 %v2614_v36 }
  0x73   : > { %2743 = vmatprep.subr.bf16.mxu0 %v2742_v37  ;;  %2239 = vmatprep.mubr.f32.mxu1 %v3475_v5 }
  0x74   : > { %2415 = vmatprep.mubr.msk.f32.mxu0 %vm342_vm0, %v3272_v28  ;;  %2240 = vmatmul.mubr.f32.gmra.mrb[6].mxu1 %v3496_v19 }
  0x75   : > { %2617 = vmatpush3.bf16.msra.mxu1 %v2614_v36  ;;  %2416 = vmatmul.mubr.f32.gmra.mrb[6].mxu0 %v2900_v7  ;;  %v1870_v7 = vld [vmem:[%s3775_s3 + $0x3e0] sm:$0xff] }
  0x76   : > { %2745 = vmatpush3.bf16.msra.mxu0 %v2742_v37  ;;  %2619 = vmatprep.subr.bf16.mxu1 %v2618_v2  ;;  %v2754_v53 = vpack.c.bf16 %v1871_v51, %v1870_v7 }
  0x77   : > { %2747 = vmatprep.subr.bf16.mxu0 %v2746_v41  ;;  %2274 = vmatprep.mubr.msk.f32.mxu1 %vm342_vm0, %v3058_v56  ;;  %v1793_v56 = vld [vmem:[%s3775_s3 + $0x1f0] sm:$0xff] }
  0x78   : > { %2450 = vmatprep.mubr.f32.mxu0 %v3210_v20  ;;  %v1873_v20 = vld [vmem:[%s3775_s3 + $0x3f8] sm:$0xff]  ;;  %v2630_v14 = vpack.c.bf16 %v1794_v54, %v1793_v56 }
  0x79   : > { %2621 = vmatpush3.bf16.msra.mxu1 %v2618_v2  ;;  %v2758_v40 = vpack.c.bf16 %v1873_v20, %v1872_v9  ;;  %v381_v2 = vld [vmem:[%s239_s7 + $0x38] sm:$0xff] }
  0x7a   : > { %2749 = vmatpush3.bf16.msra.mxu0 %v2746_v41  ;;  %2623 = vmatprep.subr.bf16.mxu1 %v2622_v0 }
  0x7b   : > { %2751 = vmatprep.subr.bf16.mxu0 %v2750_v48 }
  0x7d   : > { %2625 = vmatpush3.bf16.msra.mxu1 %v2622_v0 }
  0x7e   : > { %2753 = vmatpush3.bf16.msra.mxu0 %v2750_v48  ;;  %2627 = vmatprep.subr.bf16.mxu1 %v2626_v52 }
  0x7f   : > { %2755 = vmatprep.subr.bf16.mxu0 %v2754_v53 }
  0x81   : > { %2629 = vmatpush3.bf16.msra.mxu1 %v2626_v52 }
  0x82   : > { %2757 = vmatpush3.bf16.msra.mxu0 %v2754_v53  ;;  %2631 = vmatprep.subr.bf16.mxu1 %v2630_v14 }
  0x83   : > { %2759 = vmatprep.subr.bf16.mxu0 %v2758_v40 }
  0x85   : > { %2633 = vmatpush3.bf16.msra.mxu1 %v2630_v14 }
  0x86   : > { %2761 = vmatpush3.bf16.msra.mxu0 %v2758_v40  ;;  %2794 = vmatprep.subr.bf16.mxu1 %v2762_v3 }
  0x87   : > { %2763 = vmatprep.subr.bf16.mxu0 %v2762_v3 }
  0x88   : > { %2275 = vmatmul.mubr.msk.f32.vlgmr.msra.gmra.mrb[0].mxu1 %vm342_vm0, %v3069_v62  ;;  %v2770_v62 = vpack.c.bf16 %v1879_v58, %v1878_v25 }
  0x89   : > { %2451 = vmatmul.mubr.f32.vlgmr.msra.gmra.mrb[0].mxu0 %v3225_v32  ;;  %2802 = vmatpush3.bf16.msra.mxu1 %v2762_v3  ;;  %v1881_v32 = vld [vmem:[%s3775_s3 + $0x438] sm:$0xff] }
  0x8a   : > { %2765 = vmatpush3.bf16.msra.mxu0 %v2762_v3  ;;  %2277 = vmatprep.mubr.msk.f32.mxu1 %vm342_vm0, %v3146_v45  ;;  %v2774_v45 = vpack.c.bf16 %v1881_v32, %v1880_v60 }
  0x8b   : > { %2453 = vmatprep.mubr.f32.mxu0 %v3249_v44  ;;  %2767 = vmatprep.subr.bf16.mxu0 %v2766_v21  ;;  %v1883_v44 = vld [vmem:[%s3775_s3 + $0x448] sm:$0xff] }
  0x8c   : > { %2278 = vmatmul.mubr.msk.f32.gmra.mrb[2].mxu1 %vm342_vm0, %v3153_v50  ;;  %2795 = vmatprep.subr.bf16.mxu1 %v2766_v21  ;;  %v1882_v50 = vld [vmem:[%s3775_s3 + $0x440] sm:$0xff] }
  0x8d   : > { %2454 = vmatmul.mubr.f32.gmra.mrb[2].mxu0 %v3296_v4  ;;  %2803 = vmatpush3.bf16.msra.mxu1 %v2766_v21  ;;  %v1884_v4 = vld [vmem:[%s3775_s3 + $0x450] sm:$0xff] }
  0x8e   : > { %2769 = vmatpush3.bf16.msra.mxu0 %v2766_v21  ;;  %2280 = vmatprep.mubr.msk.f32.mxu1 %vm342_vm0, %v3171_v59  ;;  %v2778_v59 = vpack.c.bf16 %v1883_v44, %v1882_v50 }
  0x8f   : > { %2456 = vmatprep.mubr.f32.mxu0 %v3307_v61  ;;  %2771 = vmatprep.subr.bf16.mxu0 %v2770_v62  ;;  %v1886_v61 = vld [vmem:[%s3775_s3 + $0x460] sm:$0xff] }
  0x90   : > { %2281 = vmatmul.mubr.msk.f32.gmra.mrb[4].mxu1 %vm342_vm0, %v3219_v30  ;;  %2796 = vmatprep.subr.bf16.mxu1 %v2770_v62  ;;  %v1885_v30 = vld [vmem:[%s3775_s3 + $0x458] sm:$0xff] }
  0x91   : > { %2457 = vmatmul.mubr.f32.gmra.mrb[4].mxu0 %v3337_v12  ;;  %2804 = vmatpush3.bf16.msra.mxu1 %v2770_v62  ;;  %v1887_v12 = vld [vmem:[%s3775_s3 + $0x468] sm:$0xff] }
  0x92   : > { %2773 = vmatpush3.bf16.msra.mxu0 %v2770_v62  ;;  %2283 = vmatprep.mubr.msk.f32.mxu1 %vm342_vm0, %v3260_v22  ;;  %v2782_v22 = vpack.c.bf16 %v1885_v30, %v1884_v4  ;;  %v2786_v24 = vpack.c.bf16 %v1887_v12, %v1886_v61 }
  0x93   : > { %2459 = vmatprep.mubr.f32.mxu0 %v3342_v16  ;;  %2775 = vmatprep.subr.bf16.mxu0 %v2774_v45  ;;  %v1889_v16 = vld [vmem:[%s3775_s3 + $0x478] sm:$0xff] }
  0x94   : > { %2284 = vmatmul.mubr.msk.f32.gmra.mrb[6].mxu1 %vm342_vm0, %v3272_v28  ;;  %2797 = vmatprep.subr.bf16.mxu1 %v2774_v45  ;;  %v1888_v28 = vld [vmem:[%s3775_s3 + $0x470] sm:$0xff] }
  0x95   : > { %2460 = vmatmul.mubr.f32.gmra.mrb[6].mxu0 %v3354_v1  ;;  %2805 = vmatpush3.bf16.msra.mxu1 %v2774_v45  ;;  %v2790_v1 = vpack.c.bf16 %v1889_v16, %v1888_v28 }
  0x96   : > { %2777 = vmatpush3.bf16.msra.mxu0 %v2774_v45  ;;  %2798 = vmatprep.subr.bf16.mxu1 %v2778_v59 }
  0x97   : > { %2779 = vmatprep.subr.bf16.mxu0 %v2778_v59  ;;  %2494 = vmatprep.mubr.f32.mxu0 %v3425_v13  ;;  %v375_v13 = vld [vmem:[%s239_s7 + $0x8] sm:$0xff] }
  0x98   : > { %2500 = vmatprep.mubr.f32.mxu1 %v3475_v5  ;;  %v374_v5 = vld [vmem:[%s239_s7] sm:$0xff] }
  0x99   : > { %2806 = vmatpush3.bf16.msra.mxu1 %v2778_v59 }
  0x9a   : > { %2781 = vmatpush3.bf16.msra.mxu0 %v2778_v59  ;;  %2799 = vmatprep.subr.bf16.mxu1 %v2782_v22 }
  0x9b   : > { %2783 = vmatprep.subr.bf16.mxu0 %v2782_v22 }
  0x9d   : > { %2807 = vmatpush3.bf16.msra.mxu1 %v2782_v22 }
  0x9e   : > { %2785 = vmatpush3.bf16.msra.mxu0 %v2782_v22  ;;  %2800 = vmatprep.subr.bf16.mxu1 %v2786_v24 }
  0x9f   : > { %2787 = vmatprep.subr.bf16.mxu0 %v2786_v24 }
  0xa1   : > { %2808 = vmatpush3.bf16.msra.mxu1 %v2786_v24 }
  0xa2   : > { %2789 = vmatpush3.bf16.msra.mxu0 %v2786_v24  ;;  %2801 = vmatprep.subr.bf16.mxu1 %v2790_v1 }
  0xa3   : > { %2791 = vmatprep.subr.bf16.mxu0 %v2790_v1 }
  0xa5   : > { %2809 = vmatpush3.bf16.msra.mxu1 %v2790_v1 }
  0xa6   : > { %2793 = vmatpush3.bf16.msra.mxu0 %v2790_v1 }
  0xa8   : > { %2501 = vmatmul.mubr.f32.vlgmr.msra.gmra.mrb[8].mxu1 %v3496_v19 }
  0xa9   : > { %2495 = vmatmul.mubr.f32.vlgmr.msra.gmra.mrb[0].mxu0 %v3444_v8  ;;  %2503 = vmatprep.mubr.f32.mxu1 %v3499_v11  ;;  %v376_v11 = vld [vmem:[%s239_s7 + $0x10] sm:$0xff] }
  0xaa   : > { %2497 = vmatprep.mubr.f32.mxu0 %v3449_v49 }
  0xac   : > { %2504 = vmatmul.mubr.f32.gmra.mrb[10].mxu1 %v3509_v31 }
  0xad   : > { %2498 = vmatmul.mubr.f32.gmra.mrb[2].mxu0 %v3470_v46  ;;  %v378_v46 = vld [vmem:[%s239_s7 + $0x20] sm:$0xff] }
 0x15b   : > { %v2276_v10 = vpop.f32.mrb[0].mxu1 }
 0x15c   : > { %v2810_v19 = vadd.f32 %v2276_v10, %v375_v13  ;;  %v936_v26 = vpop.f32.mrb[1].mxu1 }
 0x15d   : > { %v2812_v8 = vadd.f32 %v936_v26, %v374_v5 }
 0x15f   : > { %v2279_v35 = vpop.f32.mrb[2].mxu1 }
 0x160   : > { %v2814_v49 = vadd.f32 %v2279_v35, %v377_v42  ;;  %v946_v27 = vpop.f32.mrb[3].mxu1 }
 0x161   : > { %v2816_v31 = vadd.f32 %v946_v27, %v376_v11 }
 0x163   : > { %v2282_v36 = vpop.f32.mrb[4].mxu1 }
 0x164   : > { %v2818_v37 = vadd.f32 %v2282_v36, %v379_v29  ;;  %v2458_v18 = vpop.f32.mrb[4].mxu0  ;;  %v956_v23 = vpop.f32.mrb[5].mxu1 }
 0x165   : > { %v2821_v38 = vadd.f32 %v956_v23, %v378_v46  ;;  %v1492_v39 = vpop.f32.mrb[5].mxu0 }
 0x166   : > { %v2819_v41 = vadd.f32 %v2818_v37, %v2458_v18 }
 0x167   : > { %v2822_v47 = vadd.f32 %v2821_v38, %v1492_v39  ;;  %v2285_v57 = vpop.f32.mrb[6].mxu1 }
 0x168   : > { %v2824_v63 = vadd.f32 %v2285_v57, %v381_v2  ;;  %v2461_v0 = vpop.f32.mrb[6].mxu0  ;;  %v966_v48 = vpop.f32.mrb[7].mxu1 }
 0x169   : > { %v2827_v33 = vadd.f32 %v966_v48, %v380_v43  ;;  %v1502_v17 = vpop.f32.mrb[7].mxu0 }
 0x16a   : > { %v2825_v7 = vadd.f32 %v2824_v63, %v2461_v0 }
 0x16b   : > { %v2828_v51 = vadd.f32 %v2827_v33, %v1502_v17 }
 0x17b   : > { %v2502_v52 = vpop.f32.mrb[8].mxu1 }
 0x17c   : > { %v2496_v53 = vpop.f32.mrb[0].mxu0  ;;  %v2820_v56 = vadd.f32 %v2819_v41, %v2502_v52  ;;  %v1626_v54 = vpop.f32.mrb[9].mxu1 }
 0x17d   : > { %v2811_v9 = vadd.f32 %v2810_v19, %v2496_v53  ;;  %v1606_v20 = vpop.f32.mrb[1].mxu0  ;;  %v2823_v14 = vadd.f32 %v2822_v47, %v1626_v54 }
 0x17e   : > { %1658 = vst [vmem:[%s244_s24 + $0x28] sm:$0xff] %v2820_v56  ;;  %v2813_v40 = vadd.f32 %v2812_v8, %v1606_v20 }
 0x17f   : > { %1654 = vst [vmem:[%s244_s24 + $0x8] sm:$0xff] %v2811_v9  ;;  %1657 = vst [vmem:[%s244_s24 + $0x20] sm:$0xff] %v2823_v14  ;;  %v2505_v34 = vpop.f32.mrb[10].mxu1 }
 0x180   : > { %1653 = vst [vmem:[%s244_s24] sm:$0xff] %v2813_v40  ;;  %v2499_v55 = vpop.f32.mrb[2].mxu0  ;;  %v2826_v3 = vadd.f32 %v2825_v7, %v2505_v34  ;;  %v1636_v6 = vpop.f32.mrb[11].mxu1 }
 0x181   : > { %v2815_v15 = vadd.f32 %v2814_v49, %v2499_v55  ;;  %v1616_v21 = vpop.f32.mrb[3].mxu0  ;;  %v2829_v25 = vadd.f32 %v2828_v51, %v1636_v6 }
 0x182   : > { %1660 = vst [vmem:[%s244_s24 + $0x38] sm:$0xff] %v2826_v3  ;;  %v2817_v58 = vadd.f32 %v2816_v31, %v1616_v21 }
 0x183   : > { %1656 = vst [vmem:[%s244_s24 + $0x18] sm:$0xff] %v2815_v15  ;;  %1659 = vst [vmem:[%s244_s24 + $0x30] sm:$0xff] %v2829_v25 }
 0x184   : > { %1655 = vst [vmem:[%s244_s24 + $0x10] sm:$0xff] %v2817_v58 }
 0x185 PF: > { %s15_s18 = sadd.s32 1, %s2898_s18  }
 0x186   : > { %p12_p4 = scmp.ge.s32.totalorder %s15_s18, 4  }
 0x188   :  { %14 = sbr.rel (!%p12_p4) target bundleno = 1 (0x1), region = 81 }

// kernel: a_call__.10
= control target key start
LH: loop header
LB: loop body
LE: loop exit
PB: predicated region body
PF: predicated region fallthrough
CT: control target
= control target key end

     0   :  { %s2633_s9 = smov 0   ;;  %s3309_s0 = inlined_call_operand.vmem [shape: f32[2,10,10,128], index: 0, kind: input, shape index: {}]   ;;  %s3310_s1 = inlined_call_operand.vmem [shape: f32[9,128,128], index: 1, kind: input, shape index: {}]   ;;  %s3311_s2 = inlined_call_operand.vmem [shape: f32[2,8,8,128], index: 2, kind: output, shape index: {}]  }
   0x1 LB: > { %s1482_s10 = sadd.s32 4294967295, %s2616_s9   ;;  %p1486_p0 = scmp.ge.s32.totalorder %s2616_s9, 1  ;;  %s2616_s9 = sphi %s2633_s9, %s12_s9  }
   0x2   : > { %p112_p1 = scmp.lt.s32.totalorder %s2616_s9, 3 }
   0x4   : > { %p113_p2 = pnand %p1486_p0, %p112_p1 }
   0x5   : > { %v1490_v0 = vld [vmem:[%s3310_s1 + $0x80] sm:$0xff] (!%p113_p2)  ;;  %v1491_v1 = vld [vmem:[%s3310_s1 + $0x88] sm:$0xff] (!%p113_p2)  ;;  %p134_p3 = scmp.lt.s32.totalorder (!%p113_p2), %s1482_s10, 1  ;;  %v1492_v5 = vld [vmem:[%s3310_s1 + $0x90] sm:$0xff] (!%p113_p2)  ;;  %vm196_vm0 = vcmask (!%p113_p2), 1046528   ;;  %vm456_vm1 = vcmask (!%p113_p2), 1045504  }
   0x6   : > { %116 = sbr.rel (%p113_p2) target bundleno = 389 (0x185), region = 28  ;;  %v1538_v2 = vld [vmem:[%s3310_s1 + $0x200] sm:$0xff] (!%p113_p2)  ;;  %v2233_v3 = vpack.c.bf16 (!%p113_p2), %v1491_v1, %v1490_v0  ;;  %v1539_v4 = vld [vmem:[%s3310_s1 + $0x208] sm:$0xff] (!%p113_p2)  ;;  %v1493_v6 = vld [vmem:[%s3310_s1 + $0x98] sm:$0xff] (!%p113_p2) }
   0x7   : > { %v2361_v7 = vpack.c.bf16 (!%p113_p2), %v1539_v4, %v1538_v2  ;;  %v2237_v8 = vpack.c.bf16 (!%p113_p2), %v1493_v6, %v1492_v5  ;;  %v1540_v9 = vld [vmem:[%s3310_s1 + $0x210] sm:$0xff] (!%p113_p2)  ;;  %v1541_v10 = vld [vmem:[%s3310_s1 + $0x218] sm:$0xff] (!%p113_p2)  ;;  %v1494_v11 = vld [vmem:[%s3310_s1 + $0xa0] sm:$0xff] (!%p113_p2) }
   0x8   : > { %2234 = vmatprep.subr.bf16.mxu1 (!%p113_p2), %v2233_v3  ;;  %v2365_v12 = vpack.c.bf16 (!%p113_p2), %v1541_v10, %v1540_v9  ;;  %v1495_v13 = vld [vmem:[%s3310_s1 + $0xa8] sm:$0xff] (!%p113_p2)  ;;  %v1542_v14 = vld [vmem:[%s3310_s1 + $0x220] sm:$0xff] (!%p113_p2)  ;;  %v1496_v18 = vld [vmem:[%s3310_s1 + $0xb0] sm:$0xff] (!%p113_p2) }
   0x9   : > { %v1543_v15 = vld [vmem:[%s3310_s1 + $0x228] sm:$0xff] (!%p113_p2)  ;;  %2362 = vmatprep.subr.bf16.mxu0 (!%p113_p2), %v2361_v7  ;;  %2236 = vmatpush3.bf16.msra.mxu1 (!%p113_p2), %v2233_v3  ;;  %v2241_v16 = vpack.c.bf16 (!%p113_p2), %v1495_v13, %v1494_v11  ;;  %v1497_v19 = vld [vmem:[%s3310_s1 + $0xb8] sm:$0xff] (!%p113_p2)  ;;  %v1544_v20 = vld [vmem:[%s3310_s1 + $0x230] sm:$0xff] (!%p113_p2) }
   0xa   : > { %2364 = vmatpush3.bf16.msra.mxu0 (!%p113_p2), %v2361_v7  ;;  %2238 = vmatprep.subr.bf16.mxu1 (!%p113_p2), %v2237_v8  ;;  %v2369_v17 = vpack.c.bf16 (!%p113_p2), %v1543_v15, %v1542_v14  ;;  %v1545_v21 = vld [vmem:[%s3310_s1 + $0x238] sm:$0xff] (!%p113_p2)  ;;  %v2245_v22 = vpack.c.bf16 (!%p113_p2), %v1497_v19, %v1496_v18  ;;  %v1498_v23 = vld [vmem:[%s3310_s1 + $0xc0] sm:$0xff] (!%p113_p2)  ;;  %v1499_v24 = vld [vmem:[%s3310_s1 + $0xc8] sm:$0xff] (!%p113_p2) }
   0xb   : > { %2366 = vmatprep.subr.bf16.mxu0 (!%p113_p2), %v2365_v12  ;;  %v2373_v25 = vpack.c.bf16 (!%p113_p2), %v1545_v21, %v1544_v20  ;;  %v1546_v27 = vld [vmem:[%s3310_s1 + $0x240] sm:$0xff] (!%p113_p2)  ;;  %v1547_v28 = vld [vmem:[%s3310_s1 + $0x248] sm:$0xff] (!%p113_p2)  ;;  %v2249_v31 = vpack.c.bf16 (!%p113_p2), %v1499_v24, %v1498_v23  ;;  %v1500_v40 = vld [vmem:[%s3310_s1 + $0xd0] sm:$0xff] (!%p113_p2) }
   0xc   : > { %v2377_v39 = vpack.c.bf16 (!%p113_p2), %v1547_v28, %v1546_v27  ;;  %v1501_v41 = vld [vmem:[%s3310_s1 + $0xd8] sm:$0xff] (!%p113_p2)  ;;  %v1548_v43 = vld [vmem:[%s3310_s1 + $0x250] sm:$0xff] (!%p113_p2)  ;;  %v1502_v49 = vld [vmem:[%s3310_s1 + $0xe0] sm:$0xff] (!%p113_p2) }
   0xd   : > { %s3313_s10 = smov (!%p134_p3, %s1482_s10), 1  ;;  %2240 = vmatpush3.bf16.msra.mxu1 %v2237_v8  ;;  %v1549_v44 = vld [vmem:[%s3310_s1 + $0x258] sm:$0xff]  ;;  %v2253_v46 = vpack.c.bf16 %v1501_v41, %v1500_v40  ;;  %v1503_v50 = vld [vmem:[%s3310_s1 + $0xe8] sm:$0xff]  ;;  %v1550_v51 = vld [vmem:[%s3310_s1 + $0x260] sm:$0xff] }
   0xe   : > { %s2601_s7 = smul.u32 160, %s3313_s10  ;;  %2368 = vmatpush3.bf16.msra.mxu0 %v2365_v12  ;;  %2242 = vmatprep.subr.bf16.mxu1 %v2241_v16  ;;  %v2381_v48 = vpack.c.bf16 %v1549_v44, %v1548_v43  ;;  %v1551_v52 = vld [vmem:[%s3310_s1 + $0x268] sm:$0xff]  ;;  %v2257_v53 = vpack.c.bf16 %v1503_v50, %v1502_v49  ;;  %v1504_v55 = vld [vmem:[%s3310_s1 + $0xf0] sm:$0xff]  ;;  %v1505_v56 = vld [vmem:[%s3310_s1 + $0xf8] sm:$0xff]  ;;  %s1620_s19 = sshll.u32 %s3313_s10, 6 }
   0xf   : > { %2370 = vmatprep.subr.bf16.mxu0 %v2369_v17  ;;  %v2385_v54 = vpack.c.bf16 %v1551_v52, %v1550_v51  ;;  %v1552_v57 = vld [vmem:[%s3310_s1 + $0x270] sm:$0xff]  ;;  %v1553_v58 = vld [vmem:[%s3310_s1 + $0x278] sm:$0xff]  ;;  %v2261_v59 = vpack.c.bf16 %v1505_v56, %v1504_v55  ;;  %v164_v60 = vld [vmem:[%s3310_s1] sm:$0xff]  ;;  %s143_s23 = scalar_lea.vmem %s3311_s2, %s1620_s19 }
  0x10   : > { %s2695_s20 = scalar_lea.vmem %s3309_s0, %s2601_s7  ;;  %v2389_v61 = vpack.c.bf16 %v1553_v58, %v1552_v57  ;;  %v165_v62 = vld [vmem:[%s3310_s1 + $0x8] sm:$0xff]  ;;  %v1554_v1 = vld [vmem:[%s3310_s1 + $0x280] sm:$0xff]  ;;  %v166_v6 = vld [vmem:[%s3310_s1 + $0x10] sm:$0xff] }
  0x11   : > { %v2704_v26 = vld [vmem:[%s2695_s20] sm:$0xff]  ;;  %v145_v29 = vld [vmem:[%s2695_s20 + $0x8] sm:$0x3]  ;;  %2244 = vmatpush3.bf16.msra.mxu1 %v2241_v16  ;;  %v2715_v33 = vld [vmem:[%s2695_s20 + $0x10] sm:$0xff]  ;;  %v2265_v3 = vpack.c.bf16 %v165_v62, %v164_v60 }
  0x12   : > { %v197_v30 = vrot.slane %v2704_v26, 1  ;;  %v198_v32 = vrot.slane %v145_v29, 1  ;;  %v2718_v34 = vld [vmem:[%s2695_s20 + $0x18] sm:$0x3]  ;;  %2372 = vmatpush3.bf16.msra.mxu0 %v2369_v17  ;;  %2246 = vmatprep.subr.bf16.mxu1 %v2245_v22  ;;  %v200_v35 = vrot.slane %v2715_v33, 1  ;;  %v457_v37 = vrot.slane %v2704_v26, 2 }
  0x13   : > { %v201_v36 = vrot.slane %v2718_v34, 1  ;;  %v458_v38 = vrot.slane %v145_v29, 2  ;;  %2374 = vmatprep.subr.bf16.mxu0 %v2373_v25  ;;  %v2774_v63 = vld [vmem:[%s2695_s20 + $0x20] sm:$0xff]  ;;  %v2777_v0 = vld [vmem:[%s2695_s20 + $0x28] sm:$0x3]  ;;  %v2791_v7 = vld [vmem:[%s2695_s20 + $0x30] sm:$0xff] }
  0x14   : > { %v199_v42 = vsel %vm196_vm0, %v197_v30, %v198_v32  ;;  %v1555_v2 = vld [vmem:[%s3310_s1 + $0x288] sm:$0xff]  ;;  %v203_v4 = vrot.slane %v2774_v63, 1  ;;  %v204_v5 = vrot.slane %v2777_v0, 1  ;;  %v2794_v8 = vld [vmem:[%s2695_s20 + $0x38] sm:$0x3]  ;;  %v2800_v11 = vld [vmem:[%s2695_s20 + $0x40] sm:$0xff] }
  0x15   : > { %1869 = vmatprep.mubr.f32.mxu1 %v199_v42  ;;  %v2737_v45 = vsel %vm196_vm0, %v200_v35, %v201_v36  ;;  %2248 = vmatpush3.bf16.msra.mxu1 %v2245_v22  ;;  %v2741_v47 = vsel %vm456_vm1, %v457_v37, %v458_v38  ;;  %v2393_v9 = vpack.c.bf16 %v1555_v2, %v1554_v1  ;;  %v167_v10 = vld [vmem:[%s3310_s1 + $0x18] sm:$0xff]  ;;  %v2803_v12 = vld [vmem:[%s2695_s20 + $0x48] sm:$0x3]  ;;  %v1556_v13 = vld [vmem:[%s3310_s1 + $0x290] sm:$0xff]  ;;  %v206_v15 = vrot.slane %v2791_v7, 1 }
  0x16   : > { %2045 = vmatprep.mubr.f32.mxu0 %v2737_v45  ;;  %2376 = vmatpush3.bf16.msra.mxu0 %v2373_v25  ;;  %v1557_v14 = vld [vmem:[%s3310_s1 + $0x298] sm:$0xff]  ;;  %v207_v16 = vrot.slane %v2794_v8, 1  ;;  %v2814_v17 = vsel %vm196_vm0, %v203_v4, %v204_v5  ;;  %v2269_v18 = vpack.c.bf16 %v167_v10, %v166_v6  ;;  %v168_v19 = vld [vmem:[%s3310_s1 + $0x20] sm:$0xff]  ;;  %v209_v20 = vrot.slane %v2800_v11, 1  ;;  %v2822_v22 = vld [vmem:[%s2695_s20 + $0x50] sm:$0xff] }
  0x17   : > { %2250 = vmatprep.subr.bf16.mxu1 %v2249_v31  ;;  %2378 = vmatprep.subr.bf16.mxu0 %v2377_v39  ;;  %v210_v21 = vrot.slane %v2803_v12, 1  ;;  %v2825_v23 = vld [vmem:[%s2695_s20 + $0x58] sm:$0x3]  ;;  %v2397_v24 = vpack.c.bf16 %v1557_v14, %v1556_v13  ;;  %v169_v25 = vld [vmem:[%s3310_s1 + $0x28] sm:$0xff]  ;;  %v2831_v27 = vld [vmem:[%s2695_s20 + $0x60] sm:$0xff]  ;;  %v212_v32 = vrot.slane %v2822_v22, 1 }
  0x18   : > { %v2834_v28 = vld [vmem:[%s2695_s20 + $0x68] sm:$0x3]  ;;  %v1558_v29 = vld [vmem:[%s3310_s1 + $0x2a0] sm:$0xff]  ;;  %v213_v35 = vrot.slane %v2825_v23, 1  ;;  %v2273_v36 = vpack.c.bf16 %v169_v25, %v168_v19  ;;  %v170_v37 = vld [vmem:[%s3310_s1 + $0x30] sm:$0xff]  ;;  %v460_v1 = vrot.slane %v2715_v33, 2 }
  0x19   : > { %2252 = vmatpush3.bf16.msra.mxu1 %v2249_v31  ;;  %v1559_v30 = vld [vmem:[%s3310_s1 + $0x2a8] sm:$0xff]  ;;  %v2845_v31 = vsel %vm196_vm0, %v206_v15, %v207_v16  ;;  %v2853_v38 = vsel %vm196_vm0, %v209_v20, %v210_v21  ;;  %v216_v40 = vrot.slane %v2834_v28, 1  ;;  %v2858_v41 = vld [vmem:[%s2695_s20 + $0x70] sm:$0xff]  ;;  %v2861_v42 = vld [vmem:[%s2695_s20 + $0x78] sm:$0x3]  ;;  %v461_v2 = vrot.slane %v2718_v34, 2 }
  0x1a   : > { %2380 = vmatpush3.bf16.msra.mxu0 %v2377_v39  ;;  %2254 = vmatprep.subr.bf16.mxu1 %v2253_v46  ;;  %v215_v39 = vrot.slane %v2831_v27, 1  ;;  %v2401_v43 = vpack.c.bf16 %v1559_v30, %v1558_v29  ;;  %v171_v44 = vld [vmem:[%s3310_s1 + $0x38] sm:$0xff]  ;;  %v2883_v50 = vsel %vm196_vm0, %v212_v32, %v213_v35  ;;  %v218_v51 = vrot.slane %v2858_v41, 1  ;;  %v172_v58 = vld [vmem:[%s3310_s1 + $0x40] sm:$0xff]  ;;  %v174_v6 = vld [vmem:[%s3310_s1 + $0x50] sm:$0xff] }
  0x1b   : > { %2382 = vmatprep.subr.bf16.mxu0 %v2381_v48  ;;  %v1561_v49 = vld [vmem:[%s3310_s1 + $0x2b8] sm:$0xff]  ;;  %v219_v52 = vrot.slane %v2861_v42, 1  ;;  %v1562_v60 = vld [vmem:[%s3310_s1 + $0x2c0] sm:$0xff]  ;;  %v1564_v34 = vld [vmem:[%s3310_s1 + $0x2d0] sm:$0xff]  ;;  %v2933_v13 = vsel %vm456_vm1, %v460_v1, %v461_v2  ;;  %v466_v2 = vrot.slane %v2791_v7, 2 }
  0x1c   : > { %v1565_v10 = vld [vmem:[%s3310_s1 + $0x2d8] sm:$0xff]  ;;  %v2936_v15 = vld [vmem:[%s2695_s20 + $0x90] sm:$0xff]  ;;  %v177_v19 = vld [vmem:[%s3310_s1 + $0x68] sm:$0xff] }
  0x1d   : > { %2256 = vmatpush3.bf16.msra.mxu1 %v2253_v46  ;;  %v2871_v46 = vld [vmem:[%s2695_s20 + $0x88] sm:$0x3]  ;;  %v2909_v62 = vsel %vm196_vm0, %v218_v51, %v219_v52  ;;  %v2413_v16 = vpack.c.bf16 %v1565_v10, %v1564_v34  ;;  %v1151_v20 = vrot.slane %v2936_v15, 1  ;;  %v1285_v21 = vrot.slane %v2936_v15, 2  ;;  %v163_v29 = vld [vmem:[%s2695_s20 + $0x98] sm:$0x3] }
  0x1e   : > { %2384 = vmatpush3.bf16.msra.mxu0 %v2381_v48  ;;  %2258 = vmatprep.subr.bf16.mxu1 %v2257_v53  ;;  %v1560_v48 = vld [vmem:[%s3310_s1 + $0x2b0] sm:$0xff]  ;;  %v752_v56 = vrot.slane %v2871_v46, 1  ;;  %v1567_v25 = vld [vmem:[%s3310_s1 + $0x2e8] sm:$0xff]  ;;  %v1152_v30 = vrot.slane %v163_v29, 1  ;;  %v1286_v32 = vrot.slane %v163_v29, 2  ;;  %v1506_v51 = vld [vmem:[%s3310_s1 + $0x100] sm:$0xff] }
  0x1f   : > { %2386 = vmatprep.subr.bf16.mxu0 %v2385_v54  ;;  %v2405_v57 = vpack.c.bf16 %v1561_v49, %v1560_v48  ;;  %v1507_v52 = vld [vmem:[%s3310_s1 + $0x108] sm:$0xff]  ;;  %v1572_v1 = vld [vmem:[%s3310_s1 + $0x310] sm:$0xff]  ;;  %v470_v34 = vrot.slane %v2803_v12, 2  ;;  %v476_v29 = vrot.slane %v2834_v28, 2  ;;  %v1577_v28 = vld [vmem:[%s3310_s1 + $0x338] sm:$0xff] }
  0x20   : > { %v1575_v12 = vld [vmem:[%s3310_s1 + $0x328] sm:$0xff] }
  0x21   : > { %2260 = vmatpush3.bf16.msra.mxu1 %v2257_v53  ;;  %v2277_v53 = vpack.c.bf16 %v171_v44, %v170_v37  ;;  %v179_v37 = vld [vmem:[%s3310_s1 + $0x78] sm:$0xff] }
  0x22   : > { %2388 = vmatpush3.bf16.msra.mxu0 %v2385_v54  ;;  %2262 = vmatprep.subr.bf16.mxu1 %v2261_v59  ;;  %v2888_v54 = vsel %vm196_vm0, %v215_v39, %v216_v40  ;;  %v2962_v39 = vsel %vm196_vm0, %v1151_v20, %v1152_v30  ;;  %v2965_v40 = vsel %vm456_vm1, %v1285_v21, %v1286_v32  ;;  %v1569_v44 = vld [vmem:[%s3310_s1 + $0x2f8] sm:$0xff]  ;;  %v473_v20 = vrot.slane %v2825_v23, 2  ;;  %v1512_v32 = vld [vmem:[%s3310_s1 + $0x130] sm:$0xff] }
  0x23   : > { %2390 = vmatprep.subr.bf16.mxu0 %v2389_v61  ;;  %v1513_v23 = vld [vmem:[%s3310_s1 + $0x138] sm:$0xff] }
  0x25   : > { %2264 = vmatpush3.bf16.msra.mxu1 %v2261_v59  ;;  %v173_v59 = vld [vmem:[%s3310_s1 + $0x48] sm:$0xff] }
  0x26   : > { %2392 = vmatpush3.bf16.msra.mxu0 %v2389_v61  ;;  %2266 = vmatprep.subr.bf16.mxu1 %v2265_v3  ;;  %v1563_v61 = vld [vmem:[%s3310_s1 + $0x2c8] sm:$0xff] }
  0x27   : > { %2394 = vmatprep.subr.bf16.mxu0 %v2393_v9  ;;  %v2409_v5 = vpack.c.bf16 %v1563_v61, %v1562_v60  ;;  %v1508_v60 = vld [vmem:[%s3310_s1 + $0x110] sm:$0xff]  ;;  %v1509_v61 = vld [vmem:[%s3310_s1 + $0x118] sm:$0xff] }
  0x28   : > { %1870 = vmatmul.mubr.f32.vlgmr.msra.gmra.mrb[0].mxu1 %v2737_v45  ;;  %v2868_v45 = vld [vmem:[%s2695_s20 + $0x80] sm:$0xff] }
  0x29   : > { %2268 = vmatpush3.bf16.msra.mxu1 %v2265_v3  ;;  %2046 = vmatmul.mubr.f32.vlgmr.msra.gmra.mrb[0].mxu0 %v2814_v17  ;;  %v751_v55 = vrot.slane %v2868_v45, 1  ;;  %v2281_v3 = vpack.c.bf16 %v173_v59, %v172_v58  ;;  %v463_v58 = vrot.slane %v2774_v63, 2 }
  0x2a   : > { %2396 = vmatpush3.bf16.msra.mxu0 %v2393_v9  ;;  %2270 = vmatprep.subr.bf16.mxu1 %v2269_v18  ;;  %v175_v9 = vld [vmem:[%s3310_s1 + $0x58] sm:$0xff] }
  0x2b   : > { %2398 = vmatprep.subr.bf16.mxu0 %v2397_v24  ;;  %1872 = vmatprep.mubr.f32.mxu1 %v2814_v17  ;;  %v2914_v4 = vsel %vm196_vm0, %v751_v55, %v752_v56  ;;  %v2285_v14 = vpack.c.bf16 %v175_v9, %v174_v6  ;;  %v1571_v55 = vld [vmem:[%s3310_s1 + $0x308] sm:$0xff]  ;;  %v464_v56 = vrot.slane %v2777_v0, 2  ;;  %v1573_v0 = vld [vmem:[%s3310_s1 + $0x318] sm:$0xff]  ;;  %v2301_v6 = vpack.c.bf16 %v1509_v61, %v1508_v60  ;;  %v1580_v61 = vld [vmem:[%s3310_s1 + $0x350] sm:$0xff] }
  0x2c   : > { %2048 = vmatprep.mubr.f32.mxu0 %v2845_v31  ;;  %1873 = vmatmul.mubr.f32.gmra.mrb[2].mxu1 %v2845_v31  ;;  %v469_v9 = vrot.slane %v2800_v11, 2  ;;  %v2429_v10 = vpack.c.bf16 %v1573_v0, %v1572_v1  ;;  %v1517_v60 = vld [vmem:[%s3310_s1 + $0x158] sm:$0xff] }
  0x2d   : > { %2272 = vmatpush3.bf16.msra.mxu1 %v2269_v18  ;;  %2049 = vmatmul.mubr.f32.gmra.mrb[2].mxu0 %v2853_v38  ;;  %v176_v18 = vld [vmem:[%s3310_s1 + $0x60] sm:$0xff]  ;;  %v1581_v1 = vld [vmem:[%s3310_s1 + $0x358] sm:$0xff] }
  0x2e   : > { %2400 = vmatpush3.bf16.msra.mxu0 %v2397_v24  ;;  %2274 = vmatprep.subr.bf16.mxu1 %v2273_v36  ;;  %v1566_v24 = vld [vmem:[%s3310_s1 + $0x2e0] sm:$0xff] }
  0x2f   : > { %2402 = vmatprep.subr.bf16.mxu0 %v2401_v43  ;;  %1875 = vmatprep.mubr.f32.mxu1 %v2853_v38  ;;  %v2417_v35 = vpack.c.bf16 %v1567_v25, %v1566_v24  ;;  %v3026_v24 = vsel %vm456_vm1, %v469_v9, %v470_v34  ;;  %v475_v25 = vrot.slane %v2831_v27, 2  ;;  %v1582_v9 = vld [vmem:[%s3310_s1 + $0x360] sm:$0xff]  ;;  %v1583_v34 = vld [vmem:[%s3310_s1 + $0x368] sm:$0xff] }
  0x30   : > { %2051 = vmatprep.mubr.f32.mxu0 %v2883_v50  ;;  %1876 = vmatmul.mubr.f32.gmra.mrb[4].mxu1 %v2883_v50 }
  0x31   : > { %2276 = vmatpush3.bf16.msra.mxu1 %v2273_v36  ;;  %2052 = vmatmul.mubr.f32.gmra.mrb[4].mxu0 %v2888_v54  ;;  %v178_v36 = vld [vmem:[%s3310_s1 + $0x70] sm:$0xff] }
  0x32   : > { %2404 = vmatpush3.bf16.msra.mxu0 %v2401_v43  ;;  %2278 = vmatprep.subr.bf16.mxu1 %v2277_v53  ;;  %v1568_v43 = vld [vmem:[%s3310_s1 + $0x2f0] sm:$0xff]  ;;  %v2293_v48 = vpack.c.bf16 %v179_v37, %v178_v36  ;;  %v478_v36 = vrot.slane %v2858_v41, 2  ;;  %v479_v37 = vrot.slane %v2861_v42, 2  ;;  %v1515_v42 = vld [vmem:[%s3310_s1 + $0x148] sm:$0xff] }
  0x33   : > { %2406 = vmatprep.subr.bf16.mxu0 %v2405_v57  ;;  %1878 = vmatprep.mubr.f32.mxu1 %v2888_v54  ;;  %v2421_v49 = vpack.c.bf16 %v1569_v44, %v1568_v43  ;;  %v2309_v43 = vpack.c.bf16 %v1513_v23, %v1512_v32  ;;  %v3052_v44 = vsel %vm456_vm1, %v475_v25, %v476_v29  ;;  %v1523_v25 = vld [vmem:[%s3310_s1 + $0x188] sm:$0xff]  ;;  %v1586_v29 = vld [vmem:[%s3310_s1 + $0x380] sm:$0xff] }
  0x34   : > { %2054 = vmatprep.mubr.f32.mxu0 %v2909_v62  ;;  %1879 = vmatmul.mubr.f32.gmra.mrb[6].mxu1 %v2909_v62 }
  0x35   : > { %2280 = vmatpush3.bf16.msra.mxu1 %v2277_v53  ;;  %2055 = vmatmul.mubr.f32.gmra.mrb[6].mxu0 %v2914_v4  ;;  %v1570_v53 = vld [vmem:[%s3310_s1 + $0x300] sm:$0xff] }
  0x36   : > { %2408 = vmatpush3.bf16.msra.mxu0 %v2405_v57  ;;  %2282 = vmatprep.subr.bf16.mxu1 %v2281_v3  ;;  %v2297_v57 = vpack.c.bf16 %v1507_v52, %v1506_v51  ;;  %v2425_v59 = vpack.c.bf16 %v1571_v55, %v1570_v53  ;;  %v1514_v52 = vld [vmem:[%s3310_s1 + $0x140] sm:$0xff]  ;;  %v3073_v55 = vsel %vm456_vm1, %v478_v36, %v479_v37  ;;  %v1588_v36 = vld [vmem:[%s3310_s1 + $0x390] sm:$0xff]  ;;  %v1589_v37 = vld [vmem:[%s3310_s1 + $0x398] sm:$0xff] }
  0x37   : > { %2410 = vmatprep.subr.bf16.mxu0 %v2409_v5  ;;  %1913 = vmatprep.mubr.f32.mxu1 %v2704_v26  ;;  %v2289_v26 = vpack.c.bf16 %v177_v19, %v176_v18  ;;  %v472_v19 = vrot.slane %v2822_v22, 2  ;;  %v1578_v53 = vld [vmem:[%s3310_s1 + $0x340] sm:$0xff] }
  0x38   : > { %2089 = vmatprep.mubr.f32.mxu0 %v2933_v13 }
  0x39   : > { %2284 = vmatpush3.bf16.msra.mxu1 %v2281_v3  ;;  %v467_v3 = vrot.slane %v2794_v8, 2  ;;  %v1511_v8 = vld [vmem:[%s3310_s1 + $0x128] sm:$0xff] }
  0x3a   : > { %2412 = vmatpush3.bf16.msra.mxu0 %v2409_v5  ;;  %2286 = vmatprep.subr.bf16.mxu1 %v2285_v14  ;;  %v3002_v5 = vsel %vm456_vm1, %v463_v58, %v464_v56  ;;  %v2313_v56 = vpack.c.bf16 %v1515_v42, %v1514_v52  ;;  %v1590_v52 = vld [vmem:[%s3310_s1 + $0x3a0] sm:$0xff]  ;;  %v1591_v42 = vld [vmem:[%s3310_s1 + $0x3a8] sm:$0xff] }
  0x3b   : > { %2414 = vmatprep.subr.bf16.mxu0 %v2413_v16  ;;  %v3021_v18 = vsel %vm456_vm1, %v466_v2, %v467_v3  ;;  %v2445_v2 = vpack.c.bf16 %v1581_v1, %v1580_v61  ;;  %v1518_v3 = vld [vmem:[%s3310_s1 + $0x160] sm:$0xff] }
  0x3c   : > { %v1530_v1 = vld [vmem:[%s3310_s1 + $0x1c0] sm:$0xff] }
  0x3d   : > { %2288 = vmatpush3.bf16.msra.mxu1 %v2285_v14  ;;  %v1510_v14 = vld [vmem:[%s3310_s1 + $0x120] sm:$0xff] }
  0x3e   : > { %2416 = vmatpush3.bf16.msra.mxu0 %v2413_v16  ;;  %2290 = vmatprep.subr.bf16.mxu1 %v2289_v26  ;;  %v1574_v16 = vld [vmem:[%s3310_s1 + $0x320] sm:$0xff]  ;;  %v2305_v21 = vpack.c.bf16 %v1511_v8, %v1510_v14  ;;  %v2449_v14 = vpack.c.bf16 %v1583_v34, %v1582_v9  ;;  %v1521_v8 = vld [vmem:[%s3310_s1 + $0x178] sm:$0xff]  ;;  %v1532_v34 = vld [vmem:[%s3310_s1 + $0x1d0] sm:$0xff] }
  0x3f   : > { %2418 = vmatprep.subr.bf16.mxu0 %v2417_v35  ;;  %v2433_v30 = vpack.c.bf16 %v1575_v12, %v1574_v16  ;;  %v1584_v16 = vld [vmem:[%s3310_s1 + $0x370] sm:$0xff]  ;;  %v1585_v12 = vld [vmem:[%s3310_s1 + $0x378] sm:$0xff] }
  0x41   : > { %2292 = vmatpush3.bf16.msra.mxu1 %v2289_v26  ;;  %v1576_v26 = vld [vmem:[%s3310_s1 + $0x330] sm:$0xff] }
  0x42   : > { %2420 = vmatpush3.bf16.msra.mxu0 %v2417_v35  ;;  %2294 = vmatprep.subr.bf16.mxu1 %v2293_v48  ;;  %v3047_v35 = vsel %vm456_vm1, %v472_v19, %v473_v20  ;;  %v2437_v51 = vpack.c.bf16 %v1577_v28, %v1576_v26  ;;  %v2453_v20 = vpack.c.bf16 %v1585_v12, %v1584_v16  ;;  %v1524_v26 = vld [vmem:[%s3310_s1 + $0x190] sm:$0xff]  ;;  %v1525_v28 = vld [vmem:[%s3310_s1 + $0x198] sm:$0xff]  ;;  %v1534_v12 = vld [vmem:[%s3310_s1 + $0x1e0] sm:$0xff] }
  0x43   : > { %2422 = vmatprep.subr.bf16.mxu0 %v2421_v49 }
  0x45   : > { %2296 = vmatpush3.bf16.msra.mxu1 %v2293_v48  ;;  %v885_v48 = vrot.slane %v2868_v45, 2 }
  0x46   : > { %2424 = vmatpush3.bf16.msra.mxu0 %v2421_v49  ;;  %2298 = vmatprep.subr.bf16.mxu1 %v2297_v57  ;;  %v886_v49 = vrot.slane %v2871_v46, 2  ;;  %v1579_v46 = vld [vmem:[%s3310_s1 + $0x348] sm:$0xff] }
  0x47   : > { %2426 = vmatprep.subr.bf16.mxu0 %v2425_v59  ;;  %v2441_v58 = vpack.c.bf16 %v1579_v46, %v1578_v53  ;;  %v2465_v46 = vpack.c.bf16 %v1591_v42, %v1590_v52  ;;  %v1609_v42 = vld [vmem:[%s3310_s1 + $0x438] sm:$0xff] }
  0x48   : > { %1914 = vmatmul.mubr.f32.vlgmr.msra.gmra.mrb[0].mxu1 %v2715_v33 }
  0x49   : > { %2300 = vmatpush3.bf16.msra.mxu1 %v2297_v57  ;;  %2090 = vmatmul.mubr.f32.vlgmr.msra.gmra.mrb[0].mxu0 %v3002_v5  ;;  %v3076_v57 = vsel %vm456_vm1, %v885_v48, %v886_v49  ;;  %v2461_v48 = vpack.c.bf16 %v1589_v37, %v1588_v36  ;;  %v1526_v49 = vld [vmem:[%s3310_s1 + $0x1a0] sm:$0xff]  ;;  %v1604_v37 = vld [vmem:[%s3310_s1 + $0x410] sm:$0xff] }
  0x4a   : > { %2428 = vmatpush3.bf16.msra.mxu0 %v2425_v59  ;;  %2302 = vmatprep.subr.bf16.mxu1 %v2301_v6  ;;  %v1516_v59 = vld [vmem:[%s3310_s1 + $0x150] sm:$0xff] }
  0x4b   : > { %2430 = vmatprep.subr.bf16.mxu0 %v2429_v10  ;;  %1916 = vmatprep.mubr.f32.mxu1 %v2774_v63  ;;  %v2317_v0 = vpack.c.bf16 %v1517_v60, %v1516_v59  ;;  %v1593_v59 = vld [vmem:[%s3310_s1 + $0x3b8] sm:$0xff] }
  0x4c   : > { %2092 = vmatprep.mubr.f32.mxu0 %v3021_v18  ;;  %1917 = vmatmul.mubr.f32.gmra.mrb[2].mxu1 %v2791_v7 }
  0x4d   : > { %2304 = vmatpush3.bf16.msra.mxu1 %v2301_v6  ;;  %2093 = vmatmul.mubr.f32.gmra.mrb[2].mxu0 %v3026_v24  ;;  %v1519_v6 = vld [vmem:[%s3310_s1 + $0x168] sm:$0xff] }
  0x4e   : > { %2432 = vmatpush3.bf16.msra.mxu0 %v2429_v10  ;;  %2306 = vmatprep.subr.bf16.mxu1 %v2305_v21  ;;  %v2321_v10 = vpack.c.bf16 %v1519_v6, %v1518_v3  ;;  %v1595_v3 = vld [vmem:[%s3310_s1 + $0x3c8] sm:$0xff] }
  0x4f   : > { %2434 = vmatprep.subr.bf16.mxu0 %v2433_v30  ;;  %1919 = vmatprep.mubr.f32.mxu1 %v2800_v11 }
  0x50   : > { %2095 = vmatprep.mubr.f32.mxu0 %v3047_v35  ;;  %1920 = vmatmul.mubr.f32.gmra.mrb[4].mxu1 %v2822_v22 }
  0x51   : > { %2308 = vmatpush3.bf16.msra.mxu1 %v2305_v21  ;;  %2096 = vmatmul.mubr.f32.gmra.mrb[4].mxu0 %v3052_v44  ;;  %v1522_v21 = vld [vmem:[%s3310_s1 + $0x180] sm:$0xff] }
  0x52   : > { %2436 = vmatpush3.bf16.msra.mxu0 %v2433_v30  ;;  %2310 = vmatprep.subr.bf16.mxu1 %v2309_v43  ;;  %v1587_v30 = vld [vmem:[%s3310_s1 + $0x388] sm:$0xff]  ;;  %v2329_v32 = vpack.c.bf16 %v1523_v25, %v1522_v21 }
  0x53   : > { %2438 = vmatprep.subr.bf16.mxu0 %v2437_v51  ;;  %1922 = vmatprep.mubr.f32.mxu1 %v2831_v27  ;;  %v2457_v23 = vpack.c.bf16 %v1587_v30, %v1586_v29  ;;  %v1537_v29 = vld [vmem:[%s3310_s1 + $0x1f8] sm:$0xff]  ;;  %v1600_v30 = vld [vmem:[%s3310_s1 + $0x3f0] sm:$0xff] }
  0x54   : > { %2098 = vmatprep.mubr.f32.mxu0 %v3073_v55  ;;  %1923 = vmatmul.mubr.f32.gmra.mrb[6].mxu1 %v2858_v41 }
  0x55   : > { %2312 = vmatpush3.bf16.msra.mxu1 %v2309_v43  ;;  %2099 = vmatmul.mubr.f32.gmra.mrb[6].mxu0 %v3076_v57  ;;  %v2333_v43 = vpack.c.bf16 %v1525_v28, %v1524_v26  ;;  %v1602_v26 = vld [vmem:[%s3310_s1 + $0x400] sm:$0xff]  ;;  %v1603_v28 = vld [vmem:[%s3310_s1 + $0x408] sm:$0xff] }
  0x56   : > { %2440 = vmatpush3.bf16.msra.mxu0 %v2437_v51  ;;  %2314 = vmatprep.subr.bf16.mxu1 %v2313_v56  ;;  %v1527_v51 = vld [vmem:[%s3310_s1 + $0x1a8] sm:$0xff]  ;;  %v2489_v36 = vpack.c.bf16 %v1603_v28, %v1602_v26 }
  0x57   : > { %2442 = vmatprep.subr.bf16.mxu0 %v2441_v58  ;;  %1957 = vmatprep.mubr.f32.mxu1 %v2741_v47  ;;  %v1520_v47 = vld [vmem:[%s3310_s1 + $0x170] sm:$0xff]  ;;  %v2337_v53 = vpack.c.bf16 %v1527_v51, %v1526_v49  ;;  %v1606_v49 = vld [vmem:[%s3310_s1 + $0x420] sm:$0xff]  ;;  %v1607_v51 = vld [vmem:[%s3310_s1 + $0x428] sm:$0xff] }
  0x58   : > { %2133 = vmatprep.mubr.f32.mxu0 %v2774_v63  ;;  %v2325_v19 = vpack.c.bf16 %v1521_v8, %v1520_v47  ;;  %v1597_v47 = vld [vmem:[%s3310_s1 + $0x3d8] sm:$0xff]  ;;  %v2497_v52 = vpack.c.bf16 %v1607_v51, %v1606_v49 }
  0x59   : > { %2316 = vmatpush3.bf16.msra.mxu1 %v2313_v56  ;;  %v1529_v56 = vld [vmem:[%s3310_s1 + $0x1b8] sm:$0xff] }
  0x5a   : > { %2444 = vmatpush3.bf16.msra.mxu0 %v2441_v58  ;;  %2318 = vmatprep.subr.bf16.mxu1 %v2317_v0  ;;  %v1592_v58 = vld [vmem:[%s3310_s1 + $0x3b0] sm:$0xff] }
  0x5b   : > { %2446 = vmatprep.subr.bf16.mxu0 %v2445_v2  ;;  %v2469_v61 = vpack.c.bf16 %v1593_v59, %v1592_v58 }
  0x5d   : > { %2320 = vmatpush3.bf16.msra.mxu1 %v2317_v0  ;;  %v1531_v0 = vld [vmem:[%s3310_s1 + $0x1c8] sm:$0xff] }
  0x5e   : > { %2448 = vmatpush3.bf16.msra.mxu0 %v2445_v2  ;;  %2322 = vmatprep.subr.bf16.mxu1 %v2321_v10  ;;  %v1594_v2 = vld [vmem:[%s3310_s1 + $0x3c0] sm:$0xff]  ;;  %v2345_v6 = vpack.c.bf16 %v1531_v0, %v1530_v1 }
  0x5f   : > { %2450 = vmatprep.subr.bf16.mxu0 %v2449_v14  ;;  %v2473_v9 = vpack.c.bf16 %v1595_v3, %v1594_v2 }
  0x61   : > { %2324 = vmatpush3.bf16.msra.mxu1 %v2321_v10  ;;  %v1533_v10 = vld [vmem:[%s3310_s1 + $0x1d8] sm:$0xff] }
  0x62   : > { %2452 = vmatpush3.bf16.msra.mxu0 %v2449_v14  ;;  %2326 = vmatprep.subr.bf16.mxu1 %v2325_v19  ;;  %v1596_v14 = vld [vmem:[%s3310_s1 + $0x3d0] sm:$0xff]  ;;  %v2349_v8 = vpack.c.bf16 %v1533_v10, %v1532_v34 }
  0x63   : > { %2454 = vmatprep.subr.bf16.mxu0 %v2453_v20  ;;  %v2477_v16 = vpack.c.bf16 %v1597_v47, %v1596_v14 }
  0x65   : > { %2328 = vmatpush3.bf16.msra.mxu1 %v2325_v19  ;;  %v1535_v19 = vld [vmem:[%s3310_s1 + $0x1e8] sm:$0xff] }
  0x66   : > { %2456 = vmatpush3.bf16.msra.mxu0 %v2453_v20  ;;  %2330 = vmatprep.subr.bf16.mxu1 %v2329_v32  ;;  %v1598_v20 = vld [vmem:[%s3310_s1 + $0x3e0] sm:$0xff]  ;;  %v2353_v21 = vpack.c.bf16 %v1535_v19, %v1534_v12 }
  0x67   : > { %2458 = vmatprep.subr.bf16.mxu0 %v2457_v23 }
  0x68   : > { %1958 = vmatmul.mubr.f32.vlgmr.msra.gmra.mrb[0].mxu1 %v2933_v13  ;;  %v1528_v13 = vld [vmem:[%s3310_s1 + $0x1b0] sm:$0xff] }
  0x69   : > { %2332 = vmatpush3.bf16.msra.mxu1 %v2329_v32  ;;  %2134 = vmatmul.mubr.f32.vlgmr.msra.gmra.mrb[0].mxu0 %v2791_v7  ;;  %v2341_v60 = vpack.c.bf16 %v1529_v56, %v1528_v13 }
  0x6a   : > { %2460 = vmatpush3.bf16.msra.mxu0 %v2457_v23  ;;  %2334 = vmatprep.subr.bf16.mxu1 %v2333_v43 }
  0x6b   : > { %2462 = vmatprep.subr.bf16.mxu0 %v2461_v48  ;;  %1960 = vmatprep.mubr.f32.mxu1 %v3002_v5 }
  0x6c   : > { %2136 = vmatprep.mubr.f32.mxu0 %v2800_v11  ;;  %1961 = vmatmul.mubr.f32.gmra.mrb[2].mxu1 %v3021_v18 }
  0x6d   : > { %2336 = vmatpush3.bf16.msra.mxu1 %v2333_v43  ;;  %2137 = vmatmul.mubr.f32.gmra.mrb[2].mxu0 %v2822_v22  ;;  %v1605_v43 = vld [vmem:[%s3310_s1 + $0x418] sm:$0xff] }
  0x6e   : > { %2464 = vmatpush3.bf16.msra.mxu0 %v2461_v48  ;;  %2338 = vmatprep.subr.bf16.mxu1 %v2337_v53  ;;  %v2493_v48 = vpack.c.bf16 %v1605_v43, %v1604_v37 }
  0x6f   : > { %2466 = vmatprep.subr.bf16.mxu0 %v2465_v46  ;;  %1963 = vmatprep.mubr.f32.mxu1 %v3026_v24 }
  0x70   : > { %2139 = vmatprep.mubr.f32.mxu0 %v2831_v27  ;;  %1964 = vmatmul.mubr.f32.gmra.mrb[4].mxu1 %v3047_v35 }
  0x71   : > { %2340 = vmatpush3.bf16.msra.mxu1 %v2337_v53  ;;  %2140 = vmatmul.mubr.f32.gmra.mrb[4].mxu0 %v2858_v41 }
  0x72   : > { %2468 = vmatpush3.bf16.msra.mxu0 %v2465_v46  ;;  %2342 = vmatprep.subr.bf16.mxu1 %v2341_v60 }
  0x73   : > { %2470 = vmatprep.subr.bf16.mxu0 %v2469_v61  ;;  %1966 = vmatprep.mubr.f32.mxu1 %v3052_v44 }
  0x74   : > { %2142 = vmatprep.mubr.f32.mxu0 %v2868_v45  ;;  %1967 = vmatmul.mubr.f32.gmra.mrb[6].mxu1 %v3073_v55 }
  0x75   : > { %2344 = vmatpush3.bf16.msra.mxu1 %v2341_v60  ;;  %2143 = vmatmul.mubr.f32.gmra.mrb[6].mxu0 %v2936_v15  ;;  %v1599_v15 = vld [vmem:[%s3310_s1 + $0x3e8] sm:$0xff] }
  0x76   : > { %2472 = vmatpush3.bf16.msra.mxu0 %v2469_v61  ;;  %2346 = vmatprep.subr.bf16.mxu1 %v2345_v6  ;;  %v2481_v25 = vpack.c.bf16 %v1599_v15, %v1598_v20 }
  0x77   : > { %2474 = vmatprep.subr.bf16.mxu0 %v2473_v9  ;;  %2001 = vmatprep.mubr.f32.mxu1 %v2715_v33  ;;  %v1536_v33 = vld [vmem:[%s3310_s1 + $0x1f0] sm:$0xff] }
  0x78   : > { %2177 = vmatprep.mubr.f32.mxu0 %v2814_v17  ;;  %v1601_v17 = vld [vmem:[%s3310_s1 + $0x3f8] sm:$0xff]  ;;  %v2357_v32 = vpack.c.bf16 %v1537_v29, %v1536_v33 }
  0x79   : > { %2348 = vmatpush3.bf16.msra.mxu1 %v2345_v6  ;;  %v2485_v23 = vpack.c.bf16 %v1601_v17, %v1600_v30 }
  0x7a   : > { %2476 = vmatpush3.bf16.msra.mxu0 %v2473_v9  ;;  %2350 = vmatprep.subr.bf16.mxu1 %v2349_v8 }
  0x7b   : > { %2478 = vmatprep.subr.bf16.mxu0 %v2477_v16 }
  0x7d   : > { %2352 = vmatpush3.bf16.msra.mxu1 %v2349_v8 }
  0x7e   : > { %2480 = vmatpush3.bf16.msra.mxu0 %v2477_v16  ;;  %2354 = vmatprep.subr.bf16.mxu1 %v2353_v21 }
  0x7f   : > { %2482 = vmatprep.subr.bf16.mxu0 %v2481_v25 }
  0x81   : > { %2356 = vmatpush3.bf16.msra.mxu1 %v2353_v21 }
  0x82   : > { %2484 = vmatpush3.bf16.msra.mxu0 %v2481_v25  ;;  %2358 = vmatprep.subr.bf16.mxu1 %v2357_v32 }
  0x83   : > { %2486 = vmatprep.subr.bf16.mxu0 %v2485_v23 }
  0x85   : > { %2360 = vmatpush3.bf16.msra.mxu1 %v2357_v32 }
  0x86   : > { %2488 = vmatpush3.bf16.msra.mxu0 %v2485_v23  ;;  %2521 = vmatprep.subr.bf16.mxu1 %v2489_v36 }
  0x87   : > { %2490 = vmatprep.subr.bf16.mxu0 %v2489_v36 }
  0x88   : > { %2002 = vmatmul.mubr.f32.vlgmr.msra.gmra.mrb[0].mxu1 %v2774_v63  ;;  %v1608_v63 = vld [vmem:[%s3310_s1 + $0x430] sm:$0xff] }
  0x89   : > { %2178 = vmatmul.mubr.f32.vlgmr.msra.gmra.mrb[0].mxu0 %v2845_v31  ;;  %2529 = vmatpush3.bf16.msra.mxu1 %v2489_v36  ;;  %v1611_v31 = vld [vmem:[%s3310_s1 + $0x448] sm:$0xff] }
  0x8a   : > { %2492 = vmatpush3.bf16.msra.mxu0 %v2489_v36  ;;  %2004 = vmatprep.mubr.f32.mxu1 %v2791_v7  ;;  %v2501_v7 = vpack.c.bf16 %v1609_v42, %v1608_v63 }
  0x8b   : > { %2180 = vmatprep.mubr.f32.mxu0 %v2853_v38  ;;  %2494 = vmatprep.subr.bf16.mxu0 %v2493_v48  ;;  %v1612_v38 = vld [vmem:[%s3310_s1 + $0x450] sm:$0xff] }
  0x8c   : > { %2005 = vmatmul.mubr.f32.gmra.mrb[2].mxu1 %v2800_v11  ;;  %2522 = vmatprep.subr.bf16.mxu1 %v2493_v48  ;;  %v1610_v11 = vld [vmem:[%s3310_s1 + $0x440] sm:$0xff] }
  0x8d   : > { %2181 = vmatmul.mubr.f32.gmra.mrb[2].mxu0 %v2883_v50  ;;  %2530 = vmatpush3.bf16.msra.mxu1 %v2493_v48  ;;  %v1613_v50 = vld [vmem:[%s3310_s1 + $0x458] sm:$0xff] }
  0x8e   : > { %2496 = vmatpush3.bf16.msra.mxu0 %v2493_v48  ;;  %2007 = vmatprep.mubr.f32.mxu1 %v2822_v22  ;;  %v2505_v22 = vpack.c.bf16 %v1611_v31, %v1610_v11 }
  0x8f   : > { %2183 = vmatprep.mubr.f32.mxu0 %v2888_v54  ;;  %2498 = vmatprep.subr.bf16.mxu0 %v2497_v52  ;;  %v1615_v54 = vld [vmem:[%s3310_s1 + $0x468] sm:$0xff] }
  0x90   : > { %2008 = vmatmul.mubr.f32.gmra.mrb[4].mxu1 %v2831_v27  ;;  %2523 = vmatprep.subr.bf16.mxu1 %v2497_v52  ;;  %v2509_v27 = vpack.c.bf16 %v1613_v50, %v1612_v38 }
  0x91   : > { %2184 = vmatmul.mubr.f32.gmra.mrb[4].mxu0 %v2909_v62  ;;  %2531 = vmatpush3.bf16.msra.mxu1 %v2497_v52  ;;  %v1616_v62 = vld [vmem:[%s3310_s1 + $0x470] sm:$0xff] }
  0x92   : > { %2500 = vmatpush3.bf16.msra.mxu0 %v2497_v52  ;;  %2010 = vmatprep.mubr.f32.mxu1 %v2858_v41  ;;  %v1614_v41 = vld [vmem:[%s3310_s1 + $0x460] sm:$0xff] }
  0x93   : > { %2186 = vmatprep.mubr.f32.mxu0 %v2914_v4  ;;  %2502 = vmatprep.subr.bf16.mxu0 %v2501_v7  ;;  %v1617_v4 = vld [vmem:[%s3310_s1 + $0x478] sm:$0xff] }
  0x94   : > { %2011 = vmatmul.mubr.f32.gmra.mrb[6].mxu1 %v2868_v45  ;;  %2524 = vmatprep.subr.bf16.mxu1 %v2501_v7  ;;  %v2513_v45 = vpack.c.bf16 %v1615_v54, %v1614_v41 }
  0x95   : > { %2187 = vmatmul.mubr.f32.gmra.mrb[6].mxu0 %v2962_v39  ;;  %2532 = vmatpush3.bf16.msra.mxu1 %v2501_v7  ;;  %v2517_v39 = vpack.c.bf16 %v1617_v4, %v1616_v62 }
  0x96   : > { %2504 = vmatpush3.bf16.msra.mxu0 %v2501_v7  ;;  %2525 = vmatprep.subr.bf16.mxu1 %v2505_v22 }
  0x97   : > { %2506 = vmatprep.subr.bf16.mxu0 %v2505_v22  ;;  %2221 = vmatprep.mubr.f32.mxu0 %v3002_v5 }
  0x98   : > { %2227 = vmatprep.mubr.f32.mxu1 %v3052_v44 }
  0x99   : > { %2533 = vmatpush3.bf16.msra.mxu1 %v2505_v22 }
  0x9a   : > { %2508 = vmatpush3.bf16.msra.mxu0 %v2505_v22  ;;  %2526 = vmatprep.subr.bf16.mxu1 %v2509_v27 }
  0x9b   : > { %2510 = vmatprep.subr.bf16.mxu0 %v2509_v27 }
  0x9d   : > { %2534 = vmatpush3.bf16.msra.mxu1 %v2509_v27 }
  0x9e   : > { %2512 = vmatpush3.bf16.msra.mxu0 %v2509_v27  ;;  %2527 = vmatprep.subr.bf16.mxu1 %v2513_v45 }
  0x9f   : > { %2514 = vmatprep.subr.bf16.mxu0 %v2513_v45 }
  0xa1   : > { %2535 = vmatpush3.bf16.msra.mxu1 %v2513_v45 }
  0xa2   : > { %2516 = vmatpush3.bf16.msra.mxu0 %v2513_v45  ;;  %2528 = vmatprep.subr.bf16.mxu1 %v2517_v39 }
  0xa3   : > { %2518 = vmatprep.subr.bf16.mxu0 %v2517_v39 }
  0xa5   : > { %2536 = vmatpush3.bf16.msra.mxu1 %v2517_v39 }
  0xa6   : > { %2520 = vmatpush3.bf16.msra.mxu0 %v2517_v39 }
  0xa8   : > { %2228 = vmatmul.mubr.f32.vlgmr.msra.gmra.mrb[8].mxu1 %v3073_v55 }
  0xa9   : > { %2222 = vmatmul.mubr.f32.vlgmr.msra.gmra.mrb[0].mxu0 %v3021_v18  ;;  %2230 = vmatprep.mubr.f32.mxu1 %v3076_v57 }
  0xaa   : > { %2224 = vmatprep.mubr.f32.mxu0 %v3026_v24 }
  0xac   : > { %2231 = vmatmul.mubr.f32.gmra.mrb[10].mxu1 %v2965_v40 }
  0xad   : > { %2225 = vmatmul.mubr.f32.gmra.mrb[2].mxu0 %v3047_v35 }
 0x15b   : > { %v2003_v5 = vpop.f32.mrb[0].mxu1 }
 0x15c   : > { %v702_v44 = vpop.f32.mrb[1].mxu1 }
 0x15f   : > { %v2006_v53 = vpop.f32.mrb[2].mxu1 }
 0x160   : > { %v712_v46 = vpop.f32.mrb[3].mxu1 }
 0x163   : > { %v2009_v13 = vpop.f32.mrb[4].mxu1 }
 0x164   : > { %v2185_v56 = vpop.f32.mrb[4].mxu0  ;;  %v722_v58 = vpop.f32.mrb[5].mxu1 }
 0x165   : > { %v2541_v59 = vadd.f32 %v2185_v56, %v2009_v13  ;;  %v1258_v55 = vpop.f32.mrb[5].mxu0 }
 0x166   : > { %v2543_v60 = vadd.f32 %v1258_v55, %v722_v58 }
 0x167   : > { %v2012_v18 = vpop.f32.mrb[6].mxu1 }
 0x168   : > { %v2188_v61 = vpop.f32.mrb[6].mxu0  ;;  %v732_v57 = vpop.f32.mrb[7].mxu1 }
 0x169   : > { %v2545_v1 = vadd.f32 %v2188_v61, %v2012_v18  ;;  %v1268_v24 = vpop.f32.mrb[7].mxu0 }
 0x16a   : > { %v2547_v0 = vadd.f32 %v1268_v24, %v732_v57 }
 0x17b   : > { %v2229_v40 = vpop.f32.mrb[8].mxu1 }
 0x17c   : > { %v2223_v35 = vpop.f32.mrb[0].mxu0  ;;  %v2542_v2 = vadd.f32 %v2541_v59, %v2229_v40  ;;  %v1392_v3 = vpop.f32.mrb[9].mxu1 }
 0x17d   : > { %v2537_v6 = vadd.f32 %v2223_v35, %v2003_v5  ;;  %v1372_v9 = vpop.f32.mrb[1].mxu0  ;;  %v2544_v34 = vadd.f32 %v2543_v60, %v1392_v3 }
 0x17e   : > { %1424 = vst [vmem:[%s143_s23 + $0x28] sm:$0xff] %v2542_v2  ;;  %v2538_v10 = vadd.f32 %v1372_v9, %v702_v44 }
 0x17f   : > { %1420 = vst [vmem:[%s143_s23 + $0x8] sm:$0xff] %v2537_v6  ;;  %1423 = vst [vmem:[%s143_s23 + $0x20] sm:$0xff] %v2544_v34  ;;  %v2232_v14 = vpop.f32.mrb[10].mxu1 }
 0x180   : > { %1419 = vst [vmem:[%s143_s23] sm:$0xff] %v2538_v10  ;;  %v2226_v47 = vpop.f32.mrb[2].mxu0  ;;  %v2546_v8 = vadd.f32 %v2545_v1, %v2232_v14  ;;  %v1402_v16 = vpop.f32.mrb[11].mxu1 }
 0x181   : > { %v2539_v12 = vadd.f32 %v2226_v47, %v2006_v53  ;;  %v1382_v19 = vpop.f32.mrb[3].mxu0  ;;  %v2548_v20 = vadd.f32 %v2547_v0, %v1402_v16 }
 0x182   : > { %1426 = vst [vmem:[%s143_s23 + $0x38] sm:$0xff] %v2546_v8  ;;  %v2540_v15 = vadd.f32 %v1382_v19, %v712_v46 }
 0x183   : > { %1422 = vst [vmem:[%s143_s23 + $0x18] sm:$0xff] %v2539_v12  ;;  %1425 = vst [vmem:[%s143_s23 + $0x30] sm:$0xff] %v2548_v20 }
 0x184   : > { %1421 = vst [vmem:[%s143_s23 + $0x10] sm:$0xff] %v2540_v15 }
 0x185 PF: > { %s12_s9 = sadd.s32 1, %s2616_s9  }
 0x186   : > { %p9_p4 = scmp.ge.s32.totalorder %s12_s9, 4  }
 0x188   :  { %11 = sbr.rel (!%p9_p4) target bundleno = 1 (0x1), region = 66 }

</bundles_post_ra>
